<compile_context>
chip_gen: v7x
topology: tpu7x:2x2x1
jax: 0.10.0
libtpu: 0.0.40
codegen_flags: <defaults>
</compile_context>

<pallas_src>
import functools
import math

import jax
import jax.numpy as jnp
import numpy as np
from jax import lax
from jax.experimental import pallas as pl
from jax.experimental.pallas import tpu as pltpu


# ----------------------------------------------------------------------------
# Sinusoidal positional-encoding table (same formula as get_positional_encoding)
# ----------------------------------------------------------------------------
def get_positional_encoding(max_len, d_model, T=1000.0):
    position = jnp.arange(0, max_len, dtype=jnp.float32)[:, None]          # (L, 1)
    div_term = jnp.exp(
        jnp.arange(0, d_model, 2, dtype=jnp.float32) * (-math.log(T) / d_model)
    )                                                                       # (d/2,)
    pe = jnp.zeros((max_len, d_model), dtype=jnp.float32)
    pe = pe.at[:, 0::2].set(jnp.sin(position * div_term))
    pe = pe.at[:, 1::2].set(jnp.cos(position * div_term))
    return pe


# ----------------------------------------------------------------------------
# Pallas kernel: GRU recurrence + fused Linear, batch-in-lanes layout
# ----------------------------------------------------------------------------
def _rnn_pe_kernel(x_ref, wih_ref, whh_ref, bih_ref, bhh_ref, wm_ref, bm_ref,
                   o_ref, *, dim):
    # x_ref   : (T, dim, BB)   embedded positions, time-major, batch on lanes
    # wih_ref : (3*dim, dim)   GRU weight_ih_l0 (PyTorch orientation, gates r,z,n)
    # whh_ref : (3*dim, dim)   GRU weight_hh_l0
    # bih_ref : (3*dim, 1)     bhh_ref: (3*dim, 1)
    # wm_ref  : (dim, dim)     mlp.weight (out, in)   bm_ref: (dim, 1)
    # o_ref   : (T, dim, BB)   (GRU -> Linear) output in the transposed layout
    seq_len, _, bb = x_ref.shape
    gdim = 3 * dim

    wih = wih_ref[...]                                   # (3*dim, dim)
    whh = whh_ref[...]                                   # (3*dim, dim)
    wm = wm_ref[...]                                     # (dim, dim)
    # Hoist loop-invariant lane broadcasts out of the time loop.
    bih_b = jnp.broadcast_to(bih_ref[...], (gdim, bb))   # (3*dim, BB)
    bhh_b = jnp.broadcast_to(bhh_ref[...], (gdim, bb))   # (3*dim, BB)
    bm_b = jnp.broadcast_to(bm_ref[...], (dim, bb))      # (dim, BB)

    def step(t, h):                                      # h: (dim, BB) in vregs
        x_t = x_ref[t]                                   # (dim, BB): 1 vreg @ dim=8
        # gi / gh via K == dim VPU broadcast-MACs.  The MXU would only put its
        # push/pop latency on the serial chain for an 8-deep contraction.
        gi = bih_b
        gh = bhh_b
        for d in range(dim):                             # static unroll over K
            gi = gi + wih[:, d:d + 1] * x_t[d:d + 1, :]  # (3*dim,1)*(1,BB)
            gh = gh + whh[:, d:d + 1] * h[d:d + 1, :]
        r = jax.nn.sigmoid(gi[0:dim] + gh[0:dim])
        z = jax.nn.sigmoid(gi[dim:2 * dim] + gh[dim:2 * dim])
        n = jnp.tanh(gi[2 * dim:gdim] + r * gh[2 * dim:gdim])
        h_new = (1.0 - z) * n + z * h
        # MLP fused per step: consumes h_new, feeds nothing back into the
        # recurrence, so it schedules off the serial dependence chain.
        y = bm_b
        for d in range(dim):
            y = y + wm[:, d:d + 1] * h_new[d:d + 1, :]
        o_ref[t] = y                                     # (dim, BB) lane-dense store
        return h_new

    h0 = jnp.zeros((dim, bb), jnp.float32)
    time_unroll = True if seq_len <= 16 else 8           # full unroll only for small T
    lax.fori_loop(0, seq_len, step, h0, unroll=time_unroll)


def rnn_positional_encoding(positions, pe_table, params, *, n_head):
    """positions: (B, T) int32. Returns (B, T, dim * n_head) float32."""
    dim = pe_table.shape[1]
    B, T = positions.shape
    wih, whh, bih, bhh, wm, bm = params                  # PyTorch orientation

    # Embedding lookup (glue: JAX gather), then batch-in-lanes / time-major.
    x_emb = pe_table[positions]                          # (B, T, dim)
    x_t = jnp.transpose(x_emb, (1, 2, 0))                # (T, dim, B)

    # Batch lives on the 128-lane axis; pad it to a multiple of 128.  One
    # 128-lane block per grid step -> lane-dense vregs/stores, and large B
    # gives multiple "parallel" grid steps (2 TCs on v7x).
    BB = 128
    B_pad = ((B + BB - 1) // BB) * BB
    if B_pad != B:
        x_t = jnp.pad(x_t, ((0, 0), (0, 0), (0, B_pad - B)))

    bih2 = bih.reshape(3 * dim, 1)
    bhh2 = bhh.reshape(3 * dim, 1)
    bm2 = bm.reshape(dim, 1)

    grid = (B_pad // BB,)

    def full(a):
        return pl.BlockSpec(a.shape, lambda b: (0,) * a.ndim)

    out_t = pl.pallas_call(
        functools.partial(_rnn_pe_kernel, dim=dim),
        out_shape=jax.ShapeDtypeStruct((T, dim, B_pad), jnp.float32),
        grid_spec=pltpu.PrefetchScalarGridSpec(
            num_scalar_prefetch=0,
            grid=grid,
            in_specs=[
                pl.BlockSpec((T, dim, BB), lambda b: (0, 0, b)),
                full(wih), full(whh), full(bih2), full(bhh2), full(wm), full(bm2),
            ],
            out_specs=pl.BlockSpec((T, dim, BB), lambda b: (0, 0, b)),
        ),
        compiler_params=pltpu.CompilerParams(
            dimension_semantics=("parallel",),
        ),
    )(x_t, wih, whh, bih2, bhh2, wm, bm2)

    out = jnp.transpose(out_t[:, :, :B], (2, 0, 1))      # (B, T, dim), strip padding
    # n_head duplication is pure data replication -> wrapper glue, not kernel
    # writeback (cuts kernel HBM output bytes by n_head x).
    return jnp.tile(out, (1, 1, n_head))                 # (B, T, dim*n_head)


# ----------------------------------------------------------------------------
# Pure-JAX reference (for correctness check)
# ----------------------------------------------------------------------------
def ref_forward(positions, pe_table, params, *, n_head):
    dim = pe_table.shape[1]
    wih, whh, bih, bhh, wm, bm = params
    x_emb = pe_table[positions]                          # (B, T, dim)
    B = x_emb.shape[0]

    def step(h, x_t):
        gi = x_t @ wih.T + bih
        gh = h @ whh.T + bhh
        r = jax.nn.sigmoid(gi[:, 0:dim] + gh[:, 0:dim])
        z = jax.nn.sigmoid(gi[:, dim:2 * dim] + gh[:, dim:2 * dim])
        n = jnp.tanh(gi[:, 2 * dim:3 * dim] + r * gh[:, 2 * dim:3 * dim])
        h_new = (1.0 - z) * n + z * h
        return h_new, h_new

    h0 = jnp.zeros((B, dim), jnp.float32)
    _, hs = jax.lax.scan(step, h0, jnp.transpose(x_emb, (1, 0, 2)))
    hs = jnp.transpose(hs, (1, 0, 2))                    # (B, T, dim)
    y = hs @ wm.T + bm
    return jnp.tile(y, (1, 1, n_head))


# ----------------------------------------------------------------------------
# Deterministic parameter construction (shapes from the module's __init__)
# ----------------------------------------------------------------------------
def make_params(key, dim):
    k = 1.0 / math.sqrt(dim)
    ks = jax.random.split(key, 6)
    # PyTorch GRU: weight_ih_l0 (3*dim, in), weight_hh_l0 (3*dim, dim), gate
    # order (r, z, n); biases (3*dim,).  mlp = nn.Linear(dim, dim).
    wih = jax.random.uniform(ks[0], (3 * dim, dim), jnp.float32, -k, k)
    whh = jax.random.uniform(ks[1], (3 * dim, dim), jnp.float32, -k, k)
    bih = jax.random.uniform(ks[2], (3 * dim,), jnp.float32, -k, k)
    bhh = jax.random.uniform(ks[3], (3 * dim,), jnp.float32, -k, k)
    wm = jax.random.uniform(ks[4], (dim, dim), jnp.float32, -k, k)
    bm = jax.random.uniform(ks[5], (dim,), jnp.float32, -k, k)
    return wih, whh, bih, bhh, wm, bm


if __name__ == "__main__":
    d_model = 32
    n_head = 4
    dim = d_model // n_head          # 8
    max_pos = 512
    B, T = 2, 8

    key = jax.random.PRNGKey(0)
    k_pos, k_par = jax.random.split(key)

    # sinusoid=True path: x holds integer positions (like dates / day-of-year)
    positions = jax.random.randint(k_pos, (B, T), 0, max_pos, dtype=jnp.int32)
    pe_table = get_positional_encoding(max_pos, dim, T=10000)
    params = make_params(k_par, dim)

    out = rnn_positional_encoding(positions, pe_table, params, n_head=n_head)
    out = jax.block_until_ready(out)

    ref = jax.block_until_ready(ref_forward(positions, pe_table, params, n_head=n_head))

    assert out.shape == (B, T, d_model), out.shape
    np.testing.assert_allclose(np.asarray(out), np.asarray(ref), rtol=1e-4, atol=1e-5)

    print("KERNEL_OK")
</pallas_src>

<mosaic_0001>
module attributes {stable_mosaic.version = 11 : i64} {
  func.func @_rnn_pe_kernel(%arg0: i32, %arg1: memref<8x8x128xf32, #tpu.memory_space<vmem>>, %arg2: memref<24x8xf32, #tpu.memory_space<vmem>>, %arg3: memref<24x8xf32, #tpu.memory_space<vmem>>, %arg4: memref<24x1xf32, #tpu.memory_space<vmem>>, %arg5: memref<24x1xf32, #tpu.memory_space<vmem>>, %arg6: memref<8x8xf32, #tpu.memory_space<vmem>>, %arg7: memref<8x1xf32, #tpu.memory_space<vmem>>, %arg8: memref<8x8x128xf32, #tpu.memory_space<vmem>>) attributes {dimension_semantics = [#tpu.dimension_semantics<parallel>], iteration_bounds = array<i64: 1>, scalar_prefetch = 0 : i64, scratch_operands = 0 : i64, tpu.core_type = #tpu.core_type<tc>, window_params = [{transform_indices = @transform_0, window_bounds = array<i64: 8, 8, 128>}, {pipeline_mode = #tpu.pipeline_mode<synchronous>, transform_indices = @transform_1, window_bounds = array<i64: 24, 8>}, {pipeline_mode = #tpu.pipeline_mode<synchronous>, transform_indices = @transform_2, window_bounds = array<i64: 24, 8>}, {pipeline_mode = #tpu.pipeline_mode<synchronous>, transform_indices = @transform_3, window_bounds = array<i64: 24, 1>}, {pipeline_mode = #tpu.pipeline_mode<synchronous>, transform_indices = @transform_4, window_bounds = array<i64: 24, 1>}, {pipeline_mode = #tpu.pipeline_mode<synchronous>, transform_indices = @transform_5, window_bounds = array<i64: 8, 8>}, {pipeline_mode = #tpu.pipeline_mode<synchronous>, transform_indices = @transform_6, window_bounds = array<i64: 8, 1>}, {transform_indices = @transform_7, window_bounds = array<i64: 8, 8, 128>}]} {
    %c0 = arith.constant 0 : index
    %c0_0 = arith.constant 0 : index
    %0 = vector.load %arg2[%c0, %c0_0] : memref<24x8xf32, #tpu.memory_space<vmem>>, vector<24x8xf32>
    %c0_1 = arith.constant 0 : index
    %c0_2 = arith.constant 0 : index
    %1 = vector.load %arg3[%c0_1, %c0_2] : memref<24x8xf32, #tpu.memory_space<vmem>>, vector<24x8xf32>
    %c0_3 = arith.constant 0 : index
    %c0_4 = arith.constant 0 : index
    %2 = vector.load %arg6[%c0_3, %c0_4] : memref<8x8xf32, #tpu.memory_space<vmem>>, vector<8x8xf32>
    %c0_5 = arith.constant 0 : index
    %c0_6 = arith.constant 0 : index
    %3 = vector.load %arg4[%c0_5, %c0_6] : memref<24x1xf32, #tpu.memory_space<vmem>>, vector<24x1xf32>
    %4 = vector.shape_cast %3 : vector<24x1xf32> to vector<24x1xf32>
    %5 = vector.broadcast %4 : vector<24x1xf32> to vector<24x128xf32>
    %c0_7 = arith.constant 0 : index
    %c0_8 = arith.constant 0 : index
    %6 = vector.load %arg5[%c0_7, %c0_8] : memref<24x1xf32, #tpu.memory_space<vmem>>, vector<24x1xf32>
    %7 = vector.shape_cast %6 : vector<24x1xf32> to vector<24x1xf32>
    %8 = vector.broadcast %7 : vector<24x1xf32> to vector<24x128xf32>
    %c0_9 = arith.constant 0 : index
    %c0_10 = arith.constant 0 : index
    %9 = vector.load %arg7[%c0_9, %c0_10] : memref<8x1xf32, #tpu.memory_space<vmem>>, vector<8x1xf32>
    %10 = vector.shape_cast %9 : vector<8x1xf32> to vector<8x1xf32>
    %11 = vector.broadcast %10 : vector<8x1xf32> to vector<8x128xf32>
    %cst = arith.constant 0.000000e+00 : f32
    %12 = vector.broadcast %cst : f32 to vector<8x128xf32>
    %c0_i32 = arith.constant 0 : i32
    %13 = arith.index_cast %c0_i32 : i32 to index
    %c0_11 = arith.constant 0 : index
    %c0_12 = arith.constant 0 : index
    %14 = vector.load %arg1[%13, %c0_11, %c0_12] : memref<8x8x128xf32, #tpu.memory_space<vmem>>, vector<1x8x128xf32>
    %15 = vector.shape_cast %14 : vector<1x8x128xf32> to vector<8x128xf32>
    %16 = vector.extract_strided_slice %0 {offsets = [0, 0], sizes = [24, 1], strides = [1, 1]} : vector<24x8xf32> to vector<24x1xf32>
    %17 = vector.extract_strided_slice %15 {offsets = [0, 0], sizes = [1, 128], strides = [1, 1]} : vector<8x128xf32> to vector<1x128xf32>
    %18 = vector.broadcast %16 : vector<24x1xf32> to vector<24x128xf32>
    %19 = vector.broadcast %17 : vector<1x128xf32> to vector<24x128xf32>
    %20 = arith.mulf %18, %19 : vector<24x128xf32>
    %21 = arith.addf %5, %20 : vector<24x128xf32>
    %22 = vector.extract_strided_slice %1 {offsets = [0, 0], sizes = [24, 1], strides = [1, 1]} : vector<24x8xf32> to vector<24x1xf32>
    %23 = vector.extract_strided_slice %12 {offsets = [0, 0], sizes = [1, 128], strides = [1, 1]} : vector<8x128xf32> to vector<1x128xf32>
    %24 = vector.broadcast %22 : vector<24x1xf32> to vector<24x128xf32>
    %25 = vector.broadcast %23 : vector<1x128xf32> to vector<24x128xf32>
    %26 = arith.mulf %24, %25 : vector<24x128xf32>
    %27 = arith.addf %8, %26 : vector<24x128xf32>
    %28 = vector.extract_strided_slice %0 {offsets = [0, 1], sizes = [24, 1], strides = [1, 1]} : vector<24x8xf32> to vector<24x1xf32>
    %29 = vector.extract_strided_slice %15 {offsets = [1, 0], sizes = [1, 128], strides = [1, 1]} : vector<8x128xf32> to vector<1x128xf32>
    %30 = vector.broadcast %28 : vector<24x1xf32> to vector<24x128xf32>
    %31 = vector.broadcast %29 : vector<1x128xf32> to vector<24x128xf32>
    %32 = arith.mulf %30, %31 : vector<24x128xf32>
    %33 = arith.addf %21, %32 : vector<24x128xf32>
    %34 = vector.extract_strided_slice %1 {offsets = [0, 1], sizes = [24, 1], strides = [1, 1]} : vector<24x8xf32> to vector<24x1xf32>
    %35 = vector.extract_strided_slice %12 {offsets = [1, 0], sizes = [1, 128], strides = [1, 1]} : vector<8x128xf32> to vector<1x128xf32>
    %36 = vector.broadcast %34 : vector<24x1xf32> to vector<24x128xf32>
    %37 = vector.broadcast %35 : vector<1x128xf32> to vector<24x128xf32>
    %38 = arith.mulf %36, %37 : vector<24x128xf32>
    %39 = arith.addf %27, %38 : vector<24x128xf32>
    %40 = vector.extract_strided_slice %0 {offsets = [0, 2], sizes = [24, 1], strides = [1, 1]} : vector<24x8xf32> to vector<24x1xf32>
    %41 = vector.extract_strided_slice %15 {offsets = [2, 0], sizes = [1, 128], strides = [1, 1]} : vector<8x128xf32> to vector<1x128xf32>
    %42 = vector.broadcast %40 : vector<24x1xf32> to vector<24x128xf32>
    %43 = vector.broadcast %41 : vector<1x128xf32> to vector<24x128xf32>
    %44 = arith.mulf %42, %43 : vector<24x128xf32>
    %45 = arith.addf %33, %44 : vector<24x128xf32>
    %46 = vector.extract_strided_slice %1 {offsets = [0, 2], sizes = [24, 1], strides = [1, 1]} : vector<24x8xf32> to vector<24x1xf32>
    %47 = vector.extract_strided_slice %12 {offsets = [2, 0], sizes = [1, 128], strides = [1, 1]} : vector<8x128xf32> to vector<1x128xf32>
    %48 = vector.broadcast %46 : vector<24x1xf32> to vector<24x128xf32>
    %49 = vector.broadcast %47 : vector<1x128xf32> to vector<24x128xf32>
    %50 = arith.mulf %48, %49 : vector<24x128xf32>
    %51 = arith.addf %39, %50 : vector<24x128xf32>
    %52 = vector.extract_strided_slice %0 {offsets = [0, 3], sizes = [24, 1], strides = [1, 1]} : vector<24x8xf32> to vector<24x1xf32>
    %53 = vector.extract_strided_slice %15 {offsets = [3, 0], sizes = [1, 128], strides = [1, 1]} : vector<8x128xf32> to vector<1x128xf32>
    %54 = vector.broadcast %52 : vector<24x1xf32> to vector<24x128xf32>
    %55 = vector.broadcast %53 : vector<1x128xf32> to vector<24x128xf32>
    %56 = arith.mulf %54, %55 : vector<24x128xf32>
    %57 = arith.addf %45, %56 : vector<24x128xf32>
    %58 = vector.extract_strided_slice %1 {offsets = [0, 3], sizes = [24, 1], strides = [1, 1]} : vector<24x8xf32> to vector<24x1xf32>
    %59 = vector.extract_strided_slice %12 {offsets = [3, 0], sizes = [1, 128], strides = [1, 1]} : vector<8x128xf32> to vector<1x128xf32>
    %60 = vector.broadcast %58 : vector<24x1xf32> to vector<24x128xf32>
    %61 = vector.broadcast %59 : vector<1x128xf32> to vector<24x128xf32>
    %62 = arith.mulf %60, %61 : vector<24x128xf32>
    %63 = arith.addf %51, %62 : vector<24x128xf32>
    %64 = vector.extract_strided_slice %0 {offsets = [0, 4], sizes = [24, 1], strides = [1, 1]} : vector<24x8xf32> to vector<24x1xf32>
    %65 = vector.extract_strided_slice %15 {offsets = [4, 0], sizes = [1, 128], strides = [1, 1]} : vector<8x128xf32> to vector<1x128xf32>
    %66 = vector.broadcast %64 : vector<24x1xf32> to vector<24x128xf32>
    %67 = vector.broadcast %65 : vector<1x128xf32> to vector<24x128xf32>
    %68 = arith.mulf %66, %67 : vector<24x128xf32>
    %69 = arith.addf %57, %68 : vector<24x128xf32>
    %70 = vector.extract_strided_slice %1 {offsets = [0, 4], sizes = [24, 1], strides = [1, 1]} : vector<24x8xf32> to vector<24x1xf32>
    %71 = vector.extract_strided_slice %12 {offsets = [4, 0], sizes = [1, 128], strides = [1, 1]} : vector<8x128xf32> to vector<1x128xf32>
    %72 = vector.broadcast %70 : vector<24x1xf32> to vector<24x128xf32>
    %73 = vector.broadcast %71 : vector<1x128xf32> to vector<24x128xf32>
    %74 = arith.mulf %72, %73 : vector<24x128xf32>
    %75 = arith.addf %63, %74 : vector<24x128xf32>
    %76 = vector.extract_strided_slice %0 {offsets = [0, 5], sizes = [24, 1], strides = [1, 1]} : vector<24x8xf32> to vector<24x1xf32>
    %77 = vector.extract_strided_slice %15 {offsets = [5, 0], sizes = [1, 128], strides = [1, 1]} : vector<8x128xf32> to vector<1x128xf32>
    %78 = vector.broadcast %76 : vector<24x1xf32> to vector<24x128xf32>
    %79 = vector.broadcast %77 : vector<1x128xf32> to vector<24x128xf32>
    %80 = arith.mulf %78, %79 : vector<24x128xf32>
    %81 = arith.addf %69, %80 : vector<24x128xf32>
    %82 = vector.extract_strided_slice %1 {offsets = [0, 5], sizes = [24, 1], strides = [1, 1]} : vector<24x8xf32> to vector<24x1xf32>
    %83 = vector.extract_strided_slice %12 {offsets = [5, 0], sizes = [1, 128], strides = [1, 1]} : vector<8x128xf32> to vector<1x128xf32>
    %84 = vector.broadcast %82 : vector<24x1xf32> to vector<24x128xf32>
    %85 = vector.broadcast %83 : vector<1x128xf32> to vector<24x128xf32>
    %86 = arith.mulf %84, %85 : vector<24x128xf32>
    %87 = arith.addf %75, %86 : vector<24x128xf32>
    %88 = vector.extract_strided_slice %0 {offsets = [0, 6], sizes = [24, 1], strides = [1, 1]} : vector<24x8xf32> to vector<24x1xf32>
    %89 = vector.extract_strided_slice %15 {offsets = [6, 0], sizes = [1, 128], strides = [1, 1]} : vector<8x128xf32> to vector<1x128xf32>
    %90 = vector.broadcast %88 : vector<24x1xf32> to vector<24x128xf32>
    %91 = vector.broadcast %89 : vector<1x128xf32> to vector<24x128xf32>
    %92 = arith.mulf %90, %91 : vector<24x128xf32>
    %93 = arith.addf %81, %92 : vector<24x128xf32>
    %94 = vector.extract_strided_slice %1 {offsets = [0, 6], sizes = [24, 1], strides = [1, 1]} : vector<24x8xf32> to vector<24x1xf32>
    %95 = vector.extract_strided_slice %12 {offsets = [6, 0], sizes = [1, 128], strides = [1, 1]} : vector<8x128xf32> to vector<1x128xf32>
    %96 = vector.broadcast %94 : vector<24x1xf32> to vector<24x128xf32>
    %97 = vector.broadcast %95 : vector<1x128xf32> to vector<24x128xf32>
    %98 = arith.mulf %96, %97 : vector<24x128xf32>
    %99 = arith.addf %87, %98 : vector<24x128xf32>
    %100 = vector.extract_strided_slice %0 {offsets = [0, 7], sizes = [24, 1], strides = [1, 1]} : vector<24x8xf32> to vector<24x1xf32>
    %101 = vector.extract_strided_slice %15 {offsets = [7, 0], sizes = [1, 128], strides = [1, 1]} : vector<8x128xf32> to vector<1x128xf32>
    %102 = vector.broadcast %100 : vector<24x1xf32> to vector<24x128xf32>
    %103 = vector.broadcast %101 : vector<1x128xf32> to vector<24x128xf32>
    %104 = arith.mulf %102, %103 : vector<24x128xf32>
    %105 = arith.addf %93, %104 : vector<24x128xf32>
    %106 = vector.extract_strided_slice %1 {offsets = [0, 7], sizes = [24, 1], strides = [1, 1]} : vector<24x8xf32> to vector<24x1xf32>
    %107 = vector.extract_strided_slice %12 {offsets = [7, 0], sizes = [1, 128], strides = [1, 1]} : vector<8x128xf32> to vector<1x128xf32>
    %108 = vector.broadcast %106 : vector<24x1xf32> to vector<24x128xf32>
    %109 = vector.broadcast %107 : vector<1x128xf32> to vector<24x128xf32>
    %110 = arith.mulf %108, %109 : vector<24x128xf32>
    %111 = arith.addf %99, %110 : vector<24x128xf32>
    %112 = vector.extract_strided_slice %105 {offsets = [0, 0], sizes = [8, 128], strides = [1, 1]} : vector<24x128xf32> to vector<8x128xf32>
    %113 = vector.extract_strided_slice %111 {offsets = [0, 0], sizes = [8, 128], strides = [1, 1]} : vector<24x128xf32> to vector<8x128xf32>
    %114 = arith.addf %112, %113 : vector<8x128xf32>
    %115 = arith.negf %114 : vector<8x128xf32>
    %116 = math.exp %115 : vector<8x128xf32>
    %cst_13 = arith.constant 1.000000e+00 : f32
    %117 = vector.broadcast %cst_13 : f32 to vector<8x128xf32>
    %118 = arith.addf %117, %116 : vector<8x128xf32>
    %119 = arith.divf %117, %118 : vector<8x128xf32>
    %120 = vector.extract_strided_slice %105 {offsets = [8, 0], sizes = [8, 128], strides = [1, 1]} : vector<24x128xf32> to vector<8x128xf32>
    %121 = vector.extract_strided_slice %111 {offsets = [8, 0], sizes = [8, 128], strides = [1, 1]} : vector<24x128xf32> to vector<8x128xf32>
    %122 = arith.addf %120, %121 : vector<8x128xf32>
    %123 = arith.negf %122 : vector<8x128xf32>
    %124 = math.exp %123 : vector<8x128xf32>
    %cst_14 = arith.constant 1.000000e+00 : f32
    %125 = vector.broadcast %cst_14 : f32 to vector<8x128xf32>
    %126 = arith.addf %125, %124 : vector<8x128xf32>
    %127 = arith.divf %125, %126 : vector<8x128xf32>
    %128 = vector.extract_strided_slice %105 {offsets = [16, 0], sizes = [8, 128], strides = [1, 1]} : vector<24x128xf32> to vector<8x128xf32>
    %129 = vector.extract_strided_slice %111 {offsets = [16, 0], sizes = [8, 128], strides = [1, 1]} : vector<24x128xf32> to vector<8x128xf32>
    %130 = arith.mulf %119, %129 : vector<8x128xf32>
    %131 = arith.addf %128, %130 : vector<8x128xf32>
    %132 = math.tanh %131 : vector<8x128xf32>
    %cst_15 = arith.constant 1.000000e+00 : f32
    %133 = vector.broadcast %cst_15 : f32 to vector<8x128xf32>
    %134 = arith.subf %133, %127 : vector<8x128xf32>
    %135 = arith.mulf %134, %132 : vector<8x128xf32>
    %136 = arith.mulf %127, %12 : vector<8x128xf32>
    %137 = arith.addf %135, %136 : vector<8x128xf32>
    %138 = vector.extract_strided_slice %2 {offsets = [0, 0], sizes = [8, 1], strides = [1, 1]} : vector<8x8xf32> to vector<8x1xf32>
    %139 = vector.extract_strided_slice %137 {offsets = [0, 0], sizes = [1, 128], strides = [1, 1]} : vector<8x128xf32> to vector<1x128xf32>
    %140 = vector.broadcast %138 : vector<8x1xf32> to vector<8x128xf32>
    %141 = vector.broadcast %139 : vector<1x128xf32> to vector<8x128xf32>
    %142 = arith.mulf %140, %141 : vector<8x128xf32>
    %143 = arith.addf %11, %142 : vector<8x128xf32>
    %144 = vector.extract_strided_slice %2 {offsets = [0, 1], sizes = [8, 1], strides = [1, 1]} : vector<8x8xf32> to vector<8x1xf32>
    %145 = vector.extract_strided_slice %137 {offsets = [1, 0], sizes = [1, 128], strides = [1, 1]} : vector<8x128xf32> to vector<1x128xf32>
    %146 = vector.broadcast %144 : vector<8x1xf32> to vector<8x128xf32>
    %147 = vector.broadcast %145 : vector<1x128xf32> to vector<8x128xf32>
    %148 = arith.mulf %146, %147 : vector<8x128xf32>
    %149 = arith.addf %143, %148 : vector<8x128xf32>
    %150 = vector.extract_strided_slice %2 {offsets = [0, 2], sizes = [8, 1], strides = [1, 1]} : vector<8x8xf32> to vector<8x1xf32>
    %151 = vector.extract_strided_slice %137 {offsets = [2, 0], sizes = [1, 128], strides = [1, 1]} : vector<8x128xf32> to vector<1x128xf32>
    %152 = vector.broadcast %150 : vector<8x1xf32> to vector<8x128xf32>
    %153 = vector.broadcast %151 : vector<1x128xf32> to vector<8x128xf32>
    %154 = arith.mulf %152, %153 : vector<8x128xf32>
    %155 = arith.addf %149, %154 : vector<8x128xf32>
    %156 = vector.extract_strided_slice %2 {offsets = [0, 3], sizes = [8, 1], strides = [1, 1]} : vector<8x8xf32> to vector<8x1xf32>
    %157 = vector.extract_strided_slice %137 {offsets = [3, 0], sizes = [1, 128], strides = [1, 1]} : vector<8x128xf32> to vector<1x128xf32>
    %158 = vector.broadcast %156 : vector<8x1xf32> to vector<8x128xf32>
    %159 = vector.broadcast %157 : vector<1x128xf32> to vector<8x128xf32>
    %160 = arith.mulf %158, %159 : vector<8x128xf32>
    %161 = arith.addf %155, %160 : vector<8x128xf32>
    %162 = vector.extract_strided_slice %2 {offsets = [0, 4], sizes = [8, 1], strides = [1, 1]} : vector<8x8xf32> to vector<8x1xf32>
    %163 = vector.extract_strided_slice %137 {offsets = [4, 0], sizes = [1, 128], strides = [1, 1]} : vector<8x128xf32> to vector<1x128xf32>
    %164 = vector.broadcast %162 : vector<8x1xf32> to vector<8x128xf32>
    %165 = vector.broadcast %163 : vector<1x128xf32> to vector<8x128xf32>
    %166 = arith.mulf %164, %165 : vector<8x128xf32>
    %167 = arith.addf %161, %166 : vector<8x128xf32>
    %168 = vector.extract_strided_slice %2 {offsets = [0, 5], sizes = [8, 1], strides = [1, 1]} : vector<8x8xf32> to vector<8x1xf32>
    %169 = vector.extract_strided_slice %137 {offsets = [5, 0], sizes = [1, 128], strides = [1, 1]} : vector<8x128xf32> to vector<1x128xf32>
    %170 = vector.broadcast %168 : vector<8x1xf32> to vector<8x128xf32>
    %171 = vector.broadcast %169 : vector<1x128xf32> to vector<8x128xf32>
    %172 = arith.mulf %170, %171 : vector<8x128xf32>
    %173 = arith.addf %167, %172 : vector<8x128xf32>
    %174 = vector.extract_strided_slice %2 {offsets = [0, 6], sizes = [8, 1], strides = [1, 1]} : vector<8x8xf32> to vector<8x1xf32>
    %175 = vector.extract_strided_slice %137 {offsets = [6, 0], sizes = [1, 128], strides = [1, 1]} : vector<8x128xf32> to vector<1x128xf32>
    %176 = vector.broadcast %174 : vector<8x1xf32> to vector<8x128xf32>
    %177 = vector.broadcast %175 : vector<1x128xf32> to vector<8x128xf32>
    %178 = arith.mulf %176, %177 : vector<8x128xf32>
    %179 = arith.addf %173, %178 : vector<8x128xf32>
    %180 = vector.extract_strided_slice %2 {offsets = [0, 7], sizes = [8, 1], strides = [1, 1]} : vector<8x8xf32> to vector<8x1xf32>
    %181 = vector.extract_strided_slice %137 {offsets = [7, 0], sizes = [1, 128], strides = [1, 1]} : vector<8x128xf32> to vector<1x128xf32>
    %182 = vector.broadcast %180 : vector<8x1xf32> to vector<8x128xf32>
    %183 = vector.broadcast %181 : vector<1x128xf32> to vector<8x128xf32>
    %184 = arith.mulf %182, %183 : vector<8x128xf32>
    %185 = arith.addf %179, %184 : vector<8x128xf32>
    %186 = arith.index_cast %c0_i32 : i32 to index
    %c0_16 = arith.constant 0 : index
    %c0_17 = arith.constant 0 : index
    %187 = vector.load %arg8[%186, %c0_16, %c0_17] : memref<8x8x128xf32, #tpu.memory_space<vmem>>, vector<1x8x128xf32>
    %188 = vector.shape_cast %187 : vector<1x8x128xf32> to vector<8x128xf32>
    %189 = vector.shape_cast %185 : vector<8x128xf32> to vector<1x8x128xf32>
    tpu.vector_store %arg8[%186, %c0_16, %c0_17], %189 {strides = array<i32>} : memref<8x8x128xf32, #tpu.memory_space<vmem>>, vector<1x8x128xf32>,
    %c1_i32 = arith.constant 1 : i32
    %190 = arith.index_cast %c1_i32 : i32 to index
    %c0_18 = arith.constant 0 : index
    %c0_19 = arith.constant 0 : index
    %191 = vector.load %arg1[%190, %c0_18, %c0_19] : memref<8x8x128xf32, #tpu.memory_space<vmem>>, vector<1x8x128xf32>
    %192 = vector.shape_cast %191 : vector<1x8x128xf32> to vector<8x128xf32>
    %193 = vector.extract_strided_slice %0 {offsets = [0, 0], sizes = [24, 1], strides = [1, 1]} : vector<24x8xf32> to vector<24x1xf32>
    %194 = vector.extract_strided_slice %192 {offsets = [0, 0], sizes = [1, 128], strides = [1, 1]} : vector<8x128xf32> to vector<1x128xf32>
    %195 = vector.broadcast %193 : vector<24x1xf32> to vector<24x128xf32>
    %196 = vector.broadcast %194 : vector<1x128xf32> to vector<24x128xf32>
    %197 = arith.mulf %195, %196 : vector<24x128xf32>
    %198 = arith.addf %5, %197 : vector<24x128xf32>
    %199 = vector.extract_strided_slice %1 {offsets = [0, 0], sizes = [24, 1], strides = [1, 1]} : vector<24x8xf32> to vector<24x1xf32>
    %200 = vector.extract_strided_slice %137 {offsets = [0, 0], sizes = [1, 128], strides = [1, 1]} : vector<8x128xf32> to vector<1x128xf32>
    %201 = vector.broadcast %199 : vector<24x1xf32> to vector<24x128xf32>
    %202 = vector.broadcast %200 : vector<1x128xf32> to vector<24x128xf32>
    %203 = arith.mulf %201, %202 : vector<24x128xf32>
    %204 = arith.addf %8, %203 : vector<24x128xf32>
    %205 = vector.extract_strided_slice %0 {offsets = [0, 1], sizes = [24, 1], strides = [1, 1]} : vector<24x8xf32> to vector<24x1xf32>
    %206 = vector.extract_strided_slice %192 {offsets = [1, 0], sizes = [1, 128], strides = [1, 1]} : vector<8x128xf32> to vector<1x128xf32>
    %207 = vector.broadcast %205 : vector<24x1xf32> to vector<24x128xf32>
    %208 = vector.broadcast %206 : vector<1x128xf32> to vector<24x128xf32>
    %209 = arith.mulf %207, %208 : vector<24x128xf32>
    %210 = arith.addf %198, %209 : vector<24x128xf32>
    %211 = vector.extract_strided_slice %1 {offsets = [0, 1], sizes = [24, 1], strides = [1, 1]} : vector<24x8xf32> to vector<24x1xf32>
    %212 = vector.extract_strided_slice %137 {offsets = [1, 0], sizes = [1, 128], strides = [1, 1]} : vector<8x128xf32> to vector<1x128xf32>
    %213 = vector.broadcast %211 : vector<24x1xf32> to vector<24x128xf32>
    %214 = vector.broadcast %212 : vector<1x128xf32> to vector<24x128xf32>
    %215 = arith.mulf %213, %214 : vector<24x128xf32>
    %216 = arith.addf %204, %215 : vector<24x128xf32>
    %217 = vector.extract_strided_slice %0 {offsets = [0, 2], sizes = [24, 1], strides = [1, 1]} : vector<24x8xf32> to vector<24x1xf32>
    %218 = vector.extract_strided_slice %192 {offsets = [2, 0], sizes = [1, 128], strides = [1, 1]} : vector<8x128xf32> to vector<1x128xf32>
    %219 = vector.broadcast %217 : vector<24x1xf32> to vector<24x128xf32>
    %220 = vector.broadcast %218 : vector<1x128xf32> to vector<24x128xf32>
    %221 = arith.mulf %219, %220 : vector<24x128xf32>
    %222 = arith.addf %210, %221 : vector<24x128xf32>
    %223 = vector.extract_strided_slice %1 {offsets = [0, 2], sizes = [24, 1], strides = [1, 1]} : vector<24x8xf32> to vector<24x1xf32>
    %224 = vector.extract_strided_slice %137 {offsets = [2, 0], sizes = [1, 128], strides = [1, 1]} : vector<8x128xf32> to vector<1x128xf32>
    %225 = vector.broadcast %223 : vector<24x1xf32> to vector<24x128xf32>
    %226 = vector.broadcast %224 : vector<1x128xf32> to vector<24x128xf32>
    %227 = arith.mulf %225, %226 : vector<24x128xf32>
    %228 = arith.addf %216, %227 : vector<24x128xf32>
    %229 = vector.extract_strided_slice %0 {offsets = [0, 3], sizes = [24, 1], strides = [1, 1]} : vector<24x8xf32> to vector<24x1xf32>
    %230 = vector.extract_strided_slice %192 {offsets = [3, 0], sizes = [1, 128], strides = [1, 1]} : vector<8x128xf32> to vector<1x128xf32>
    %231 = vector.broadcast %229 : vector<24x1xf32> to vector<24x128xf32>
    %232 = vector.broadcast %230 : vector<1x128xf32> to vector<24x128xf32>
    %233 = arith.mulf %231, %232 : vector<24x128xf32>
    %234 = arith.addf %222, %233 : vector<24x128xf32>
    %235 = vector.extract_strided_slice %1 {offsets = [0, 3], sizes = [24, 1], strides = [1, 1]} : vector<24x8xf32> to vector<24x1xf32>
    %236 = vector.extract_strided_slice %137 {offsets = [3, 0], sizes = [1, 128], strides = [1, 1]} : vector<8x128xf32> to vector<1x128xf32>
    %237 = vector.broadcast %235 : vector<24x1xf32> to vector<24x128xf32>
    %238 = vector.broadcast %236 : vector<1x128xf32> to vector<24x128xf32>
    %239 = arith.mulf %237, %238 : vector<24x128xf32>
    %240 = arith.addf %228, %239 : vector<24x128xf32>
    %241 = vector.extract_strided_slice %0 {offsets = [0, 4], sizes = [24, 1], strides = [1, 1]} : vector<24x8xf32> to vector<24x1xf32>
    %242 = vector.extract_strided_slice %192 {offsets = [4, 0], sizes = [1, 128], strides = [1, 1]} : vector<8x128xf32> to vector<1x128xf32>
    %243 = vector.broadcast %241 : vector<24x1xf32> to vector<24x128xf32>
    %244 = vector.broadcast %242 : vector<1x128xf32> to vector<24x128xf32>
    %245 = arith.mulf %243, %244 : vector<24x128xf32>
    %246 = arith.addf %234, %245 : vector<24x128xf32>
    %247 = vector.extract_strided_slice %1 {offsets = [0, 4], sizes = [24, 1], strides = [1, 1]} : vector<24x8xf32> to vector<24x1xf32>
    %248 = vector.extract_strided_slice %137 {offsets = [4, 0], sizes = [1, 128], strides = [1, 1]} : vector<8x128xf32> to vector<1x128xf32>
    %249 = vector.broadcast %247 : vector<24x1xf32> to vector<24x128xf32>
    %250 = vector.broadcast %248 : vector<1x128xf32> to vector<24x128xf32>
    %251 = arith.mulf %249, %250 : vector<24x128xf32>
    %252 = arith.addf %240, %251 : vector<24x128xf32>
    %253 = vector.extract_strided_slice %0 {offsets = [0, 5], sizes = [24, 1], strides = [1, 1]} : vector<24x8xf32> to vector<24x1xf32>
    %254 = vector.extract_strided_slice %192 {offsets = [5, 0], sizes = [1, 128], strides = [1, 1]} : vector<8x128xf32> to vector<1x128xf32>
    %255 = vector.broadcast %253 : vector<24x1xf32> to vector<24x128xf32>
    %256 = vector.broadcast %254 : vector<1x128xf32> to vector<24x128xf32>
    %257 = arith.mulf %255, %256 : vector<24x128xf32>
    %258 = arith.addf %246, %257 : vector<24x128xf32>
    %259 = vector.extract_strided_slice %1 {offsets = [0, 5], sizes = [24, 1], strides = [1, 1]} : vector<24x8xf32> to vector<24x1xf32>
    %260 = vector.extract_strided_slice %137 {offsets = [5, 0], sizes = [1, 128], strides = [1, 1]} : vector<8x128xf32> to vector<1x128xf32>
    %261 = vector.broadcast %259 : vector<24x1xf32> to vector<24x128xf32>
    %262 = vector.broadcast %260 : vector<1x128xf32> to vector<24x128xf32>
    %263 = arith.mulf %261, %262 : vector<24x128xf32>
    %264 = arith.addf %252, %263 : vector<24x128xf32>
    %265 = vector.extract_strided_slice %0 {offsets = [0, 6], sizes = [24, 1], strides = [1, 1]} : vector<24x8xf32> to vector<24x1xf32>
    %266 = vector.extract_strided_slice %192 {offsets = [6, 0], sizes = [1, 128], strides = [1, 1]} : vector<8x128xf32> to vector<1x128xf32>
    %267 = vector.broadcast %265 : vector<24x1xf32> to vector<24x128xf32>
    %268 = vector.broadcast %266 : vector<1x128xf32> to vector<24x128xf32>
    %269 = arith.mulf %267, %268 : vector<24x128xf32>
    %270 = arith.addf %258, %269 : vector<24x128xf32>
    %271 = vector.extract_strided_slice %1 {offsets = [0, 6], sizes = [24, 1], strides = [1, 1]} : vector<24x8xf32> to vector<24x1xf32>
    %272 = vector.extract_strided_slice %137 {offsets = [6, 0], sizes = [1, 128], strides = [1, 1]} : vector<8x128xf32> to vector<1x128xf32>
    %273 = vector.broadcast %271 : vector<24x1xf32> to vector<24x128xf32>
    %274 = vector.broadcast %272 : vector<1x128xf32> to vector<24x128xf32>
    %275 = arith.mulf %273, %274 : vector<24x128xf32>
    %276 = arith.addf %264, %275 : vector<24x128xf32>
    %277 = vector.extract_strided_slice %0 {offsets = [0, 7], sizes = [24, 1], strides = [1, 1]} : vector<24x8xf32> to vector<24x1xf32>
    %278 = vector.extract_strided_slice %192 {offsets = [7, 0], sizes = [1, 128], strides = [1, 1]} : vector<8x128xf32> to vector<1x128xf32>
    %279 = vector.broadcast %277 : vector<24x1xf32> to vector<24x128xf32>
    %280 = vector.broadcast %278 : vector<1x128xf32> to vector<24x128xf32>
    %281 = arith.mulf %279, %280 : vector<24x128xf32>
    %282 = arith.addf %270, %281 : vector<24x128xf32>
    %283 = vector.extract_strided_slice %1 {offsets = [0, 7], sizes = [24, 1], strides = [1, 1]} : vector<24x8xf32> to vector<24x1xf32>
    %284 = vector.extract_strided_slice %137 {offsets = [7, 0], sizes = [1, 128], strides = [1, 1]} : vector<8x128xf32> to vector<1x128xf32>
    %285 = vector.broadcast %283 : vector<24x1xf32> to vector<24x128xf32>
    %286 = vector.broadcast %284 : vector<1x128xf32> to vector<24x128xf32>
    %287 = arith.mulf %285, %286 : vector<24x128xf32>
    %288 = arith.addf %276, %287 : vector<24x128xf32>
    %289 = vector.extract_strided_slice %282 {offsets = [0, 0], sizes = [8, 128], strides = [1, 1]} : vector<24x128xf32> to vector<8x128xf32>
    %290 = vector.extract_strided_slice %288 {offsets = [0, 0], sizes = [8, 128], strides = [1, 1]} : vector<24x128xf32> to vector<8x128xf32>
    %291 = arith.addf %289, %290 : vector<8x128xf32>
    %292 = arith.negf %291 : vector<8x128xf32>
    %293 = math.exp %292 : vector<8x128xf32>
    %cst_20 = arith.constant 1.000000e+00 : f32
    %294 = vector.broadcast %cst_20 : f32 to vector<8x128xf32>
    %295 = arith.addf %294, %293 : vector<8x128xf32>
    %296 = arith.divf %294, %295 : vector<8x128xf32>
    %297 = vector.extract_strided_slice %282 {offsets = [8, 0], sizes = [8, 128], strides = [1, 1]} : vector<24x128xf32> to vector<8x128xf32>
    %298 = vector.extract_strided_slice %288 {offsets = [8, 0], sizes = [8, 128], strides = [1, 1]} : vector<24x128xf32> to vector<8x128xf32>
    %299 = arith.addf %297, %298 : vector<8x128xf32>
    %300 = arith.negf %299 : vector<8x128xf32>
    %301 = math.exp %300 : vector<8x128xf32>
    %cst_21 = arith.constant 1.000000e+00 : f32
    %302 = vector.broadcast %cst_21 : f32 to vector<8x128xf32>
    %303 = arith.addf %302, %301 : vector<8x128xf32>
    %304 = arith.divf %302, %303 : vector<8x128xf32>
    %305 = vector.extract_strided_slice %282 {offsets = [16, 0], sizes = [8, 128], strides = [1, 1]} : vector<24x128xf32> to vector<8x128xf32>
    %306 = vector.extract_strided_slice %288 {offsets = [16, 0], sizes = [8, 128], strides = [1, 1]} : vector<24x128xf32> to vector<8x128xf32>
    %307 = arith.mulf %296, %306 : vector<8x128xf32>
    %308 = arith.addf %305, %307 : vector<8x128xf32>
    %309 = math.tanh %308 : vector<8x128xf32>
    %cst_22 = arith.constant 1.000000e+00 : f32
    %310 = vector.broadcast %cst_22 : f32 to vector<8x128xf32>
    %311 = arith.subf %310, %304 : vector<8x128xf32>
    %312 = arith.mulf %311, %309 : vector<8x128xf32>
    %313 = arith.mulf %304, %137 : vector<8x128xf32>
    %314 = arith.addf %312, %313 : vector<8x128xf32>
    %315 = vector.extract_strided_slice %2 {offsets = [0, 0], sizes = [8, 1], strides = [1, 1]} : vector<8x8xf32> to vector<8x1xf32>
    %316 = vector.extract_strided_slice %314 {offsets = [0, 0], sizes = [1, 128], strides = [1, 1]} : vector<8x128xf32> to vector<1x128xf32>
    %317 = vector.broadcast %315 : vector<8x1xf32> to vector<8x128xf32>
    %318 = vector.broadcast %316 : vector<1x128xf32> to vector<8x128xf32>
    %319 = arith.mulf %317, %318 : vector<8x128xf32>
    %320 = arith.addf %11, %319 : vector<8x128xf32>
    %321 = vector.extract_strided_slice %2 {offsets = [0, 1], sizes = [8, 1], strides = [1, 1]} : vector<8x8xf32> to vector<8x1xf32>
    %322 = vector.extract_strided_slice %314 {offsets = [1, 0], sizes = [1, 128], strides = [1, 1]} : vector<8x128xf32> to vector<1x128xf32>
    %323 = vector.broadcast %321 : vector<8x1xf32> to vector<8x128xf32>
    %324 = vector.broadcast %322 : vector<1x128xf32> to vector<8x128xf32>
    %325 = arith.mulf %323, %324 : vector<8x128xf32>
    %326 = arith.addf %320, %325 : vector<8x128xf32>
    %327 = vector.extract_strided_slice %2 {offsets = [0, 2], sizes = [8, 1], strides = [1, 1]} : vector<8x8xf32> to vector<8x1xf32>
    %328 = vector.extract_strided_slice %314 {offsets = [2, 0], sizes = [1, 128], strides = [1, 1]} : vector<8x128xf32> to vector<1x128xf32>
    %329 = vector.broadcast %327 : vector<8x1xf32> to vector<8x128xf32>
    %330 = vector.broadcast %328 : vector<1x128xf32> to vector<8x128xf32>
    %331 = arith.mulf %329, %330 : vector<8x128xf32>
    %332 = arith.addf %326, %331 : vector<8x128xf32>
    %333 = vector.extract_strided_slice %2 {offsets = [0, 3], sizes = [8, 1], strides = [1, 1]} : vector<8x8xf32> to vector<8x1xf32>
    %334 = vector.extract_strided_slice %314 {offsets = [3, 0], sizes = [1, 128], strides = [1, 1]} : vector<8x128xf32> to vector<1x128xf32>
    %335 = vector.broadcast %333 : vector<8x1xf32> to vector<8x128xf32>
    %336 = vector.broadcast %334 : vector<1x128xf32> to vector<8x128xf32>
    %337 = arith.mulf %335, %336 : vector<8x128xf32>
    %338 = arith.addf %332, %337 : vector<8x128xf32>
    %339 = vector.extract_strided_slice %2 {offsets = [0, 4], sizes = [8, 1], strides = [1, 1]} : vector<8x8xf32> to vector<8x1xf32>
    %340 = vector.extract_strided_slice %314 {offsets = [4, 0], sizes = [1, 128], strides = [1, 1]} : vector<8x128xf32> to vector<1x128xf32>
    %341 = vector.broadcast %339 : vector<8x1xf32> to vector<8x128xf32>
    %342 = vector.broadcast %340 : vector<1x128xf32> to vector<8x128xf32>
    %343 = arith.mulf %341, %342 : vector<8x128xf32>
    %344 = arith.addf %338, %343 : vector<8x128xf32>
    %345 = vector.extract_strided_slice %2 {offsets = [0, 5], sizes = [8, 1], strides = [1, 1]} : vector<8x8xf32> to vector<8x1xf32>
    %346 = vector.extract_strided_slice %314 {offsets = [5, 0], sizes = [1, 128], strides = [1, 1]} : vector<8x128xf32> to vector<1x128xf32>
    %347 = vector.broadcast %345 : vector<8x1xf32> to vector<8x128xf32>
    %348 = vector.broadcast %346 : vector<1x128xf32> to vector<8x128xf32>
    %349 = arith.mulf %347, %348 : vector<8x128xf32>
    %350 = arith.addf %344, %349 : vector<8x128xf32>
    %351 = vector.extract_strided_slice %2 {offsets = [0, 6], sizes = [8, 1], strides = [1, 1]} : vector<8x8xf32> to vector<8x1xf32>
    %352 = vector.extract_strided_slice %314 {offsets = [6, 0], sizes = [1, 128], strides = [1, 1]} : vector<8x128xf32> to vector<1x128xf32>
    %353 = vector.broadcast %351 : vector<8x1xf32> to vector<8x128xf32>
    %354 = vector.broadcast %352 : vector<1x128xf32> to vector<8x128xf32>
    %355 = arith.mulf %353, %354 : vector<8x128xf32>
    %356 = arith.addf %350, %355 : vector<8x128xf32>
    %357 = vector.extract_strided_slice %2 {offsets = [0, 7], sizes = [8, 1], strides = [1, 1]} : vector<8x8xf32> to vector<8x1xf32>
    %358 = vector.extract_strided_slice %314 {offsets = [7, 0], sizes = [1, 128], strides = [1, 1]} : vector<8x128xf32> to vector<1x128xf32>
    %359 = vector.broadcast %357 : vector<8x1xf32> to vector<8x128xf32>
    %360 = vector.broadcast %358 : vector<1x128xf32> to vector<8x128xf32>
    %361 = arith.mulf %359, %360 : vector<8x128xf32>
    %362 = arith.addf %356, %361 : vector<8x128xf32>
    %363 = arith.index_cast %c1_i32 : i32 to index
    %c0_23 = arith.constant 0 : index
    %c0_24 = arith.constant 0 : index
    %364 = vector.load %arg8[%363, %c0_23, %c0_24] : memref<8x8x128xf32, #tpu.memory_space<vmem>>, vector<1x8x128xf32>
    %365 = vector.shape_cast %364 : vector<1x8x128xf32> to vector<8x128xf32>
    %366 = vector.shape_cast %362 : vector<8x128xf32> to vector<1x8x128xf32>
    tpu.vector_store %arg8[%363, %c0_23, %c0_24], %366 {strides = array<i32>} : memref<8x8x128xf32, #tpu.memory_space<vmem>>, vector<1x8x128xf32>,
    %c2_i32 = arith.constant 2 : i32
    %367 = arith.index_cast %c2_i32 : i32 to index
    %c0_25 = arith.constant 0 : index
    %c0_26 = arith.constant 0 : index
    %368 = vector.load %arg1[%367, %c0_25, %c0_26] : memref<8x8x128xf32, #tpu.memory_space<vmem>>, vector<1x8x128xf32>
    %369 = vector.shape_cast %368 : vector<1x8x128xf32> to vector<8x128xf32>
    %370 = vector.extract_strided_slice %0 {offsets = [0, 0], sizes = [24, 1], strides = [1, 1]} : vector<24x8xf32> to vector<24x1xf32>
    %371 = vector.extract_strided_slice %369 {offsets = [0, 0], sizes = [1, 128], strides = [1, 1]} : vector<8x128xf32> to vector<1x128xf32>
    %372 = vector.broadcast %370 : vector<24x1xf32> to vector<24x128xf32>
    %373 = vector.broadcast %371 : vector<1x128xf32> to vector<24x128xf32>
    %374 = arith.mulf %372, %373 : vector<24x128xf32>
    %375 = arith.addf %5, %374 : vector<24x128xf32>
    %376 = vector.extract_strided_slice %1 {offsets = [0, 0], sizes = [24, 1], strides = [1, 1]} : vector<24x8xf32> to vector<24x1xf32>
    %377 = vector.extract_strided_slice %314 {offsets = [0, 0], sizes = [1, 128], strides = [1, 1]} : vector<8x128xf32> to vector<1x128xf32>
    %378 = vector.broadcast %376 : vector<24x1xf32> to vector<24x128xf32>
    %379 = vector.broadcast %377 : vector<1x128xf32> to vector<24x128xf32>
    %380 = arith.mulf %378, %379 : vector<24x128xf32>
    %381 = arith.addf %8, %380 : vector<24x128xf32>
    %382 = vector.extract_strided_slice %0 {offsets = [0, 1], sizes = [24, 1], strides = [1, 1]} : vector<24x8xf32> to vector<24x1xf32>
    %383 = vector.extract_strided_slice %369 {offsets = [1, 0], sizes = [1, 128], strides = [1, 1]} : vector<8x128xf32> to vector<1x128xf32>
    %384 = vector.broadcast %382 : vector<24x1xf32> to vector<24x128xf32>
    %385 = vector.broadcast %383 : vector<1x128xf32> to vector<24x128xf32>
    %386 = arith.mulf %384, %385 : vector<24x128xf32>
    %387 = arith.addf %375, %386 : vector<24x128xf32>
    %388 = vector.extract_strided_slice %1 {offsets = [0, 1], sizes = [24, 1], strides = [1, 1]} : vector<24x8xf32> to vector<24x1xf32>
    %389 = vector.extract_strided_slice %314 {offsets = [1, 0], sizes = [1, 128], strides = [1, 1]} : vector<8x128xf32> to vector<1x128xf32>
    %390 = vector.broadcast %388 : vector<24x1xf32> to vector<24x128xf32>
    %391 = vector.broadcast %389 : vector<1x128xf32> to vector<24x128xf32>
    %392 = arith.mulf %390, %391 : vector<24x128xf32>
    %393 = arith.addf %381, %392 : vector<24x128xf32>
    %394 = vector.extract_strided_slice %0 {offsets = [0, 2], sizes = [24, 1], strides = [1, 1]} : vector<24x8xf32> to vector<24x1xf32>
    %395 = vector.extract_strided_slice %369 {offsets = [2, 0], sizes = [1, 128], strides = [1, 1]} : vector<8x128xf32> to vector<1x128xf32>
    %396 = vector.broadcast %394 : vector<24x1xf32> to vector<24x128xf32>
    %397 = vector.broadcast %395 : vector<1x128xf32> to vector<24x128xf32>
    %398 = arith.mulf %396, %397 : vector<24x128xf32>
    %399 = arith.addf %387, %398 : vector<24x128xf32>
    %400 = vector.extract_strided_slice %1 {offsets = [0, 2], sizes = [24, 1], strides = [1, 1]} : vector<24x8xf32> to vector<24x1xf32>
    %401 = vector.extract_strided_slice %314 {offsets = [2, 0], sizes = [1, 128], strides = [1, 1]} : vector<8x128xf32> to vector<1x128xf32>
    %402 = vector.broadcast %400 : vector<24x1xf32> to vector<24x128xf32>
    %403 = vector.broadcast %401 : vector<1x128xf32> to vector<24x128xf32>
    %404 = arith.mulf %402, %403 : vector<24x128xf32>
    %405 = arith.addf %393, %404 : vector<24x128xf32>
    %406 = vector.extract_strided_slice %0 {offsets = [0, 3], sizes = [24, 1], strides = [1, 1]} : vector<24x8xf32> to vector<24x1xf32>
    %407 = vector.extract_strided_slice %369 {offsets = [3, 0], sizes = [1, 128], strides = [1, 1]} : vector<8x128xf32> to vector<1x128xf32>
    %408 = vector.broadcast %406 : vector<24x1xf32> to vector<24x128xf32>
    %409 = vector.broadcast %407 : vector<1x128xf32> to vector<24x128xf32>
    %410 = arith.mulf %408, %409 : vector<24x128xf32>
    %411 = arith.addf %399, %410 : vector<24x128xf32>
    %412 = vector.extract_strided_slice %1 {offsets = [0, 3], sizes = [24, 1], strides = [1, 1]} : vector<24x8xf32> to vector<24x1xf32>
    %413 = vector.extract_strided_slice %314 {offsets = [3, 0], sizes = [1, 128], strides = [1, 1]} : vector<8x128xf32> to vector<1x128xf32>
    %414 = vector.broadcast %412 : vector<24x1xf32> to vector<24x128xf32>
    %415 = vector.broadcast %413 : vector<1x128xf32> to vector<24x128xf32>
    %416 = arith.mulf %414, %415 : vector<24x128xf32>
    %417 = arith.addf %405, %416 : vector<24x128xf32>
    %418 = vector.extract_strided_slice %0 {offsets = [0, 4], sizes = [24, 1], strides = [1, 1]} : vector<24x8xf32> to vector<24x1xf32>
    %419 = vector.extract_strided_slice %369 {offsets = [4, 0], sizes = [1, 128], strides = [1, 1]} : vector<8x128xf32> to vector<1x128xf32>
    %420 = vector.broadcast %418 : vector<24x1xf32> to vector<24x128xf32>
    %421 = vector.broadcast %419 : vector<1x128xf32> to vector<24x128xf32>
    %422 = arith.mulf %420, %421 : vector<24x128xf32>
    %423 = arith.addf %411, %422 : vector<24x128xf32>
    %424 = vector.extract_strided_slice %1 {offsets = [0, 4], sizes = [24, 1], strides = [1, 1]} : vector<24x8xf32> to vector<24x1xf32>
    %425 = vector.extract_strided_slice %314 {offsets = [4, 0], sizes = [1, 128], strides = [1, 1]} : vector<8x128xf32> to vector<1x128xf32>
    %426 = vector.broadcast %424 : vector<24x1xf32> to vector<24x128xf32>
    %427 = vector.broadcast %425 : vector<1x128xf32> to vector<24x128xf32>
    %428 = arith.mulf %426, %427 : vector<24x128xf32>
    %429 = arith.addf %417, %428 : vector<24x128xf32>
    %430 = vector.extract_strided_slice %0 {offsets = [0, 5], sizes = [24, 1], strides = [1, 1]} : vector<24x8xf32> to vector<24x1xf32>
    %431 = vector.extract_strided_slice %369 {offsets = [5, 0], sizes = [1, 128], strides = [1, 1]} : vector<8x128xf32> to vector<1x128xf32>
    %432 = vector.broadcast %430 : vector<24x1xf32> to vector<24x128xf32>
    %433 = vector.broadcast %431 : vector<1x128xf32> to vector<24x128xf32>
    %434 = arith.mulf %432, %433 : vector<24x128xf32>
    %435 = arith.addf %423, %434 : vector<24x128xf32>
    %436 = vector.extract_strided_slice %1 {offsets = [0, 5], sizes = [24, 1], strides = [1, 1]} : vector<24x8xf32> to vector<24x1xf32>
    %437 = vector.extract_strided_slice %314 {offsets = [5, 0], sizes = [1, 128], strides = [1, 1]} : vector<8x128xf32> to vector<1x128xf32>
    %438 = vector.broadcast %436 : vector<24x1xf32> to vector<24x128xf32>
    %439 = vector.broadcast %437 : vector<1x128xf32> to vector<24x128xf32>
    %440 = arith.mulf %438, %439 : vector<24x128xf32>
    %441 = arith.addf %429, %440 : vector<24x128xf32>
    %442 = vector.extract_strided_slice %0 {offsets = [0, 6], sizes = [24, 1], strides = [1, 1]} : vector<24x8xf32> to vector<24x1xf32>
    %443 = vector.extract_strided_slice %369 {offsets = [6, 0], sizes = [1, 128], strides = [1, 1]} : vector<8x128xf32> to vector<1x128xf32>
    %444 = vector.broadcast %442 : vector<24x1xf32> to vector<24x128xf32>
    %445 = vector.broadcast %443 : vector<1x128xf32> to vector<24x128xf32>
    %446 = arith.mulf %444, %445 : vector<24x128xf32>
    %447 = arith.addf %435, %446 : vector<24x128xf32>
    %448 = vector.extract_strided_slice %1 {offsets = [0, 6], sizes = [24, 1], strides = [1, 1]} : vector<24x8xf32> to vector<24x1xf32>
    %449 = vector.extract_strided_slice %314 {offsets = [6, 0], sizes = [1, 128], strides = [1, 1]} : vector<8x128xf32> to vector<1x128xf32>
    %450 = vector.broadcast %448 : vector<24x1xf32> to vector<24x128xf32>
    %451 = vector.broadcast %449 : vector<1x128xf32> to vector<24x128xf32>
    %452 = arith.mulf %450, %451 : vector<24x128xf32>
    %453 = arith.addf %441, %452 : vector<24x128xf32>
    %454 = vector.extract_strided_slice %0 {offsets = [0, 7], sizes = [24, 1], strides = [1, 1]} : vector<24x8xf32> to vector<24x1xf32>
    %455 = vector.extract_strided_slice %369 {offsets = [7, 0], sizes = [1, 128], strides = [1, 1]} : vector<8x128xf32> to vector<1x128xf32>
    %456 = vector.broadcast %454 : vector<24x1xf32> to vector<24x128xf32>
    %457 = vector.broadcast %455 : vector<1x128xf32> to vector<24x128xf32>
    %458 = arith.mulf %456, %457 : vector<24x128xf32>
    %459 = arith.addf %447, %458 : vector<24x128xf32>
    %460 = vector.extract_strided_slice %1 {offsets = [0, 7], sizes = [24, 1], strides = [1, 1]} : vector<24x8xf32> to vector<24x1xf32>
    %461 = vector.extract_strided_slice %314 {offsets = [7, 0], sizes = [1, 128], strides = [1, 1]} : vector<8x128xf32> to vector<1x128xf32>
    %462 = vector.broadcast %460 : vector<24x1xf32> to vector<24x128xf32>
    %463 = vector.broadcast %461 : vector<1x128xf32> to vector<24x128xf32>
    %464 = arith.mulf %462, %463 : vector<24x128xf32>
    %465 = arith.addf %453, %464 : vector<24x128xf32>
    %466 = vector.extract_strided_slice %459 {offsets = [0, 0], sizes = [8, 128], strides = [1, 1]} : vector<24x128xf32> to vector<8x128xf32>
    %467 = vector.extract_strided_slice %465 {offsets = [0, 0], sizes = [8, 128], strides = [1, 1]} : vector<24x128xf32> to vector<8x128xf32>
    %468 = arith.addf %466, %467 : vector<8x128xf32>
    %469 = arith.negf %468 : vector<8x128xf32>
    %470 = math.exp %469 : vector<8x128xf32>
    %cst_27 = arith.constant 1.000000e+00 : f32
    %471 = vector.broadcast %cst_27 : f32 to vector<8x128xf32>
    %472 = arith.addf %471, %470 : vector<8x128xf32>
    %473 = arith.divf %471, %472 : vector<8x128xf32>
    %474 = vector.extract_strided_slice %459 {offsets = [8, 0], sizes = [8, 128], strides = [1, 1]} : vector<24x128xf32> to vector<8x128xf32>
    %475 = vector.extract_strided_slice %465 {offsets = [8, 0], sizes = [8, 128], strides = [1, 1]} : vector<24x128xf32> to vector<8x128xf32>
    %476 = arith.addf %474, %475 : vector<8x128xf32>
    %477 = arith.negf %476 : vector<8x128xf32>
    %478 = math.exp %477 : vector<8x128xf32>
    %cst_28 = arith.constant 1.000000e+00 : f32
    %479 = vector.broadcast %cst_28 : f32 to vector<8x128xf32>
    %480 = arith.addf %479, %478 : vector<8x128xf32>
    %481 = arith.divf %479, %480 : vector<8x128xf32>
    %482 = vector.extract_strided_slice %459 {offsets = [16, 0], sizes = [8, 128], strides = [1, 1]} : vector<24x128xf32> to vector<8x128xf32>
    %483 = vector.extract_strided_slice %465 {offsets = [16, 0], sizes = [8, 128], strides = [1, 1]} : vector<24x128xf32> to vector<8x128xf32>
    %484 = arith.mulf %473, %483 : vector<8x128xf32>
    %485 = arith.addf %482, %484 : vector<8x128xf32>
    %486 = math.tanh %485 : vector<8x128xf32>
    %cst_29 = arith.constant 1.000000e+00 : f32
    %487 = vector.broadcast %cst_29 : f32 to vector<8x128xf32>
    %488 = arith.subf %487, %481 : vector<8x128xf32>
    %489 = arith.mulf %488, %486 : vector<8x128xf32>
    %490 = arith.mulf %481, %314 : vector<8x128xf32>
    %491 = arith.addf %489, %490 : vector<8x128xf32>
    %492 = vector.extract_strided_slice %2 {offsets = [0, 0], sizes = [8, 1], strides = [1, 1]} : vector<8x8xf32> to vector<8x1xf32>
    %493 = vector.extract_strided_slice %491 {offsets = [0, 0], sizes = [1, 128], strides = [1, 1]} : vector<8x128xf32> to vector<1x128xf32>
    %494 = vector.broadcast %492 : vector<8x1xf32> to vector<8x128xf32>
    %495 = vector.broadcast %493 : vector<1x128xf32> to vector<8x128xf32>
    %496 = arith.mulf %494, %495 : vector<8x128xf32>
    %497 = arith.addf %11, %496 : vector<8x128xf32>
    %498 = vector.extract_strided_slice %2 {offsets = [0, 1], sizes = [8, 1], strides = [1, 1]} : vector<8x8xf32> to vector<8x1xf32>
    %499 = vector.extract_strided_slice %491 {offsets = [1, 0], sizes = [1, 128], strides = [1, 1]} : vector<8x128xf32> to vector<1x128xf32>
    %500 = vector.broadcast %498 : vector<8x1xf32> to vector<8x128xf32>
    %501 = vector.broadcast %499 : vector<1x128xf32> to vector<8x128xf32>
    %502 = arith.mulf %500, %501 : vector<8x128xf32>
    %503 = arith.addf %497, %502 : vector<8x128xf32>
    %504 = vector.extract_strided_slice %2 {offsets = [0, 2], sizes = [8, 1], strides = [1, 1]} : vector<8x8xf32> to vector<8x1xf32>
    %505 = vector.extract_strided_slice %491 {offsets = [2, 0], sizes = [1, 128], strides = [1, 1]} : vector<8x128xf32> to vector<1x128xf32>
    %506 = vector.broadcast %504 : vector<8x1xf32> to vector<8x128xf32>
    %507 = vector.broadcast %505 : vector<1x128xf32> to vector<8x128xf32>
    %508 = arith.mulf %506, %507 : vector<8x128xf32>
    %509 = arith.addf %503, %508 : vector<8x128xf32>
    %510 = vector.extract_strided_slice %2 {offsets = [0, 3], sizes = [8, 1], strides = [1, 1]} : vector<8x8xf32> to vector<8x1xf32>
    %511 = vector.extract_strided_slice %491 {offsets = [3, 0], sizes = [1, 128], strides = [1, 1]} : vector<8x128xf32> to vector<1x128xf32>
    %512 = vector.broadcast %510 : vector<8x1xf32> to vector<8x128xf32>
    %513 = vector.broadcast %511 : vector<1x128xf32> to vector<8x128xf32>
    %514 = arith.mulf %512, %513 : vector<8x128xf32>
    %515 = arith.addf %509, %514 : vector<8x128xf32>
    %516 = vector.extract_strided_slice %2 {offsets = [0, 4], sizes = [8, 1], strides = [1, 1]} : vector<8x8xf32> to vector<8x1xf32>
    %517 = vector.extract_strided_slice %491 {offsets = [4, 0], sizes = [1, 128], strides = [1, 1]} : vector<8x128xf32> to vector<1x128xf32>
    %518 = vector.broadcast %516 : vector<8x1xf32> to vector<8x128xf32>
    %519 = vector.broadcast %517 : vector<1x128xf32> to vector<8x128xf32>
    %520 = arith.mulf %518, %519 : vector<8x128xf32>
    %521 = arith.addf %515, %520 : vector<8x128xf32>
    %522 = vector.extract_strided_slice %2 {offsets = [0, 5], sizes = [8, 1], strides = [1, 1]} : vector<8x8xf32> to vector<8x1xf32>
    %523 = vector.extract_strided_slice %491 {offsets = [5, 0], sizes = [1, 128], strides = [1, 1]} : vector<8x128xf32> to vector<1x128xf32>
    %524 = vector.broadcast %522 : vector<8x1xf32> to vector<8x128xf32>
    %525 = vector.broadcast %523 : vector<1x128xf32> to vector<8x128xf32>
    %526 = arith.mulf %524, %525 : vector<8x128xf32>
    %527 = arith.addf %521, %526 : vector<8x128xf32>
    %528 = vector.extract_strided_slice %2 {offsets = [0, 6], sizes = [8, 1], strides = [1, 1]} : vector<8x8xf32> to vector<8x1xf32>
    %529 = vector.extract_strided_slice %491 {offsets = [6, 0], sizes = [1, 128], strides = [1, 1]} : vector<8x128xf32> to vector<1x128xf32>
    %530 = vector.broadcast %528 : vector<8x1xf32> to vector<8x128xf32>
    %531 = vector.broadcast %529 : vector<1x128xf32> to vector<8x128xf32>
    %532 = arith.mulf %530, %531 : vector<8x128xf32>
    %533 = arith.addf %527, %532 : vector<8x128xf32>
    %534 = vector.extract_strided_slice %2 {offsets = [0, 7], sizes = [8, 1], strides = [1, 1]} : vector<8x8xf32> to vector<8x1xf32>
    %535 = vector.extract_strided_slice %491 {offsets = [7, 0], sizes = [1, 128], strides = [1, 1]} : vector<8x128xf32> to vector<1x128xf32>
    %536 = vector.broadcast %534 : vector<8x1xf32> to vector<8x128xf32>
    %537 = vector.broadcast %535 : vector<1x128xf32> to vector<8x128xf32>
    %538 = arith.mulf %536, %537 : vector<8x128xf32>
    %539 = arith.addf %533, %538 : vector<8x128xf32>
    %540 = arith.index_cast %c2_i32 : i32 to index
    %c0_30 = arith.constant 0 : index
    %c0_31 = arith.constant 0 : index
    %541 = vector.load %arg8[%540, %c0_30, %c0_31] : memref<8x8x128xf32, #tpu.memory_space<vmem>>, vector<1x8x128xf32>
    %542 = vector.shape_cast %541 : vector<1x8x128xf32> to vector<8x128xf32>
    %543 = vector.shape_cast %539 : vector<8x128xf32> to vector<1x8x128xf32>
    tpu.vector_store %arg8[%540, %c0_30, %c0_31], %543 {strides = array<i32>} : memref<8x8x128xf32, #tpu.memory_space<vmem>>, vector<1x8x128xf32>,
    %c3_i32 = arith.constant 3 : i32
    %544 = arith.index_cast %c3_i32 : i32 to index
    %c0_32 = arith.constant 0 : index
    %c0_33 = arith.constant 0 : index
    %545 = vector.load %arg1[%544, %c0_32, %c0_33] : memref<8x8x128xf32, #tpu.memory_space<vmem>>, vector<1x8x128xf32>
    %546 = vector.shape_cast %545 : vector<1x8x128xf32> to vector<8x128xf32>
    %547 = vector.extract_strided_slice %0 {offsets = [0, 0], sizes = [24, 1], strides = [1, 1]} : vector<24x8xf32> to vector<24x1xf32>
    %548 = vector.extract_strided_slice %546 {offsets = [0, 0], sizes = [1, 128], strides = [1, 1]} : vector<8x128xf32> to vector<1x128xf32>
    %549 = vector.broadcast %547 : vector<24x1xf32> to vector<24x128xf32>
    %550 = vector.broadcast %548 : vector<1x128xf32> to vector<24x128xf32>
    %551 = arith.mulf %549, %550 : vector<24x128xf32>
    %552 = arith.addf %5, %551 : vector<24x128xf32>
    %553 = vector.extract_strided_slice %1 {offsets = [0, 0], sizes = [24, 1], strides = [1, 1]} : vector<24x8xf32> to vector<24x1xf32>
    %554 = vector.extract_strided_slice %491 {offsets = [0, 0], sizes = [1, 128], strides = [1, 1]} : vector<8x128xf32> to vector<1x128xf32>
    %555 = vector.broadcast %553 : vector<24x1xf32> to vector<24x128xf32>
    %556 = vector.broadcast %554 : vector<1x128xf32> to vector<24x128xf32>
    %557 = arith.mulf %555, %556 : vector<24x128xf32>
    %558 = arith.addf %8, %557 : vector<24x128xf32>
    %559 = vector.extract_strided_slice %0 {offsets = [0, 1], sizes = [24, 1], strides = [1, 1]} : vector<24x8xf32> to vector<24x1xf32>
    %560 = vector.extract_strided_slice %546 {offsets = [1, 0], sizes = [1, 128], strides = [1, 1]} : vector<8x128xf32> to vector<1x128xf32>
    %561 = vector.broadcast %559 : vector<24x1xf32> to vector<24x128xf32>
    %562 = vector.broadcast %560 : vector<1x128xf32> to vector<24x128xf32>
    %563 = arith.mulf %561, %562 : vector<24x128xf32>
    %564 = arith.addf %552, %563 : vector<24x128xf32>
    %565 = vector.extract_strided_slice %1 {offsets = [0, 1], sizes = [24, 1], strides = [1, 1]} : vector<24x8xf32> to vector<24x1xf32>
    %566 = vector.extract_strided_slice %491 {offsets = [1, 0], sizes = [1, 128], strides = [1, 1]} : vector<8x128xf32> to vector<1x128xf32>
    %567 = vector.broadcast %565 : vector<24x1xf32> to vector<24x128xf32>
    %568 = vector.broadcast %566 : vector<1x128xf32> to vector<24x128xf32>
    %569 = arith.mulf %567, %568 : vector<24x128xf32>
    %570 = arith.addf %558, %569 : vector<24x128xf32>
    %571 = vector.extract_strided_slice %0 {offsets = [0, 2], sizes = [24, 1], strides = [1, 1]} : vector<24x8xf32> to vector<24x1xf32>
    %572 = vector.extract_strided_slice %546 {offsets = [2, 0], sizes = [1, 128], strides = [1, 1]} : vector<8x128xf32> to vector<1x128xf32>
    %573 = vector.broadcast %571 : vector<24x1xf32> to vector<24x128xf32>
    %574 = vector.broadcast %572 : vector<1x128xf32> to vector<24x128xf32>
    %575 = arith.mulf %573, %574 : vector<24x128xf32>
    %576 = arith.addf %564, %575 : vector<24x128xf32>
    %577 = vector.extract_strided_slice %1 {offsets = [0, 2], sizes = [24, 1], strides = [1, 1]} : vector<24x8xf32> to vector<24x1xf32>
    %578 = vector.extract_strided_slice %491 {offsets = [2, 0], sizes = [1, 128], strides = [1, 1]} : vector<8x128xf32> to vector<1x128xf32>
    %579 = vector.broadcast %577 : vector<24x1xf32> to vector<24x128xf32>
    %580 = vector.broadcast %578 : vector<1x128xf32> to vector<24x128xf32>
    %581 = arith.mulf %579, %580 : vector<24x128xf32>
    %582 = arith.addf %570, %581 : vector<24x128xf32>
    %583 = vector.extract_strided_slice %0 {offsets = [0, 3], sizes = [24, 1], strides = [1, 1]} : vector<24x8xf32> to vector<24x1xf32>
    %584 = vector.extract_strided_slice %546 {offsets = [3, 0], sizes = [1, 128], strides = [1, 1]} : vector<8x128xf32> to vector<1x128xf32>
    %585 = vector.broadcast %583 : vector<24x1xf32> to vector<24x128xf32>
    %586 = vector.broadcast %584 : vector<1x128xf32> to vector<24x128xf32>
    %587 = arith.mulf %585, %586 : vector<24x128xf32>
    %588 = arith.addf %576, %587 : vector<24x128xf32>
    %589 = vector.extract_strided_slice %1 {offsets = [0, 3], sizes = [24, 1], strides = [1, 1]} : vector<24x8xf32> to vector<24x1xf32>
    %590 = vector.extract_strided_slice %491 {offsets = [3, 0], sizes = [1, 128], strides = [1, 1]} : vector<8x128xf32> to vector<1x128xf32>
    %591 = vector.broadcast %589 : vector<24x1xf32> to vector<24x128xf32>
    %592 = vector.broadcast %590 : vector<1x128xf32> to vector<24x128xf32>
    %593 = arith.mulf %591, %592 : vector<24x128xf32>
    %594 = arith.addf %582, %593 : vector<24x128xf32>
    %595 = vector.extract_strided_slice %0 {offsets = [0, 4], sizes = [24, 1], strides = [1, 1]} : vector<24x8xf32> to vector<24x1xf32>
    %596 = vector.extract_strided_slice %546 {offsets = [4, 0], sizes = [1, 128], strides = [1, 1]} : vector<8x128xf32> to vector<1x128xf32>
    %597 = vector.broadcast %595 : vector<24x1xf32> to vector<24x128xf32>
    %598 = vector.broadcast %596 : vector<1x128xf32> to vector<24x128xf32>
    %599 = arith.mulf %597, %598 : vector<24x128xf32>
    %600 = arith.addf %588, %599 : vector<24x128xf32>
    %601 = vector.extract_strided_slice %1 {offsets = [0, 4], sizes = [24, 1], strides = [1, 1]} : vector<24x8xf32> to vector<24x1xf32>
    %602 = vector.extract_strided_slice %491 {offsets = [4, 0], sizes = [1, 128], strides = [1, 1]} : vector<8x128xf32> to vector<1x128xf32>
    %603 = vector.broadcast %601 : vector<24x1xf32> to vector<24x128xf32>
    %604 = vector.broadcast %602 : vector<1x128xf32> to vector<24x128xf32>
    %605 = arith.mulf %603, %604 : vector<24x128xf32>
    %606 = arith.addf %594, %605 : vector<24x128xf32>
    %607 = vector.extract_strided_slice %0 {offsets = [0, 5], sizes = [24, 1], strides = [1, 1]} : vector<24x8xf32> to vector<24x1xf32>
    %608 = vector.extract_strided_slice %546 {offsets = [5, 0], sizes = [1, 128], strides = [1, 1]} : vector<8x128xf32> to vector<1x128xf32>
    %609 = vector.broadcast %607 : vector<24x1xf32> to vector<24x128xf32>
    %610 = vector.broadcast %608 : vector<1x128xf32> to vector<24x128xf32>
    %611 = arith.mulf %609, %610 : vector<24x128xf32>
    %612 = arith.addf %600, %611 : vector<24x128xf32>
    %613 = vector.extract_strided_slice %1 {offsets = [0, 5], sizes = [24, 1], strides = [1, 1]} : vector<24x8xf32> to vector<24x1xf32>
    %614 = vector.extract_strided_slice %491 {offsets = [5, 0], sizes = [1, 128], strides = [1, 1]} : vector<8x128xf32> to vector<1x128xf32>
    %615 = vector.broadcast %613 : vector<24x1xf32> to vector<24x128xf32>
    %616 = vector.broadcast %614 : vector<1x128xf32> to vector<24x128xf32>
    %617 = arith.mulf %615, %616 : vector<24x128xf32>
    %618 = arith.addf %606, %617 : vector<24x128xf32>
    %619 = vector.extract_strided_slice %0 {offsets = [0, 6], sizes = [24, 1], strides = [1, 1]} : vector<24x8xf32> to vector<24x1xf32>
    %620 = vector.extract_strided_slice %546 {offsets = [6, 0], sizes = [1, 128], strides = [1, 1]} : vector<8x128xf32> to vector<1x128xf32>
    %621 = vector.broadcast %619 : vector<24x1xf32> to vector<24x128xf32>
    %622 = vector.broadcast %620 : vector<1x128xf32> to vector<24x128xf32>
    %623 = arith.mulf %621, %622 : vector<24x128xf32>
    %624 = arith.addf %612, %623 : vector<24x128xf32>
    %625 = vector.extract_strided_slice %1 {offsets = [0, 6], sizes = [24, 1], strides = [1, 1]} : vector<24x8xf32> to vector<24x1xf32>
    %626 = vector.extract_strided_slice %491 {offsets = [6, 0], sizes = [1, 128], strides = [1, 1]} : vector<8x128xf32> to vector<1x128xf32>
    %627 = vector.broadcast %625 : vector<24x1xf32> to vector<24x128xf32>
    %628 = vector.broadcast %626 : vector<1x128xf32> to vector<24x128xf32>
    %629 = arith.mulf %627, %628 : vector<24x128xf32>
    %630 = arith.addf %618, %629 : vector<24x128xf32>
    %631 = vector.extract_strided_slice %0 {offsets = [0, 7], sizes = [24, 1], strides = [1, 1]} : vector<24x8xf32> to vector<24x1xf32>
    %632 = vector.extract_strided_slice %546 {offsets = [7, 0], sizes = [1, 128], strides = [1, 1]} : vector<8x128xf32> to vector<1x128xf32>
    %633 = vector.broadcast %631 : vector<24x1xf32> to vector<24x128xf32>
    %634 = vector.broadcast %632 : vector<1x128xf32> to vector<24x128xf32>
    %635 = arith.mulf %633, %634 : vector<24x128xf32>
    %636 = arith.addf %624, %635 : vector<24x128xf32>
    %637 = vector.extract_strided_slice %1 {offsets = [0, 7], sizes = [24, 1], strides = [1, 1]} : vector<24x8xf32> to vector<24x1xf32>
    %638 = vector.extract_strided_slice %491 {offsets = [7, 0], sizes = [1, 128], strides = [1, 1]} : vector<8x128xf32> to vector<1x128xf32>
    %639 = vector.broadcast %637 : vector<24x1xf32> to vector<24x128xf32>
    %640 = vector.broadcast %638 : vector<1x128xf32> to vector<24x128xf32>
    %641 = arith.mulf %639, %640 : vector<24x128xf32>
    %642 = arith.addf %630, %641 : vector<24x128xf32>
    %643 = vector.extract_strided_slice %636 {offsets = [0, 0], sizes = [8, 128], strides = [1, 1]} : vector<24x128xf32> to vector<8x128xf32>
    %644 = vector.extract_strided_slice %642 {offsets = [0, 0], sizes = [8, 128], strides = [1, 1]} : vector<24x128xf32> to vector<8x128xf32>
    %645 = arith.addf %643, %644 : vector<8x128xf32>
    %646 = arith.negf %645 : vector<8x128xf32>
    %647 = math.exp %646 : vector<8x128xf32>
    %cst_34 = arith.constant 1.000000e+00 : f32
    %648 = vector.broadcast %cst_34 : f32 to vector<8x128xf32>
    %649 = arith.addf %648, %647 : vector<8x128xf32>
    %650 = arith.divf %648, %649 : vector<8x128xf32>
    %651 = vector.extract_strided_slice %636 {offsets = [8, 0], sizes = [8, 128], strides = [1, 1]} : vector<24x128xf32> to vector<8x128xf32>
    %652 = vector.extract_strided_slice %642 {offsets = [8, 0], sizes = [8, 128], strides = [1, 1]} : vector<24x128xf32> to vector<8x128xf32>
    %653 = arith.addf %651, %652 : vector<8x128xf32>
    %654 = arith.negf %653 : vector<8x128xf32>
    %655 = math.exp %654 : vector<8x128xf32>
    %cst_35 = arith.constant 1.000000e+00 : f32
    %656 = vector.broadcast %cst_35 : f32 to vector<8x128xf32>
    %657 = arith.addf %656, %655 : vector<8x128xf32>
    %658 = arith.divf %656, %657 : vector<8x128xf32>
    %659 = vector.extract_strided_slice %636 {offsets = [16, 0], sizes = [8, 128], strides = [1, 1]} : vector<24x128xf32> to vector<8x128xf32>
    %660 = vector.extract_strided_slice %642 {offsets = [16, 0], sizes = [8, 128], strides = [1, 1]} : vector<24x128xf32> to vector<8x128xf32>
    %661 = arith.mulf %650, %660 : vector<8x128xf32>
    %662 = arith.addf %659, %661 : vector<8x128xf32>
    %663 = math.tanh %662 : vector<8x128xf32>
    %cst_36 = arith.constant 1.000000e+00 : f32
    %664 = vector.broadcast %cst_36 : f32 to vector<8x128xf32>
    %665 = arith.subf %664, %658 : vector<8x128xf32>
    %666 = arith.mulf %665, %663 : vector<8x128xf32>
    %667 = arith.mulf %658, %491 : vector<8x128xf32>
    %668 = arith.addf %666, %667 : vector<8x128xf32>
    %669 = vector.extract_strided_slice %2 {offsets = [0, 0], sizes = [8, 1], strides = [1, 1]} : vector<8x8xf32> to vector<8x1xf32>
    %670 = vector.extract_strided_slice %668 {offsets = [0, 0], sizes = [1, 128], strides = [1, 1]} : vector<8x128xf32> to vector<1x128xf32>
    %671 = vector.broadcast %669 : vector<8x1xf32> to vector<8x128xf32>
    %672 = vector.broadcast %670 : vector<1x128xf32> to vector<8x128xf32>
    %673 = arith.mulf %671, %672 : vector<8x128xf32>
    %674 = arith.addf %11, %673 : vector<8x128xf32>
    %675 = vector.extract_strided_slice %2 {offsets = [0, 1], sizes = [8, 1], strides = [1, 1]} : vector<8x8xf32> to vector<8x1xf32>
    %676 = vector.extract_strided_slice %668 {offsets = [1, 0], sizes = [1, 128], strides = [1, 1]} : vector<8x128xf32> to vector<1x128xf32>
    %677 = vector.broadcast %675 : vector<8x1xf32> to vector<8x128xf32>
    %678 = vector.broadcast %676 : vector<1x128xf32> to vector<8x128xf32>
    %679 = arith.mulf %677, %678 : vector<8x128xf32>
    %680 = arith.addf %674, %679 : vector<8x128xf32>
    %681 = vector.extract_strided_slice %2 {offsets = [0, 2], sizes = [8, 1], strides = [1, 1]} : vector<8x8xf32> to vector<8x1xf32>
    %682 = vector.extract_strided_slice %668 {offsets = [2, 0], sizes = [1, 128], strides = [1, 1]} : vector<8x128xf32> to vector<1x128xf32>
    %683 = vector.broadcast %681 : vector<8x1xf32> to vector<8x128xf32>
    %684 = vector.broadcast %682 : vector<1x128xf32> to vector<8x128xf32>
    %685 = arith.mulf %683, %684 : vector<8x128xf32>
    %686 = arith.addf %680, %685 : vector<8x128xf32>
    %687 = vector.extract_strided_slice %2 {offsets = [0, 3], sizes = [8, 1], strides = [1, 1]} : vector<8x8xf32> to vector<8x1xf32>
    %688 = vector.extract_strided_slice %668 {offsets = [3, 0], sizes = [1, 128], strides = [1, 1]} : vector<8x128xf32> to vector<1x128xf32>
    %689 = vector.broadcast %687 : vector<8x1xf32> to vector<8x128xf32>
    %690 = vector.broadcast %688 : vector<1x128xf32> to vector<8x128xf32>
    %691 = arith.mulf %689, %690 : vector<8x128xf32>
    %692 = arith.addf %686, %691 : vector<8x128xf32>
    %693 = vector.extract_strided_slice %2 {offsets = [0, 4], sizes = [8, 1], strides = [1, 1]} : vector<8x8xf32> to vector<8x1xf32>
    %694 = vector.extract_strided_slice %668 {offsets = [4, 0], sizes = [1, 128], strides = [1, 1]} : vector<8x128xf32> to vector<1x128xf32>
    %695 = vector.broadcast %693 : vector<8x1xf32> to vector<8x128xf32>
    %696 = vector.broadcast %694 : vector<1x128xf32> to vector<8x128xf32>
    %697 = arith.mulf %695, %696 : vector<8x128xf32>
    %698 = arith.addf %692, %697 : vector<8x128xf32>
    %699 = vector.extract_strided_slice %2 {offsets = [0, 5], sizes = [8, 1], strides = [1, 1]} : vector<8x8xf32> to vector<8x1xf32>
    %700 = vector.extract_strided_slice %668 {offsets = [5, 0], sizes = [1, 128], strides = [1, 1]} : vector<8x128xf32> to vector<1x128xf32>
    %701 = vector.broadcast %699 : vector<8x1xf32> to vector<8x128xf32>
    %702 = vector.broadcast %700 : vector<1x128xf32> to vector<8x128xf32>
    %703 = arith.mulf %701, %702 : vector<8x128xf32>
    %704 = arith.addf %698, %703 : vector<8x128xf32>
    %705 = vector.extract_strided_slice %2 {offsets = [0, 6], sizes = [8, 1], strides = [1, 1]} : vector<8x8xf32> to vector<8x1xf32>
    %706 = vector.extract_strided_slice %668 {offsets = [6, 0], sizes = [1, 128], strides = [1, 1]} : vector<8x128xf32> to vector<1x128xf32>
    %707 = vector.broadcast %705 : vector<8x1xf32> to vector<8x128xf32>
    %708 = vector.broadcast %706 : vector<1x128xf32> to vector<8x128xf32>
    %709 = arith.mulf %707, %708 : vector<8x128xf32>
    %710 = arith.addf %704, %709 : vector<8x128xf32>
    %711 = vector.extract_strided_slice %2 {offsets = [0, 7], sizes = [8, 1], strides = [1, 1]} : vector<8x8xf32> to vector<8x1xf32>
    %712 = vector.extract_strided_slice %668 {offsets = [7, 0], sizes = [1, 128], strides = [1, 1]} : vector<8x128xf32> to vector<1x128xf32>
    %713 = vector.broadcast %711 : vector<8x1xf32> to vector<8x128xf32>
    %714 = vector.broadcast %712 : vector<1x128xf32> to vector<8x128xf32>
    %715 = arith.mulf %713, %714 : vector<8x128xf32>
    %716 = arith.addf %710, %715 : vector<8x128xf32>
    %717 = arith.index_cast %c3_i32 : i32 to index
    %c0_37 = arith.constant 0 : index
    %c0_38 = arith.constant 0 : index
    %718 = vector.load %arg8[%717, %c0_37, %c0_38] : memref<8x8x128xf32, #tpu.memory_space<vmem>>, vector<1x8x128xf32>
    %719 = vector.shape_cast %718 : vector<1x8x128xf32> to vector<8x128xf32>
    %720 = vector.shape_cast %716 : vector<8x128xf32> to vector<1x8x128xf32>
    tpu.vector_store %arg8[%717, %c0_37, %c0_38], %720 {strides = array<i32>} : memref<8x8x128xf32, #tpu.memory_space<vmem>>, vector<1x8x128xf32>,
    %c4_i32 = arith.constant 4 : i32
    %721 = arith.index_cast %c4_i32 : i32 to index
    %c0_39 = arith.constant 0 : index
    %c0_40 = arith.constant 0 : index
    %722 = vector.load %arg1[%721, %c0_39, %c0_40] : memref<8x8x128xf32, #tpu.memory_space<vmem>>, vector<1x8x128xf32>
    %723 = vector.shape_cast %722 : vector<1x8x128xf32> to vector<8x128xf32>
    %724 = vector.extract_strided_slice %0 {offsets = [0, 0], sizes = [24, 1], strides = [1, 1]} : vector<24x8xf32> to vector<24x1xf32>
    %725 = vector.extract_strided_slice %723 {offsets = [0, 0], sizes = [1, 128], strides = [1, 1]} : vector<8x128xf32> to vector<1x128xf32>
    %726 = vector.broadcast %724 : vector<24x1xf32> to vector<24x128xf32>
    %727 = vector.broadcast %725 : vector<1x128xf32> to vector<24x128xf32>
    %728 = arith.mulf %726, %727 : vector<24x128xf32>
    %729 = arith.addf %5, %728 : vector<24x128xf32>
    %730 = vector.extract_strided_slice %1 {offsets = [0, 0], sizes = [24, 1], strides = [1, 1]} : vector<24x8xf32> to vector<24x1xf32>
    %731 = vector.extract_strided_slice %668 {offsets = [0, 0], sizes = [1, 128], strides = [1, 1]} : vector<8x128xf32> to vector<1x128xf32>
    %732 = vector.broadcast %730 : vector<24x1xf32> to vector<24x128xf32>
    %733 = vector.broadcast %731 : vector<1x128xf32> to vector<24x128xf32>
    %734 = arith.mulf %732, %733 : vector<24x128xf32>
    %735 = arith.addf %8, %734 : vector<24x128xf32>
    %736 = vector.extract_strided_slice %0 {offsets = [0, 1], sizes = [24, 1], strides = [1, 1]} : vector<24x8xf32> to vector<24x1xf32>
    %737 = vector.extract_strided_slice %723 {offsets = [1, 0], sizes = [1, 128], strides = [1, 1]} : vector<8x128xf32> to vector<1x128xf32>
    %738 = vector.broadcast %736 : vector<24x1xf32> to vector<24x128xf32>
    %739 = vector.broadcast %737 : vector<1x128xf32> to vector<24x128xf32>
    %740 = arith.mulf %738, %739 : vector<24x128xf32>
    %741 = arith.addf %729, %740 : vector<24x128xf32>
    %742 = vector.extract_strided_slice %1 {offsets = [0, 1], sizes = [24, 1], strides = [1, 1]} : vector<24x8xf32> to vector<24x1xf32>
    %743 = vector.extract_strided_slice %668 {offsets = [1, 0], sizes = [1, 128], strides = [1, 1]} : vector<8x128xf32> to vector<1x128xf32>
    %744 = vector.broadcast %742 : vector<24x1xf32> to vector<24x128xf32>
    %745 = vector.broadcast %743 : vector<1x128xf32> to vector<24x128xf32>
    %746 = arith.mulf %744, %745 : vector<24x128xf32>
    %747 = arith.addf %735, %746 : vector<24x128xf32>
    %748 = vector.extract_strided_slice %0 {offsets = [0, 2], sizes = [24, 1], strides = [1, 1]} : vector<24x8xf32> to vector<24x1xf32>
    %749 = vector.extract_strided_slice %723 {offsets = [2, 0], sizes = [1, 128], strides = [1, 1]} : vector<8x128xf32> to vector<1x128xf32>
    %750 = vector.broadcast %748 : vector<24x1xf32> to vector<24x128xf32>
    %751 = vector.broadcast %749 : vector<1x128xf32> to vector<24x128xf32>
    %752 = arith.mulf %750, %751 : vector<24x128xf32>
    %753 = arith.addf %741, %752 : vector<24x128xf32>
    %754 = vector.extract_strided_slice %1 {offsets = [0, 2], sizes = [24, 1], strides = [1, 1]} : vector<24x8xf32> to vector<24x1xf32>
    %755 = vector.extract_strided_slice %668 {offsets = [2, 0], sizes = [1, 128], strides = [1, 1]} : vector<8x128xf32> to vector<1x128xf32>
    %756 = vector.broadcast %754 : vector<24x1xf32> to vector<24x128xf32>
    %757 = vector.broadcast %755 : vector<1x128xf32> to vector<24x128xf32>
    %758 = arith.mulf %756, %757 : vector<24x128xf32>
    %759 = arith.addf %747, %758 : vector<24x128xf32>
    %760 = vector.extract_strided_slice %0 {offsets = [0, 3], sizes = [24, 1], strides = [1, 1]} : vector<24x8xf32> to vector<24x1xf32>
    %761 = vector.extract_strided_slice %723 {offsets = [3, 0], sizes = [1, 128], strides = [1, 1]} : vector<8x128xf32> to vector<1x128xf32>
    %762 = vector.broadcast %760 : vector<24x1xf32> to vector<24x128xf32>
    %763 = vector.broadcast %761 : vector<1x128xf32> to vector<24x128xf32>
    %764 = arith.mulf %762, %763 : vector<24x128xf32>
    %765 = arith.addf %753, %764 : vector<24x128xf32>
    %766 = vector.extract_strided_slice %1 {offsets = [0, 3], sizes = [24, 1], strides = [1, 1]} : vector<24x8xf32> to vector<24x1xf32>
    %767 = vector.extract_strided_slice %668 {offsets = [3, 0], sizes = [1, 128], strides = [1, 1]} : vector<8x128xf32> to vector<1x128xf32>
    %768 = vector.broadcast %766 : vector<24x1xf32> to vector<24x128xf32>
    %769 = vector.broadcast %767 : vector<1x128xf32> to vector<24x128xf32>
    %770 = arith.mulf %768, %769 : vector<24x128xf32>
    %771 = arith.addf %759, %770 : vector<24x128xf32>
    %772 = vector.extract_strided_slice %0 {offsets = [0, 4], sizes = [24, 1], strides = [1, 1]} : vector<24x8xf32> to vector<24x1xf32>
    %773 = vector.extract_strided_slice %723 {offsets = [4, 0], sizes = [1, 128], strides = [1, 1]} : vector<8x128xf32> to vector<1x128xf32>
    %774 = vector.broadcast %772 : vector<24x1xf32> to vector<24x128xf32>
    %775 = vector.broadcast %773 : vector<1x128xf32> to vector<24x128xf32>
    %776 = arith.mulf %774, %775 : vector<24x128xf32>
    %777 = arith.addf %765, %776 : vector<24x128xf32>
    %778 = vector.extract_strided_slice %1 {offsets = [0, 4], sizes = [24, 1], strides = [1, 1]} : vector<24x8xf32> to vector<24x1xf32>
    %779 = vector.extract_strided_slice %668 {offsets = [4, 0], sizes = [1, 128], strides = [1, 1]} : vector<8x128xf32> to vector<1x128xf32>
    %780 = vector.broadcast %778 : vector<24x1xf32> to vector<24x128xf32>
    %781 = vector.broadcast %779 : vector<1x128xf32> to vector<24x128xf32>
    %782 = arith.mulf %780, %781 : vector<24x128xf32>
    %783 = arith.addf %771, %782 : vector<24x128xf32>
    %784 = vector.extract_strided_slice %0 {offsets = [0, 5], sizes = [24, 1], strides = [1, 1]} : vector<24x8xf32> to vector<24x1xf32>
    %785 = vector.extract_strided_slice %723 {offsets = [5, 0], sizes = [1, 128], strides = [1, 1]} : vector<8x128xf32> to vector<1x128xf32>
    %786 = vector.broadcast %784 : vector<24x1xf32> to vector<24x128xf32>
    %787 = vector.broadcast %785 : vector<1x128xf32> to vector<24x128xf32>
    %788 = arith.mulf %786, %787 : vector<24x128xf32>
    %789 = arith.addf %777, %788 : vector<24x128xf32>
    %790 = vector.extract_strided_slice %1 {offsets = [0, 5], sizes = [24, 1], strides = [1, 1]} : vector<24x8xf32> to vector<24x1xf32>
    %791 = vector.extract_strided_slice %668 {offsets = [5, 0], sizes = [1, 128], strides = [1, 1]} : vector<8x128xf32> to vector<1x128xf32>
    %792 = vector.broadcast %790 : vector<24x1xf32> to vector<24x128xf32>
    %793 = vector.broadcast %791 : vector<1x128xf32> to vector<24x128xf32>
    %794 = arith.mulf %792, %793 : vector<24x128xf32>
    %795 = arith.addf %783, %794 : vector<24x128xf32>
    %796 = vector.extract_strided_slice %0 {offsets = [0, 6], sizes = [24, 1], strides = [1, 1]} : vector<24x8xf32> to vector<24x1xf32>
    %797 = vector.extract_strided_slice %723 {offsets = [6, 0], sizes = [1, 128], strides = [1, 1]} : vector<8x128xf32> to vector<1x128xf32>
    %798 = vector.broadcast %796 : vector<24x1xf32> to vector<24x128xf32>
    %799 = vector.broadcast %797 : vector<1x128xf32> to vector<24x128xf32>
    %800 = arith.mulf %798, %799 : vector<24x128xf32>
    %801 = arith.addf %789, %800 : vector<24x128xf32>
    %802 = vector.extract_strided_slice %1 {offsets = [0, 6], sizes = [24, 1], strides = [1, 1]} : vector<24x8xf32> to vector<24x1xf32>
    %803 = vector.extract_strided_slice %668 {offsets = [6, 0], sizes = [1, 128], strides = [1, 1]} : vector<8x128xf32> to vector<1x128xf32>
    %804 = vector.broadcast %802 : vector<24x1xf32> to vector<24x128xf32>
    %805 = vector.broadcast %803 : vector<1x128xf32> to vector<24x128xf32>
    %806 = arith.mulf %804, %805 : vector<24x128xf32>
    %807 = arith.addf %795, %806 : vector<24x128xf32>
    %808 = vector.extract_strided_slice %0 {offsets = [0, 7], sizes = [24, 1], strides = [1, 1]} : vector<24x8xf32> to vector<24x1xf32>
    %809 = vector.extract_strided_slice %723 {offsets = [7, 0], sizes = [1, 128], strides = [1, 1]} : vector<8x128xf32> to vector<1x128xf32>
    %810 = vector.broadcast %808 : vector<24x1xf32> to vector<24x128xf32>
    %811 = vector.broadcast %809 : vector<1x128xf32> to vector<24x128xf32>
    %812 = arith.mulf %810, %811 : vector<24x128xf32>
    %813 = arith.addf %801, %812 : vector<24x128xf32>
    %814 = vector.extract_strided_slice %1 {offsets = [0, 7], sizes = [24, 1], strides = [1, 1]} : vector<24x8xf32> to vector<24x1xf32>
    %815 = vector.extract_strided_slice %668 {offsets = [7, 0], sizes = [1, 128], strides = [1, 1]} : vector<8x128xf32> to vector<1x128xf32>
    %816 = vector.broadcast %814 : vector<24x1xf32> to vector<24x128xf32>
    %817 = vector.broadcast %815 : vector<1x128xf32> to vector<24x128xf32>
    %818 = arith.mulf %816, %817 : vector<24x128xf32>
    %819 = arith.addf %807, %818 : vector<24x128xf32>
    %820 = vector.extract_strided_slice %813 {offsets = [0, 0], sizes = [8, 128], strides = [1, 1]} : vector<24x128xf32> to vector<8x128xf32>
    %821 = vector.extract_strided_slice %819 {offsets = [0, 0], sizes = [8, 128], strides = [1, 1]} : vector<24x128xf32> to vector<8x128xf32>
    %822 = arith.addf %820, %821 : vector<8x128xf32>
    %823 = arith.negf %822 : vector<8x128xf32>
    %824 = math.exp %823 : vector<8x128xf32>
    %cst_41 = arith.constant 1.000000e+00 : f32
    %825 = vector.broadcast %cst_41 : f32 to vector<8x128xf32>
    %826 = arith.addf %825, %824 : vector<8x128xf32>
    %827 = arith.divf %825, %826 : vector<8x128xf32>
    %828 = vector.extract_strided_slice %813 {offsets = [8, 0], sizes = [8, 128], strides = [1, 1]} : vector<24x128xf32> to vector<8x128xf32>
    %829 = vector.extract_strided_slice %819 {offsets = [8, 0], sizes = [8, 128], strides = [1, 1]} : vector<24x128xf32> to vector<8x128xf32>
    %830 = arith.addf %828, %829 : vector<8x128xf32>
    %831 = arith.negf %830 : vector<8x128xf32>
    %832 = math.exp %831 : vector<8x128xf32>
    %cst_42 = arith.constant 1.000000e+00 : f32
    %833 = vector.broadcast %cst_42 : f32 to vector<8x128xf32>
    %834 = arith.addf %833, %832 : vector<8x128xf32>
    %835 = arith.divf %833, %834 : vector<8x128xf32>
    %836 = vector.extract_strided_slice %813 {offsets = [16, 0], sizes = [8, 128], strides = [1, 1]} : vector<24x128xf32> to vector<8x128xf32>
    %837 = vector.extract_strided_slice %819 {offsets = [16, 0], sizes = [8, 128], strides = [1, 1]} : vector<24x128xf32> to vector<8x128xf32>
    %838 = arith.mulf %827, %837 : vector<8x128xf32>
    %839 = arith.addf %836, %838 : vector<8x128xf32>
    %840 = math.tanh %839 : vector<8x128xf32>
    %cst_43 = arith.constant 1.000000e+00 : f32
    %841 = vector.broadcast %cst_43 : f32 to vector<8x128xf32>
    %842 = arith.subf %841, %835 : vector<8x128xf32>
    %843 = arith.mulf %842, %840 : vector<8x128xf32>
    %844 = arith.mulf %835, %668 : vector<8x128xf32>
    %845 = arith.addf %843, %844 : vector<8x128xf32>
    %846 = vector.extract_strided_slice %2 {offsets = [0, 0], sizes = [8, 1], strides = [1, 1]} : vector<8x8xf32> to vector<8x1xf32>
    %847 = vector.extract_strided_slice %845 {offsets = [0, 0], sizes = [1, 128], strides = [1, 1]} : vector<8x128xf32> to vector<1x128xf32>
    %848 = vector.broadcast %846 : vector<8x1xf32> to vector<8x128xf32>
    %849 = vector.broadcast %847 : vector<1x128xf32> to vector<8x128xf32>
    %850 = arith.mulf %848, %849 : vector<8x128xf32>
    %851 = arith.addf %11, %850 : vector<8x128xf32>
    %852 = vector.extract_strided_slice %2 {offsets = [0, 1], sizes = [8, 1], strides = [1, 1]} : vector<8x8xf32> to vector<8x1xf32>
    %853 = vector.extract_strided_slice %845 {offsets = [1, 0], sizes = [1, 128], strides = [1, 1]} : vector<8x128xf32> to vector<1x128xf32>
    %854 = vector.broadcast %852 : vector<8x1xf32> to vector<8x128xf32>
    %855 = vector.broadcast %853 : vector<1x128xf32> to vector<8x128xf32>
    %856 = arith.mulf %854, %855 : vector<8x128xf32>
    %857 = arith.addf %851, %856 : vector<8x128xf32>
    %858 = vector.extract_strided_slice %2 {offsets = [0, 2], sizes = [8, 1], strides = [1, 1]} : vector<8x8xf32> to vector<8x1xf32>
    %859 = vector.extract_strided_slice %845 {offsets = [2, 0], sizes = [1, 128], strides = [1, 1]} : vector<8x128xf32> to vector<1x128xf32>
    %860 = vector.broadcast %858 : vector<8x1xf32> to vector<8x128xf32>
    %861 = vector.broadcast %859 : vector<1x128xf32> to vector<8x128xf32>
    %862 = arith.mulf %860, %861 : vector<8x128xf32>
    %863 = arith.addf %857, %862 : vector<8x128xf32>
    %864 = vector.extract_strided_slice %2 {offsets = [0, 3], sizes = [8, 1], strides = [1, 1]} : vector<8x8xf32> to vector<8x1xf32>
    %865 = vector.extract_strided_slice %845 {offsets = [3, 0], sizes = [1, 128], strides = [1, 1]} : vector<8x128xf32> to vector<1x128xf32>
    %866 = vector.broadcast %864 : vector<8x1xf32> to vector<8x128xf32>
    %867 = vector.broadcast %865 : vector<1x128xf32> to vector<8x128xf32>
    %868 = arith.mulf %866, %867 : vector<8x128xf32>
    %869 = arith.addf %863, %868 : vector<8x128xf32>
    %870 = vector.extract_strided_slice %2 {offsets = [0, 4], sizes = [8, 1], strides = [1, 1]} : vector<8x8xf32> to vector<8x1xf32>
    %871 = vector.extract_strided_slice %845 {offsets = [4, 0], sizes = [1, 128], strides = [1, 1]} : vector<8x128xf32> to vector<1x128xf32>
    %872 = vector.broadcast %870 : vector<8x1xf32> to vector<8x128xf32>
    %873 = vector.broadcast %871 : vector<1x128xf32> to vector<8x128xf32>
    %874 = arith.mulf %872, %873 : vector<8x128xf32>
    %875 = arith.addf %869, %874 : vector<8x128xf32>
    %876 = vector.extract_strided_slice %2 {offsets = [0, 5], sizes = [8, 1], strides = [1, 1]} : vector<8x8xf32> to vector<8x1xf32>
    %877 = vector.extract_strided_slice %845 {offsets = [5, 0], sizes = [1, 128], strides = [1, 1]} : vector<8x128xf32> to vector<1x128xf32>
    %878 = vector.broadcast %876 : vector<8x1xf32> to vector<8x128xf32>
    %879 = vector.broadcast %877 : vector<1x128xf32> to vector<8x128xf32>
    %880 = arith.mulf %878, %879 : vector<8x128xf32>
    %881 = arith.addf %875, %880 : vector<8x128xf32>
    %882 = vector.extract_strided_slice %2 {offsets = [0, 6], sizes = [8, 1], strides = [1, 1]} : vector<8x8xf32> to vector<8x1xf32>
    %883 = vector.extract_strided_slice %845 {offsets = [6, 0], sizes = [1, 128], strides = [1, 1]} : vector<8x128xf32> to vector<1x128xf32>
    %884 = vector.broadcast %882 : vector<8x1xf32> to vector<8x128xf32>
    %885 = vector.broadcast %883 : vector<1x128xf32> to vector<8x128xf32>
    %886 = arith.mulf %884, %885 : vector<8x128xf32>
    %887 = arith.addf %881, %886 : vector<8x128xf32>
    %888 = vector.extract_strided_slice %2 {offsets = [0, 7], sizes = [8, 1], strides = [1, 1]} : vector<8x8xf32> to vector<8x1xf32>
    %889 = vector.extract_strided_slice %845 {offsets = [7, 0], sizes = [1, 128], strides = [1, 1]} : vector<8x128xf32> to vector<1x128xf32>
    %890 = vector.broadcast %888 : vector<8x1xf32> to vector<8x128xf32>
    %891 = vector.broadcast %889 : vector<1x128xf32> to vector<8x128xf32>
    %892 = arith.mulf %890, %891 : vector<8x128xf32>
    %893 = arith.addf %887, %892 : vector<8x128xf32>
    %894 = arith.index_cast %c4_i32 : i32 to index
    %c0_44 = arith.constant 0 : index
    %c0_45 = arith.constant 0 : index
    %895 = vector.load %arg8[%894, %c0_44, %c0_45] : memref<8x8x128xf32, #tpu.memory_space<vmem>>, vector<1x8x128xf32>
    %896 = vector.shape_cast %895 : vector<1x8x128xf32> to vector<8x128xf32>
    %897 = vector.shape_cast %893 : vector<8x128xf32> to vector<1x8x128xf32>
    tpu.vector_store %arg8[%894, %c0_44, %c0_45], %897 {strides = array<i32>} : memref<8x8x128xf32, #tpu.memory_space<vmem>>, vector<1x8x128xf32>,
    %c5_i32 = arith.constant 5 : i32
    %898 = arith.index_cast %c5_i32 : i32 to index
    %c0_46 = arith.constant 0 : index
    %c0_47 = arith.constant 0 : index
    %899 = vector.load %arg1[%898, %c0_46, %c0_47] : memref<8x8x128xf32, #tpu.memory_space<vmem>>, vector<1x8x128xf32>
    %900 = vector.shape_cast %899 : vector<1x8x128xf32> to vector<8x128xf32>
    %901 = vector.extract_strided_slice %0 {offsets = [0, 0], sizes = [24, 1], strides = [1, 1]} : vector<24x8xf32> to vector<24x1xf32>
    %902 = vector.extract_strided_slice %900 {offsets = [0, 0], sizes = [1, 128], strides = [1, 1]} : vector<8x128xf32> to vector<1x128xf32>
    %903 = vector.broadcast %901 : vector<24x1xf32> to vector<24x128xf32>
    %904 = vector.broadcast %902 : vector<1x128xf32> to vector<24x128xf32>
    %905 = arith.mulf %903, %904 : vector<24x128xf32>
    %906 = arith.addf %5, %905 : vector<24x128xf32>
    %907 = vector.extract_strided_slice %1 {offsets = [0, 0], sizes = [24, 1], strides = [1, 1]} : vector<24x8xf32> to vector<24x1xf32>
    %908 = vector.extract_strided_slice %845 {offsets = [0, 0], sizes = [1, 128], strides = [1, 1]} : vector<8x128xf32> to vector<1x128xf32>
    %909 = vector.broadcast %907 : vector<24x1xf32> to vector<24x128xf32>
    %910 = vector.broadcast %908 : vector<1x128xf32> to vector<24x128xf32>
    %911 = arith.mulf %909, %910 : vector<24x128xf32>
    %912 = arith.addf %8, %911 : vector<24x128xf32>
    %913 = vector.extract_strided_slice %0 {offsets = [0, 1], sizes = [24, 1], strides = [1, 1]} : vector<24x8xf32> to vector<24x1xf32>
    %914 = vector.extract_strided_slice %900 {offsets = [1, 0], sizes = [1, 128], strides = [1, 1]} : vector<8x128xf32> to vector<1x128xf32>
    %915 = vector.broadcast %913 : vector<24x1xf32> to vector<24x128xf32>
    %916 = vector.broadcast %914 : vector<1x128xf32> to vector<24x128xf32>
    %917 = arith.mulf %915, %916 : vector<24x128xf32>
    %918 = arith.addf %906, %917 : vector<24x128xf32>
    %919 = vector.extract_strided_slice %1 {offsets = [0, 1], sizes = [24, 1], strides = [1, 1]} : vector<24x8xf32> to vector<24x1xf32>
    %920 = vector.extract_strided_slice %845 {offsets = [1, 0], sizes = [1, 128], strides = [1, 1]} : vector<8x128xf32> to vector<1x128xf32>
    %921 = vector.broadcast %919 : vector<24x1xf32> to vector<24x128xf32>
    %922 = vector.broadcast %920 : vector<1x128xf32> to vector<24x128xf32>
    %923 = arith.mulf %921, %922 : vector<24x128xf32>
    %924 = arith.addf %912, %923 : vector<24x128xf32>
    %925 = vector.extract_strided_slice %0 {offsets = [0, 2], sizes = [24, 1], strides = [1, 1]} : vector<24x8xf32> to vector<24x1xf32>
    %926 = vector.extract_strided_slice %900 {offsets = [2, 0], sizes = [1, 128], strides = [1, 1]} : vector<8x128xf32> to vector<1x128xf32>
    %927 = vector.broadcast %925 : vector<24x1xf32> to vector<24x128xf32>
    %928 = vector.broadcast %926 : vector<1x128xf32> to vector<24x128xf32>
    %929 = arith.mulf %927, %928 : vector<24x128xf32>
    %930 = arith.addf %918, %929 : vector<24x128xf32>
    %931 = vector.extract_strided_slice %1 {offsets = [0, 2], sizes = [24, 1], strides = [1, 1]} : vector<24x8xf32> to vector<24x1xf32>
    %932 = vector.extract_strided_slice %845 {offsets = [2, 0], sizes = [1, 128], strides = [1, 1]} : vector<8x128xf32> to vector<1x128xf32>
    %933 = vector.broadcast %931 : vector<24x1xf32> to vector<24x128xf32>
    %934 = vector.broadcast %932 : vector<1x128xf32> to vector<24x128xf32>
    %935 = arith.mulf %933, %934 : vector<24x128xf32>
    %936 = arith.addf %924, %935 : vector<24x128xf32>
    %937 = vector.extract_strided_slice %0 {offsets = [0, 3], sizes = [24, 1], strides = [1, 1]} : vector<24x8xf32> to vector<24x1xf32>
    %938 = vector.extract_strided_slice %900 {offsets = [3, 0], sizes = [1, 128], strides = [1, 1]} : vector<8x128xf32> to vector<1x128xf32>
    %939 = vector.broadcast %937 : vector<24x1xf32> to vector<24x128xf32>
    %940 = vector.broadcast %938 : vector<1x128xf32> to vector<24x128xf32>
    %941 = arith.mulf %939, %940 : vector<24x128xf32>
    %942 = arith.addf %930, %941 : vector<24x128xf32>
    %943 = vector.extract_strided_slice %1 {offsets = [0, 3], sizes = [24, 1], strides = [1, 1]} : vector<24x8xf32> to vector<24x1xf32>
    %944 = vector.extract_strided_slice %845 {offsets = [3, 0], sizes = [1, 128], strides = [1, 1]} : vector<8x128xf32> to vector<1x128xf32>
    %945 = vector.broadcast %943 : vector<24x1xf32> to vector<24x128xf32>
    %946 = vector.broadcast %944 : vector<1x128xf32> to vector<24x128xf32>
    %947 = arith.mulf %945, %946 : vector<24x128xf32>
    %948 = arith.addf %936, %947 : vector<24x128xf32>
    %949 = vector.extract_strided_slice %0 {offsets = [0, 4], sizes = [24, 1], strides = [1, 1]} : vector<24x8xf32> to vector<24x1xf32>
    %950 = vector.extract_strided_slice %900 {offsets = [4, 0], sizes = [1, 128], strides = [1, 1]} : vector<8x128xf32> to vector<1x128xf32>
    %951 = vector.broadcast %949 : vector<24x1xf32> to vector<24x128xf32>
    %952 = vector.broadcast %950 : vector<1x128xf32> to vector<24x128xf32>
    %953 = arith.mulf %951, %952 : vector<24x128xf32>
    %954 = arith.addf %942, %953 : vector<24x128xf32>
    %955 = vector.extract_strided_slice %1 {offsets = [0, 4], sizes = [24, 1], strides = [1, 1]} : vector<24x8xf32> to vector<24x1xf32>
    %956 = vector.extract_strided_slice %845 {offsets = [4, 0], sizes = [1, 128], strides = [1, 1]} : vector<8x128xf32> to vector<1x128xf32>
    %957 = vector.broadcast %955 : vector<24x1xf32> to vector<24x128xf32>
    %958 = vector.broadcast %956 : vector<1x128xf32> to vector<24x128xf32>
    %959 = arith.mulf %957, %958 : vector<24x128xf32>
    %960 = arith.addf %948, %959 : vector<24x128xf32>
    %961 = vector.extract_strided_slice %0 {offsets = [0, 5], sizes = [24, 1], strides = [1, 1]} : vector<24x8xf32> to vector<24x1xf32>
    %962 = vector.extract_strided_slice %900 {offsets = [5, 0], sizes = [1, 128], strides = [1, 1]} : vector<8x128xf32> to vector<1x128xf32>
    %963 = vector.broadcast %961 : vector<24x1xf32> to vector<24x128xf32>
    %964 = vector.broadcast %962 : vector<1x128xf32> to vector<24x128xf32>
    %965 = arith.mulf %963, %964 : vector<24x128xf32>
    %966 = arith.addf %954, %965 : vector<24x128xf32>
    %967 = vector.extract_strided_slice %1 {offsets = [0, 5], sizes = [24, 1], strides = [1, 1]} : vector<24x8xf32> to vector<24x1xf32>
    %968 = vector.extract_strided_slice %845 {offsets = [5, 0], sizes = [1, 128], strides = [1, 1]} : vector<8x128xf32> to vector<1x128xf32>
    %969 = vector.broadcast %967 : vector<24x1xf32> to vector<24x128xf32>
    %970 = vector.broadcast %968 : vector<1x128xf32> to vector<24x128xf32>
    %971 = arith.mulf %969, %970 : vector<24x128xf32>
    %972 = arith.addf %960, %971 : vector<24x128xf32>
    %973 = vector.extract_strided_slice %0 {offsets = [0, 6], sizes = [24, 1], strides = [1, 1]} : vector<24x8xf32> to vector<24x1xf32>
    %974 = vector.extract_strided_slice %900 {offsets = [6, 0], sizes = [1, 128], strides = [1, 1]} : vector<8x128xf32> to vector<1x128xf32>
    %975 = vector.broadcast %973 : vector<24x1xf32> to vector<24x128xf32>
    %976 = vector.broadcast %974 : vector<1x128xf32> to vector<24x128xf32>
    %977 = arith.mulf %975, %976 : vector<24x128xf32>
    %978 = arith.addf %966, %977 : vector<24x128xf32>
    %979 = vector.extract_strided_slice %1 {offsets = [0, 6], sizes = [24, 1], strides = [1, 1]} : vector<24x8xf32> to vector<24x1xf32>
    %980 = vector.extract_strided_slice %845 {offsets = [6, 0], sizes = [1, 128], strides = [1, 1]} : vector<8x128xf32> to vector<1x128xf32>
    %981 = vector.broadcast %979 : vector<24x1xf32> to vector<24x128xf32>
    %982 = vector.broadcast %980 : vector<1x128xf32> to vector<24x128xf32>
    %983 = arith.mulf %981, %982 : vector<24x128xf32>
    %984 = arith.addf %972, %983 : vector<24x128xf32>
    %985 = vector.extract_strided_slice %0 {offsets = [0, 7], sizes = [24, 1], strides = [1, 1]} : vector<24x8xf32> to vector<24x1xf32>
    %986 = vector.extract_strided_slice %900 {offsets = [7, 0], sizes = [1, 128], strides = [1, 1]} : vector<8x128xf32> to vector<1x128xf32>
    %987 = vector.broadcast %985 : vector<24x1xf32> to vector<24x128xf32>
    %988 = vector.broadcast %986 : vector<1x128xf32> to vector<24x128xf32>
    %989 = arith.mulf %987, %988 : vector<24x128xf32>
    %990 = arith.addf %978, %989 : vector<24x128xf32>
    %991 = vector.extract_strided_slice %1 {offsets = [0, 7], sizes = [24, 1], strides = [1, 1]} : vector<24x8xf32> to vector<24x1xf32>
    %992 = vector.extract_strided_slice %845 {offsets = [7, 0], sizes = [1, 128], strides = [1, 1]} : vector<8x128xf32> to vector<1x128xf32>
    %993 = vector.broadcast %991 : vector<24x1xf32> to vector<24x128xf32>
    %994 = vector.broadcast %992 : vector<1x128xf32> to vector<24x128xf32>
    %995 = arith.mulf %993, %994 : vector<24x128xf32>
    %996 = arith.addf %984, %995 : vector<24x128xf32>
    %997 = vector.extract_strided_slice %990 {offsets = [0, 0], sizes = [8, 128], strides = [1, 1]} : vector<24x128xf32> to vector<8x128xf32>
    %998 = vector.extract_strided_slice %996 {offsets = [0, 0], sizes = [8, 128], strides = [1, 1]} : vector<24x128xf32> to vector<8x128xf32>
    %999 = arith.addf %997, %998 : vector<8x128xf32>
    %1000 = arith.negf %999 : vector<8x128xf32>
    %1001 = math.exp %1000 : vector<8x128xf32>
    %cst_48 = arith.constant 1.000000e+00 : f32
    %1002 = vector.broadcast %cst_48 : f32 to vector<8x128xf32>
    %1003 = arith.addf %1002, %1001 : vector<8x128xf32>
    %1004 = arith.divf %1002, %1003 : vector<8x128xf32>
    %1005 = vector.extract_strided_slice %990 {offsets = [8, 0], sizes = [8, 128], strides = [1, 1]} : vector<24x128xf32> to vector<8x128xf32>
    %1006 = vector.extract_strided_slice %996 {offsets = [8, 0], sizes = [8, 128], strides = [1, 1]} : vector<24x128xf32> to vector<8x128xf32>
    %1007 = arith.addf %1005, %1006 : vector<8x128xf32>
    %1008 = arith.negf %1007 : vector<8x128xf32>
    %1009 = math.exp %1008 : vector<8x128xf32>
    %cst_49 = arith.constant 1.000000e+00 : f32
    %1010 = vector.broadcast %cst_49 : f32 to vector<8x128xf32>
    %1011 = arith.addf %1010, %1009 : vector<8x128xf32>
    %1012 = arith.divf %1010, %1011 : vector<8x128xf32>
    %1013 = vector.extract_strided_slice %990 {offsets = [16, 0], sizes = [8, 128], strides = [1, 1]} : vector<24x128xf32> to vector<8x128xf32>
    %1014 = vector.extract_strided_slice %996 {offsets = [16, 0], sizes = [8, 128], strides = [1, 1]} : vector<24x128xf32> to vector<8x128xf32>
    %1015 = arith.mulf %1004, %1014 : vector<8x128xf32>
    %1016 = arith.addf %1013, %1015 : vector<8x128xf32>
    %1017 = math.tanh %1016 : vector<8x128xf32>
    %cst_50 = arith.constant 1.000000e+00 : f32
    %1018 = vector.broadcast %cst_50 : f32 to vector<8x128xf32>
    %1019 = arith.subf %1018, %1012 : vector<8x128xf32>
    %1020 = arith.mulf %1019, %1017 : vector<8x128xf32>
    %1021 = arith.mulf %1012, %845 : vector<8x128xf32>
    %1022 = arith.addf %1020, %1021 : vector<8x128xf32>
    %1023 = vector.extract_strided_slice %2 {offsets = [0, 0], sizes = [8, 1], strides = [1, 1]} : vector<8x8xf32> to vector<8x1xf32>
    %1024 = vector.extract_strided_slice %1022 {offsets = [0, 0], sizes = [1, 128], strides = [1, 1]} : vector<8x128xf32> to vector<1x128xf32>
    %1025 = vector.broadcast %1023 : vector<8x1xf32> to vector<8x128xf32>
    %1026 = vector.broadcast %1024 : vector<1x128xf32> to vector<8x128xf32>
    %1027 = arith.mulf %1025, %1026 : vector<8x128xf32>
    %1028 = arith.addf %11, %1027 : vector<8x128xf32>
    %1029 = vector.extract_strided_slice %2 {offsets = [0, 1], sizes = [8, 1], strides = [1, 1]} : vector<8x8xf32> to vector<8x1xf32>
    %1030 = vector.extract_strided_slice %1022 {offsets = [1, 0], sizes = [1, 128], strides = [1, 1]} : vector<8x128xf32> to vector<1x128xf32>
    %1031 = vector.broadcast %1029 : vector<8x1xf32> to vector<8x128xf32>
    %1032 = vector.broadcast %1030 : vector<1x128xf32> to vector<8x128xf32>
    %1033 = arith.mulf %1031, %1032 : vector<8x128xf32>
    %1034 = arith.addf %1028, %1033 : vector<8x128xf32>
    %1035 = vector.extract_strided_slice %2 {offsets = [0, 2], sizes = [8, 1], strides = [1, 1]} : vector<8x8xf32> to vector<8x1xf32>
    %1036 = vector.extract_strided_slice %1022 {offsets = [2, 0], sizes = [1, 128], strides = [1, 1]} : vector<8x128xf32> to vector<1x128xf32>
    %1037 = vector.broadcast %1035 : vector<8x1xf32> to vector<8x128xf32>
    %1038 = vector.broadcast %1036 : vector<1x128xf32> to vector<8x128xf32>
    %1039 = arith.mulf %1037, %1038 : vector<8x128xf32>
    %1040 = arith.addf %1034, %1039 : vector<8x128xf32>
    %1041 = vector.extract_strided_slice %2 {offsets = [0, 3], sizes = [8, 1], strides = [1, 1]} : vector<8x8xf32> to vector<8x1xf32>
    %1042 = vector.extract_strided_slice %1022 {offsets = [3, 0], sizes = [1, 128], strides = [1, 1]} : vector<8x128xf32> to vector<1x128xf32>
    %1043 = vector.broadcast %1041 : vector<8x1xf32> to vector<8x128xf32>
    %1044 = vector.broadcast %1042 : vector<1x128xf32> to vector<8x128xf32>
    %1045 = arith.mulf %1043, %1044 : vector<8x128xf32>
    %1046 = arith.addf %1040, %1045 : vector<8x128xf32>
    %1047 = vector.extract_strided_slice %2 {offsets = [0, 4], sizes = [8, 1], strides = [1, 1]} : vector<8x8xf32> to vector<8x1xf32>
    %1048 = vector.extract_strided_slice %1022 {offsets = [4, 0], sizes = [1, 128], strides = [1, 1]} : vector<8x128xf32> to vector<1x128xf32>
    %1049 = vector.broadcast %1047 : vector<8x1xf32> to vector<8x128xf32>
    %1050 = vector.broadcast %1048 : vector<1x128xf32> to vector<8x128xf32>
    %1051 = arith.mulf %1049, %1050 : vector<8x128xf32>
    %1052 = arith.addf %1046, %1051 : vector<8x128xf32>
    %1053 = vector.extract_strided_slice %2 {offsets = [0, 5], sizes = [8, 1], strides = [1, 1]} : vector<8x8xf32> to vector<8x1xf32>
    %1054 = vector.extract_strided_slice %1022 {offsets = [5, 0], sizes = [1, 128], strides = [1, 1]} : vector<8x128xf32> to vector<1x128xf32>
    %1055 = vector.broadcast %1053 : vector<8x1xf32> to vector<8x128xf32>
    %1056 = vector.broadcast %1054 : vector<1x128xf32> to vector<8x128xf32>
    %1057 = arith.mulf %1055, %1056 : vector<8x128xf32>
    %1058 = arith.addf %1052, %1057 : vector<8x128xf32>
    %1059 = vector.extract_strided_slice %2 {offsets = [0, 6], sizes = [8, 1], strides = [1, 1]} : vector<8x8xf32> to vector<8x1xf32>
    %1060 = vector.extract_strided_slice %1022 {offsets = [6, 0], sizes = [1, 128], strides = [1, 1]} : vector<8x128xf32> to vector<1x128xf32>
    %1061 = vector.broadcast %1059 : vector<8x1xf32> to vector<8x128xf32>
    %1062 = vector.broadcast %1060 : vector<1x128xf32> to vector<8x128xf32>
    %1063 = arith.mulf %1061, %1062 : vector<8x128xf32>
    %1064 = arith.addf %1058, %1063 : vector<8x128xf32>
    %1065 = vector.extract_strided_slice %2 {offsets = [0, 7], sizes = [8, 1], strides = [1, 1]} : vector<8x8xf32> to vector<8x1xf32>
    %1066 = vector.extract_strided_slice %1022 {offsets = [7, 0], sizes = [1, 128], strides = [1, 1]} : vector<8x128xf32> to vector<1x128xf32>
    %1067 = vector.broadcast %1065 : vector<8x1xf32> to vector<8x128xf32>
    %1068 = vector.broadcast %1066 : vector<1x128xf32> to vector<8x128xf32>
    %1069 = arith.mulf %1067, %1068 : vector<8x128xf32>
    %1070 = arith.addf %1064, %1069 : vector<8x128xf32>
    %1071 = arith.index_cast %c5_i32 : i32 to index
    %c0_51 = arith.constant 0 : index
    %c0_52 = arith.constant 0 : index
    %1072 = vector.load %arg8[%1071, %c0_51, %c0_52] : memref<8x8x128xf32, #tpu.memory_space<vmem>>, vector<1x8x128xf32>
    %1073 = vector.shape_cast %1072 : vector<1x8x128xf32> to vector<8x128xf32>
    %1074 = vector.shape_cast %1070 : vector<8x128xf32> to vector<1x8x128xf32>
    tpu.vector_store %arg8[%1071, %c0_51, %c0_52], %1074 {strides = array<i32>} : memref<8x8x128xf32, #tpu.memory_space<vmem>>, vector<1x8x128xf32>,
    %c6_i32 = arith.constant 6 : i32
    %1075 = arith.index_cast %c6_i32 : i32 to index
    %c0_53 = arith.constant 0 : index
    %c0_54 = arith.constant 0 : index
    %1076 = vector.load %arg1[%1075, %c0_53, %c0_54] : memref<8x8x128xf32, #tpu.memory_space<vmem>>, vector<1x8x128xf32>
    %1077 = vector.shape_cast %1076 : vector<1x8x128xf32> to vector<8x128xf32>
    %1078 = vector.extract_strided_slice %0 {offsets = [0, 0], sizes = [24, 1], strides = [1, 1]} : vector<24x8xf32> to vector<24x1xf32>
    %1079 = vector.extract_strided_slice %1077 {offsets = [0, 0], sizes = [1, 128], strides = [1, 1]} : vector<8x128xf32> to vector<1x128xf32>
    %1080 = vector.broadcast %1078 : vector<24x1xf32> to vector<24x128xf32>
    %1081 = vector.broadcast %1079 : vector<1x128xf32> to vector<24x128xf32>
    %1082 = arith.mulf %1080, %1081 : vector<24x128xf32>
    %1083 = arith.addf %5, %1082 : vector<24x128xf32>
    %1084 = vector.extract_strided_slice %1 {offsets = [0, 0], sizes = [24, 1], strides = [1, 1]} : vector<24x8xf32> to vector<24x1xf32>
    %1085 = vector.extract_strided_slice %1022 {offsets = [0, 0], sizes = [1, 128], strides = [1, 1]} : vector<8x128xf32> to vector<1x128xf32>
    %1086 = vector.broadcast %1084 : vector<24x1xf32> to vector<24x128xf32>
    %1087 = vector.broadcast %1085 : vector<1x128xf32> to vector<24x128xf32>
    %1088 = arith.mulf %1086, %1087 : vector<24x128xf32>
    %1089 = arith.addf %8, %1088 : vector<24x128xf32>
    %1090 = vector.extract_strided_slice %0 {offsets = [0, 1], sizes = [24, 1], strides = [1, 1]} : vector<24x8xf32> to vector<24x1xf32>
    %1091 = vector.extract_strided_slice %1077 {offsets = [1, 0], sizes = [1, 128], strides = [1, 1]} : vector<8x128xf32> to vector<1x128xf32>
    %1092 = vector.broadcast %1090 : vector<24x1xf32> to vector<24x128xf32>
    %1093 = vector.broadcast %1091 : vector<1x128xf32> to vector<24x128xf32>
    %1094 = arith.mulf %1092, %1093 : vector<24x128xf32>
    %1095 = arith.addf %1083, %1094 : vector<24x128xf32>
    %1096 = vector.extract_strided_slice %1 {offsets = [0, 1], sizes = [24, 1], strides = [1, 1]} : vector<24x8xf32> to vector<24x1xf32>
    %1097 = vector.extract_strided_slice %1022 {offsets = [1, 0], sizes = [1, 128], strides = [1, 1]} : vector<8x128xf32> to vector<1x128xf32>
    %1098 = vector.broadcast %1096 : vector<24x1xf32> to vector<24x128xf32>
    %1099 = vector.broadcast %1097 : vector<1x128xf32> to vector<24x128xf32>
    %1100 = arith.mulf %1098, %1099 : vector<24x128xf32>
    %1101 = arith.addf %1089, %1100 : vector<24x128xf32>
    %1102 = vector.extract_strided_slice %0 {offsets = [0, 2], sizes = [24, 1], strides = [1, 1]} : vector<24x8xf32> to vector<24x1xf32>
    %1103 = vector.extract_strided_slice %1077 {offsets = [2, 0], sizes = [1, 128], strides = [1, 1]} : vector<8x128xf32> to vector<1x128xf32>
    %1104 = vector.broadcast %1102 : vector<24x1xf32> to vector<24x128xf32>
    %1105 = vector.broadcast %1103 : vector<1x128xf32> to vector<24x128xf32>
    %1106 = arith.mulf %1104, %1105 : vector<24x128xf32>
    %1107 = arith.addf %1095, %1106 : vector<24x128xf32>
    %1108 = vector.extract_strided_slice %1 {offsets = [0, 2], sizes = [24, 1], strides = [1, 1]} : vector<24x8xf32> to vector<24x1xf32>
    %1109 = vector.extract_strided_slice %1022 {offsets = [2, 0], sizes = [1, 128], strides = [1, 1]} : vector<8x128xf32> to vector<1x128xf32>
    %1110 = vector.broadcast %1108 : vector<24x1xf32> to vector<24x128xf32>
    %1111 = vector.broadcast %1109 : vector<1x128xf32> to vector<24x128xf32>
    %1112 = arith.mulf %1110, %1111 : vector<24x128xf32>
    %1113 = arith.addf %1101, %1112 : vector<24x128xf32>
    %1114 = vector.extract_strided_slice %0 {offsets = [0, 3], sizes = [24, 1], strides = [1, 1]} : vector<24x8xf32> to vector<24x1xf32>
    %1115 = vector.extract_strided_slice %1077 {offsets = [3, 0], sizes = [1, 128], strides = [1, 1]} : vector<8x128xf32> to vector<1x128xf32>
    %1116 = vector.broadcast %1114 : vector<24x1xf32> to vector<24x128xf32>
    %1117 = vector.broadcast %1115 : vector<1x128xf32> to vector<24x128xf32>
    %1118 = arith.mulf %1116, %1117 : vector<24x128xf32>
    %1119 = arith.addf %1107, %1118 : vector<24x128xf32>
    %1120 = vector.extract_strided_slice %1 {offsets = [0, 3], sizes = [24, 1], strides = [1, 1]} : vector<24x8xf32> to vector<24x1xf32>
    %1121 = vector.extract_strided_slice %1022 {offsets = [3, 0], sizes = [1, 128], strides = [1, 1]} : vector<8x128xf32> to vector<1x128xf32>
    %1122 = vector.broadcast %1120 : vector<24x1xf32> to vector<24x128xf32>
    %1123 = vector.broadcast %1121 : vector<1x128xf32> to vector<24x128xf32>
    %1124 = arith.mulf %1122, %1123 : vector<24x128xf32>
    %1125 = arith.addf %1113, %1124 : vector<24x128xf32>
    %1126 = vector.extract_strided_slice %0 {offsets = [0, 4], sizes = [24, 1], strides = [1, 1]} : vector<24x8xf32> to vector<24x1xf32>
    %1127 = vector.extract_strided_slice %1077 {offsets = [4, 0], sizes = [1, 128], strides = [1, 1]} : vector<8x128xf32> to vector<1x128xf32>
    %1128 = vector.broadcast %1126 : vector<24x1xf32> to vector<24x128xf32>
    %1129 = vector.broadcast %1127 : vector<1x128xf32> to vector<24x128xf32>
    %1130 = arith.mulf %1128, %1129 : vector<24x128xf32>
    %1131 = arith.addf %1119, %1130 : vector<24x128xf32>
    %1132 = vector.extract_strided_slice %1 {offsets = [0, 4], sizes = [24, 1], strides = [1, 1]} : vector<24x8xf32> to vector<24x1xf32>
    %1133 = vector.extract_strided_slice %1022 {offsets = [4, 0], sizes = [1, 128], strides = [1, 1]} : vector<8x128xf32> to vector<1x128xf32>
    %1134 = vector.broadcast %1132 : vector<24x1xf32> to vector<24x128xf32>
    %1135 = vector.broadcast %1133 : vector<1x128xf32> to vector<24x128xf32>
    %1136 = arith.mulf %1134, %1135 : vector<24x128xf32>
    %1137 = arith.addf %1125, %1136 : vector<24x128xf32>
    %1138 = vector.extract_strided_slice %0 {offsets = [0, 5], sizes = [24, 1], strides = [1, 1]} : vector<24x8xf32> to vector<24x1xf32>
    %1139 = vector.extract_strided_slice %1077 {offsets = [5, 0], sizes = [1, 128], strides = [1, 1]} : vector<8x128xf32> to vector<1x128xf32>
    %1140 = vector.broadcast %1138 : vector<24x1xf32> to vector<24x128xf32>
    %1141 = vector.broadcast %1139 : vector<1x128xf32> to vector<24x128xf32>
    %1142 = arith.mulf %1140, %1141 : vector<24x128xf32>
    %1143 = arith.addf %1131, %1142 : vector<24x128xf32>
    %1144 = vector.extract_strided_slice %1 {offsets = [0, 5], sizes = [24, 1], strides = [1, 1]} : vector<24x8xf32> to vector<24x1xf32>
    %1145 = vector.extract_strided_slice %1022 {offsets = [5, 0], sizes = [1, 128], strides = [1, 1]} : vector<8x128xf32> to vector<1x128xf32>
    %1146 = vector.broadcast %1144 : vector<24x1xf32> to vector<24x128xf32>
    %1147 = vector.broadcast %1145 : vector<1x128xf32> to vector<24x128xf32>
    %1148 = arith.mulf %1146, %1147 : vector<24x128xf32>
    %1149 = arith.addf %1137, %1148 : vector<24x128xf32>
    %1150 = vector.extract_strided_slice %0 {offsets = [0, 6], sizes = [24, 1], strides = [1, 1]} : vector<24x8xf32> to vector<24x1xf32>
    %1151 = vector.extract_strided_slice %1077 {offsets = [6, 0], sizes = [1, 128], strides = [1, 1]} : vector<8x128xf32> to vector<1x128xf32>
    %1152 = vector.broadcast %1150 : vector<24x1xf32> to vector<24x128xf32>
    %1153 = vector.broadcast %1151 : vector<1x128xf32> to vector<24x128xf32>
    %1154 = arith.mulf %1152, %1153 : vector<24x128xf32>
    %1155 = arith.addf %1143, %1154 : vector<24x128xf32>
    %1156 = vector.extract_strided_slice %1 {offsets = [0, 6], sizes = [24, 1], strides = [1, 1]} : vector<24x8xf32> to vector<24x1xf32>
    %1157 = vector.extract_strided_slice %1022 {offsets = [6, 0], sizes = [1, 128], strides = [1, 1]} : vector<8x128xf32> to vector<1x128xf32>
    %1158 = vector.broadcast %1156 : vector<24x1xf32> to vector<24x128xf32>
    %1159 = vector.broadcast %1157 : vector<1x128xf32> to vector<24x128xf32>
    %1160 = arith.mulf %1158, %1159 : vector<24x128xf32>
    %1161 = arith.addf %1149, %1160 : vector<24x128xf32>
    %1162 = vector.extract_strided_slice %0 {offsets = [0, 7], sizes = [24, 1], strides = [1, 1]} : vector<24x8xf32> to vector<24x1xf32>
    %1163 = vector.extract_strided_slice %1077 {offsets = [7, 0], sizes = [1, 128], strides = [1, 1]} : vector<8x128xf32> to vector<1x128xf32>
    %1164 = vector.broadcast %1162 : vector<24x1xf32> to vector<24x128xf32>
    %1165 = vector.broadcast %1163 : vector<1x128xf32> to vector<24x128xf32>
    %1166 = arith.mulf %1164, %1165 : vector<24x128xf32>
    %1167 = arith.addf %1155, %1166 : vector<24x128xf32>
    %1168 = vector.extract_strided_slice %1 {offsets = [0, 7], sizes = [24, 1], strides = [1, 1]} : vector<24x8xf32> to vector<24x1xf32>
    %1169 = vector.extract_strided_slice %1022 {offsets = [7, 0], sizes = [1, 128], strides = [1, 1]} : vector<8x128xf32> to vector<1x128xf32>
    %1170 = vector.broadcast %1168 : vector<24x1xf32> to vector<24x128xf32>
    %1171 = vector.broadcast %1169 : vector<1x128xf32> to vector<24x128xf32>
    %1172 = arith.mulf %1170, %1171 : vector<24x128xf32>
    %1173 = arith.addf %1161, %1172 : vector<24x128xf32>
    %1174 = vector.extract_strided_slice %1167 {offsets = [0, 0], sizes = [8, 128], strides = [1, 1]} : vector<24x128xf32> to vector<8x128xf32>
    %1175 = vector.extract_strided_slice %1173 {offsets = [0, 0], sizes = [8, 128], strides = [1, 1]} : vector<24x128xf32> to vector<8x128xf32>
    %1176 = arith.addf %1174, %1175 : vector<8x128xf32>
    %1177 = arith.negf %1176 : vector<8x128xf32>
    %1178 = math.exp %1177 : vector<8x128xf32>
    %cst_55 = arith.constant 1.000000e+00 : f32
    %1179 = vector.broadcast %cst_55 : f32 to vector<8x128xf32>
    %1180 = arith.addf %1179, %1178 : vector<8x128xf32>
    %1181 = arith.divf %1179, %1180 : vector<8x128xf32>
    %1182 = vector.extract_strided_slice %1167 {offsets = [8, 0], sizes = [8, 128], strides = [1, 1]} : vector<24x128xf32> to vector<8x128xf32>
    %1183 = vector.extract_strided_slice %1173 {offsets = [8, 0], sizes = [8, 128], strides = [1, 1]} : vector<24x128xf32> to vector<8x128xf32>
    %1184 = arith.addf %1182, %1183 : vector<8x128xf32>
    %1185 = arith.negf %1184 : vector<8x128xf32>
    %1186 = math.exp %1185 : vector<8x128xf32>
    %cst_56 = arith.constant 1.000000e+00 : f32
    %1187 = vector.broadcast %cst_56 : f32 to vector<8x128xf32>
    %1188 = arith.addf %1187, %1186 : vector<8x128xf32>
    %1189 = arith.divf %1187, %1188 : vector<8x128xf32>
    %1190 = vector.extract_strided_slice %1167 {offsets = [16, 0], sizes = [8, 128], strides = [1, 1]} : vector<24x128xf32> to vector<8x128xf32>
    %1191 = vector.extract_strided_slice %1173 {offsets = [16, 0], sizes = [8, 128], strides = [1, 1]} : vector<24x128xf32> to vector<8x128xf32>
    %1192 = arith.mulf %1181, %1191 : vector<8x128xf32>
    %1193 = arith.addf %1190, %1192 : vector<8x128xf32>
    %1194 = math.tanh %1193 : vector<8x128xf32>
    %cst_57 = arith.constant 1.000000e+00 : f32
    %1195 = vector.broadcast %cst_57 : f32 to vector<8x128xf32>
    %1196 = arith.subf %1195, %1189 : vector<8x128xf32>
    %1197 = arith.mulf %1196, %1194 : vector<8x128xf32>
    %1198 = arith.mulf %1189, %1022 : vector<8x128xf32>
    %1199 = arith.addf %1197, %1198 : vector<8x128xf32>
    %1200 = vector.extract_strided_slice %2 {offsets = [0, 0], sizes = [8, 1], strides = [1, 1]} : vector<8x8xf32> to vector<8x1xf32>
    %1201 = vector.extract_strided_slice %1199 {offsets = [0, 0], sizes = [1, 128], strides = [1, 1]} : vector<8x128xf32> to vector<1x128xf32>
    %1202 = vector.broadcast %1200 : vector<8x1xf32> to vector<8x128xf32>
    %1203 = vector.broadcast %1201 : vector<1x128xf32> to vector<8x128xf32>
    %1204 = arith.mulf %1202, %1203 : vector<8x128xf32>
    %1205 = arith.addf %11, %1204 : vector<8x128xf32>
    %1206 = vector.extract_strided_slice %2 {offsets = [0, 1], sizes = [8, 1], strides = [1, 1]} : vector<8x8xf32> to vector<8x1xf32>
    %1207 = vector.extract_strided_slice %1199 {offsets = [1, 0], sizes = [1, 128], strides = [1, 1]} : vector<8x128xf32> to vector<1x128xf32>
    %1208 = vector.broadcast %1206 : vector<8x1xf32> to vector<8x128xf32>
    %1209 = vector.broadcast %1207 : vector<1x128xf32> to vector<8x128xf32>
    %1210 = arith.mulf %1208, %1209 : vector<8x128xf32>
    %1211 = arith.addf %1205, %1210 : vector<8x128xf32>
    %1212 = vector.extract_strided_slice %2 {offsets = [0, 2], sizes = [8, 1], strides = [1, 1]} : vector<8x8xf32> to vector<8x1xf32>
    %1213 = vector.extract_strided_slice %1199 {offsets = [2, 0], sizes = [1, 128], strides = [1, 1]} : vector<8x128xf32> to vector<1x128xf32>
    %1214 = vector.broadcast %1212 : vector<8x1xf32> to vector<8x128xf32>
    %1215 = vector.broadcast %1213 : vector<1x128xf32> to vector<8x128xf32>
    %1216 = arith.mulf %1214, %1215 : vector<8x128xf32>
    %1217 = arith.addf %1211, %1216 : vector<8x128xf32>
    %1218 = vector.extract_strided_slice %2 {offsets = [0, 3], sizes = [8, 1], strides = [1, 1]} : vector<8x8xf32> to vector<8x1xf32>
    %1219 = vector.extract_strided_slice %1199 {offsets = [3, 0], sizes = [1, 128], strides = [1, 1]} : vector<8x128xf32> to vector<1x128xf32>
    %1220 = vector.broadcast %1218 : vector<8x1xf32> to vector<8x128xf32>
    %1221 = vector.broadcast %1219 : vector<1x128xf32> to vector<8x128xf32>
    %1222 = arith.mulf %1220, %1221 : vector<8x128xf32>
    %1223 = arith.addf %1217, %1222 : vector<8x128xf32>
    %1224 = vector.extract_strided_slice %2 {offsets = [0, 4], sizes = [8, 1], strides = [1, 1]} : vector<8x8xf32> to vector<8x1xf32>
    %1225 = vector.extract_strided_slice %1199 {offsets = [4, 0], sizes = [1, 128], strides = [1, 1]} : vector<8x128xf32> to vector<1x128xf32>
    %1226 = vector.broadcast %1224 : vector<8x1xf32> to vector<8x128xf32>
    %1227 = vector.broadcast %1225 : vector<1x128xf32> to vector<8x128xf32>
    %1228 = arith.mulf %1226, %1227 : vector<8x128xf32>
    %1229 = arith.addf %1223, %1228 : vector<8x128xf32>
    %1230 = vector.extract_strided_slice %2 {offsets = [0, 5], sizes = [8, 1], strides = [1, 1]} : vector<8x8xf32> to vector<8x1xf32>
    %1231 = vector.extract_strided_slice %1199 {offsets = [5, 0], sizes = [1, 128], strides = [1, 1]} : vector<8x128xf32> to vector<1x128xf32>
    %1232 = vector.broadcast %1230 : vector<8x1xf32> to vector<8x128xf32>
    %1233 = vector.broadcast %1231 : vector<1x128xf32> to vector<8x128xf32>
    %1234 = arith.mulf %1232, %1233 : vector<8x128xf32>
    %1235 = arith.addf %1229, %1234 : vector<8x128xf32>
    %1236 = vector.extract_strided_slice %2 {offsets = [0, 6], sizes = [8, 1], strides = [1, 1]} : vector<8x8xf32> to vector<8x1xf32>
    %1237 = vector.extract_strided_slice %1199 {offsets = [6, 0], sizes = [1, 128], strides = [1, 1]} : vector<8x128xf32> to vector<1x128xf32>
    %1238 = vector.broadcast %1236 : vector<8x1xf32> to vector<8x128xf32>
    %1239 = vector.broadcast %1237 : vector<1x128xf32> to vector<8x128xf32>
    %1240 = arith.mulf %1238, %1239 : vector<8x128xf32>
    %1241 = arith.addf %1235, %1240 : vector<8x128xf32>
    %1242 = vector.extract_strided_slice %2 {offsets = [0, 7], sizes = [8, 1], strides = [1, 1]} : vector<8x8xf32> to vector<8x1xf32>
    %1243 = vector.extract_strided_slice %1199 {offsets = [7, 0], sizes = [1, 128], strides = [1, 1]} : vector<8x128xf32> to vector<1x128xf32>
    %1244 = vector.broadcast %1242 : vector<8x1xf32> to vector<8x128xf32>
    %1245 = vector.broadcast %1243 : vector<1x128xf32> to vector<8x128xf32>
    %1246 = arith.mulf %1244, %1245 : vector<8x128xf32>
    %1247 = arith.addf %1241, %1246 : vector<8x128xf32>
    %1248 = arith.index_cast %c6_i32 : i32 to index
    %c0_58 = arith.constant 0 : index
    %c0_59 = arith.constant 0 : index
    %1249 = vector.load %arg8[%1248, %c0_58, %c0_59] : memref<8x8x128xf32, #tpu.memory_space<vmem>>, vector<1x8x128xf32>
    %1250 = vector.shape_cast %1249 : vector<1x8x128xf32> to vector<8x128xf32>
    %1251 = vector.shape_cast %1247 : vector<8x128xf32> to vector<1x8x128xf32>
    tpu.vector_store %arg8[%1248, %c0_58, %c0_59], %1251 {strides = array<i32>} : memref<8x8x128xf32, #tpu.memory_space<vmem>>, vector<1x8x128xf32>,
    %c7_i32 = arith.constant 7 : i32
    %1252 = arith.index_cast %c7_i32 : i32 to index
    %c0_60 = arith.constant 0 : index
    %c0_61 = arith.constant 0 : index
    %1253 = vector.load %arg1[%1252, %c0_60, %c0_61] : memref<8x8x128xf32, #tpu.memory_space<vmem>>, vector<1x8x128xf32>
    %1254 = vector.shape_cast %1253 : vector<1x8x128xf32> to vector<8x128xf32>
    %1255 = vector.extract_strided_slice %0 {offsets = [0, 0], sizes = [24, 1], strides = [1, 1]} : vector<24x8xf32> to vector<24x1xf32>
    %1256 = vector.extract_strided_slice %1254 {offsets = [0, 0], sizes = [1, 128], strides = [1, 1]} : vector<8x128xf32> to vector<1x128xf32>
    %1257 = vector.broadcast %1255 : vector<24x1xf32> to vector<24x128xf32>
    %1258 = vector.broadcast %1256 : vector<1x128xf32> to vector<24x128xf32>
    %1259 = arith.mulf %1257, %1258 : vector<24x128xf32>
    %1260 = arith.addf %5, %1259 : vector<24x128xf32>
    %1261 = vector.extract_strided_slice %1 {offsets = [0, 0], sizes = [24, 1], strides = [1, 1]} : vector<24x8xf32> to vector<24x1xf32>
    %1262 = vector.extract_strided_slice %1199 {offsets = [0, 0], sizes = [1, 128], strides = [1, 1]} : vector<8x128xf32> to vector<1x128xf32>
    %1263 = vector.broadcast %1261 : vector<24x1xf32> to vector<24x128xf32>
    %1264 = vector.broadcast %1262 : vector<1x128xf32> to vector<24x128xf32>
    %1265 = arith.mulf %1263, %1264 : vector<24x128xf32>
    %1266 = arith.addf %8, %1265 : vector<24x128xf32>
    %1267 = vector.extract_strided_slice %0 {offsets = [0, 1], sizes = [24, 1], strides = [1, 1]} : vector<24x8xf32> to vector<24x1xf32>
    %1268 = vector.extract_strided_slice %1254 {offsets = [1, 0], sizes = [1, 128], strides = [1, 1]} : vector<8x128xf32> to vector<1x128xf32>
    %1269 = vector.broadcast %1267 : vector<24x1xf32> to vector<24x128xf32>
    %1270 = vector.broadcast %1268 : vector<1x128xf32> to vector<24x128xf32>
    %1271 = arith.mulf %1269, %1270 : vector<24x128xf32>
    %1272 = arith.addf %1260, %1271 : vector<24x128xf32>
    %1273 = vector.extract_strided_slice %1 {offsets = [0, 1], sizes = [24, 1], strides = [1, 1]} : vector<24x8xf32> to vector<24x1xf32>
    %1274 = vector.extract_strided_slice %1199 {offsets = [1, 0], sizes = [1, 128], strides = [1, 1]} : vector<8x128xf32> to vector<1x128xf32>
    %1275 = vector.broadcast %1273 : vector<24x1xf32> to vector<24x128xf32>
    %1276 = vector.broadcast %1274 : vector<1x128xf32> to vector<24x128xf32>
    %1277 = arith.mulf %1275, %1276 : vector<24x128xf32>
    %1278 = arith.addf %1266, %1277 : vector<24x128xf32>
    %1279 = vector.extract_strided_slice %0 {offsets = [0, 2], sizes = [24, 1], strides = [1, 1]} : vector<24x8xf32> to vector<24x1xf32>
    %1280 = vector.extract_strided_slice %1254 {offsets = [2, 0], sizes = [1, 128], strides = [1, 1]} : vector<8x128xf32> to vector<1x128xf32>
    %1281 = vector.broadcast %1279 : vector<24x1xf32> to vector<24x128xf32>
    %1282 = vector.broadcast %1280 : vector<1x128xf32> to vector<24x128xf32>
    %1283 = arith.mulf %1281, %1282 : vector<24x128xf32>
    %1284 = arith.addf %1272, %1283 : vector<24x128xf32>
    %1285 = vector.extract_strided_slice %1 {offsets = [0, 2], sizes = [24, 1], strides = [1, 1]} : vector<24x8xf32> to vector<24x1xf32>
    %1286 = vector.extract_strided_slice %1199 {offsets = [2, 0], sizes = [1, 128], strides = [1, 1]} : vector<8x128xf32> to vector<1x128xf32>
    %1287 = vector.broadcast %1285 : vector<24x1xf32> to vector<24x128xf32>
    %1288 = vector.broadcast %1286 : vector<1x128xf32> to vector<24x128xf32>
    %1289 = arith.mulf %1287, %1288 : vector<24x128xf32>
    %1290 = arith.addf %1278, %1289 : vector<24x128xf32>
    %1291 = vector.extract_strided_slice %0 {offsets = [0, 3], sizes = [24, 1], strides = [1, 1]} : vector<24x8xf32> to vector<24x1xf32>
    %1292 = vector.extract_strided_slice %1254 {offsets = [3, 0], sizes = [1, 128], strides = [1, 1]} : vector<8x128xf32> to vector<1x128xf32>
    %1293 = vector.broadcast %1291 : vector<24x1xf32> to vector<24x128xf32>
    %1294 = vector.broadcast %1292 : vector<1x128xf32> to vector<24x128xf32>
    %1295 = arith.mulf %1293, %1294 : vector<24x128xf32>
    %1296 = arith.addf %1284, %1295 : vector<24x128xf32>
    %1297 = vector.extract_strided_slice %1 {offsets = [0, 3], sizes = [24, 1], strides = [1, 1]} : vector<24x8xf32> to vector<24x1xf32>
    %1298 = vector.extract_strided_slice %1199 {offsets = [3, 0], sizes = [1, 128], strides = [1, 1]} : vector<8x128xf32> to vector<1x128xf32>
    %1299 = vector.broadcast %1297 : vector<24x1xf32> to vector<24x128xf32>
    %1300 = vector.broadcast %1298 : vector<1x128xf32> to vector<24x128xf32>
    %1301 = arith.mulf %1299, %1300 : vector<24x128xf32>
    %1302 = arith.addf %1290, %1301 : vector<24x128xf32>
    %1303 = vector.extract_strided_slice %0 {offsets = [0, 4], sizes = [24, 1], strides = [1, 1]} : vector<24x8xf32> to vector<24x1xf32>
    %1304 = vector.extract_strided_slice %1254 {offsets = [4, 0], sizes = [1, 128], strides = [1, 1]} : vector<8x128xf32> to vector<1x128xf32>
    %1305 = vector.broadcast %1303 : vector<24x1xf32> to vector<24x128xf32>
    %1306 = vector.broadcast %1304 : vector<1x128xf32> to vector<24x128xf32>
    %1307 = arith.mulf %1305, %1306 : vector<24x128xf32>
    %1308 = arith.addf %1296, %1307 : vector<24x128xf32>
    %1309 = vector.extract_strided_slice %1 {offsets = [0, 4], sizes = [24, 1], strides = [1, 1]} : vector<24x8xf32> to vector<24x1xf32>
    %1310 = vector.extract_strided_slice %1199 {offsets = [4, 0], sizes = [1, 128], strides = [1, 1]} : vector<8x128xf32> to vector<1x128xf32>
    %1311 = vector.broadcast %1309 : vector<24x1xf32> to vector<24x128xf32>
    %1312 = vector.broadcast %1310 : vector<1x128xf32> to vector<24x128xf32>
    %1313 = arith.mulf %1311, %1312 : vector<24x128xf32>
    %1314 = arith.addf %1302, %1313 : vector<24x128xf32>
    %1315 = vector.extract_strided_slice %0 {offsets = [0, 5], sizes = [24, 1], strides = [1, 1]} : vector<24x8xf32> to vector<24x1xf32>
    %1316 = vector.extract_strided_slice %1254 {offsets = [5, 0], sizes = [1, 128], strides = [1, 1]} : vector<8x128xf32> to vector<1x128xf32>
    %1317 = vector.broadcast %1315 : vector<24x1xf32> to vector<24x128xf32>
    %1318 = vector.broadcast %1316 : vector<1x128xf32> to vector<24x128xf32>
    %1319 = arith.mulf %1317, %1318 : vector<24x128xf32>
    %1320 = arith.addf %1308, %1319 : vector<24x128xf32>
    %1321 = vector.extract_strided_slice %1 {offsets = [0, 5], sizes = [24, 1], strides = [1, 1]} : vector<24x8xf32> to vector<24x1xf32>
    %1322 = vector.extract_strided_slice %1199 {offsets = [5, 0], sizes = [1, 128], strides = [1, 1]} : vector<8x128xf32> to vector<1x128xf32>
    %1323 = vector.broadcast %1321 : vector<24x1xf32> to vector<24x128xf32>
    %1324 = vector.broadcast %1322 : vector<1x128xf32> to vector<24x128xf32>
    %1325 = arith.mulf %1323, %1324 : vector<24x128xf32>
    %1326 = arith.addf %1314, %1325 : vector<24x128xf32>
    %1327 = vector.extract_strided_slice %0 {offsets = [0, 6], sizes = [24, 1], strides = [1, 1]} : vector<24x8xf32> to vector<24x1xf32>
    %1328 = vector.extract_strided_slice %1254 {offsets = [6, 0], sizes = [1, 128], strides = [1, 1]} : vector<8x128xf32> to vector<1x128xf32>
    %1329 = vector.broadcast %1327 : vector<24x1xf32> to vector<24x128xf32>
    %1330 = vector.broadcast %1328 : vector<1x128xf32> to vector<24x128xf32>
    %1331 = arith.mulf %1329, %1330 : vector<24x128xf32>
    %1332 = arith.addf %1320, %1331 : vector<24x128xf32>
    %1333 = vector.extract_strided_slice %1 {offsets = [0, 6], sizes = [24, 1], strides = [1, 1]} : vector<24x8xf32> to vector<24x1xf32>
    %1334 = vector.extract_strided_slice %1199 {offsets = [6, 0], sizes = [1, 128], strides = [1, 1]} : vector<8x128xf32> to vector<1x128xf32>
    %1335 = vector.broadcast %1333 : vector<24x1xf32> to vector<24x128xf32>
    %1336 = vector.broadcast %1334 : vector<1x128xf32> to vector<24x128xf32>
    %1337 = arith.mulf %1335, %1336 : vector<24x128xf32>
    %1338 = arith.addf %1326, %1337 : vector<24x128xf32>
    %1339 = vector.extract_strided_slice %0 {offsets = [0, 7], sizes = [24, 1], strides = [1, 1]} : vector<24x8xf32> to vector<24x1xf32>
    %1340 = vector.extract_strided_slice %1254 {offsets = [7, 0], sizes = [1, 128], strides = [1, 1]} : vector<8x128xf32> to vector<1x128xf32>
    %1341 = vector.broadcast %1339 : vector<24x1xf32> to vector<24x128xf32>
    %1342 = vector.broadcast %1340 : vector<1x128xf32> to vector<24x128xf32>
    %1343 = arith.mulf %1341, %1342 : vector<24x128xf32>
    %1344 = arith.addf %1332, %1343 : vector<24x128xf32>
    %1345 = vector.extract_strided_slice %1 {offsets = [0, 7], sizes = [24, 1], strides = [1, 1]} : vector<24x8xf32> to vector<24x1xf32>
    %1346 = vector.extract_strided_slice %1199 {offsets = [7, 0], sizes = [1, 128], strides = [1, 1]} : vector<8x128xf32> to vector<1x128xf32>
    %1347 = vector.broadcast %1345 : vector<24x1xf32> to vector<24x128xf32>
    %1348 = vector.broadcast %1346 : vector<1x128xf32> to vector<24x128xf32>
    %1349 = arith.mulf %1347, %1348 : vector<24x128xf32>
    %1350 = arith.addf %1338, %1349 : vector<24x128xf32>
    %1351 = vector.extract_strided_slice %1344 {offsets = [0, 0], sizes = [8, 128], strides = [1, 1]} : vector<24x128xf32> to vector<8x128xf32>
    %1352 = vector.extract_strided_slice %1350 {offsets = [0, 0], sizes = [8, 128], strides = [1, 1]} : vector<24x128xf32> to vector<8x128xf32>
    %1353 = arith.addf %1351, %1352 : vector<8x128xf32>
    %1354 = arith.negf %1353 : vector<8x128xf32>
    %1355 = math.exp %1354 : vector<8x128xf32>
    %cst_62 = arith.constant 1.000000e+00 : f32
    %1356 = vector.broadcast %cst_62 : f32 to vector<8x128xf32>
    %1357 = arith.addf %1356, %1355 : vector<8x128xf32>
    %1358 = arith.divf %1356, %1357 : vector<8x128xf32>
    %1359 = vector.extract_strided_slice %1344 {offsets = [8, 0], sizes = [8, 128], strides = [1, 1]} : vector<24x128xf32> to vector<8x128xf32>
    %1360 = vector.extract_strided_slice %1350 {offsets = [8, 0], sizes = [8, 128], strides = [1, 1]} : vector<24x128xf32> to vector<8x128xf32>
    %1361 = arith.addf %1359, %1360 : vector<8x128xf32>
    %1362 = arith.negf %1361 : vector<8x128xf32>
    %1363 = math.exp %1362 : vector<8x128xf32>
    %cst_63 = arith.constant 1.000000e+00 : f32
    %1364 = vector.broadcast %cst_63 : f32 to vector<8x128xf32>
    %1365 = arith.addf %1364, %1363 : vector<8x128xf32>
    %1366 = arith.divf %1364, %1365 : vector<8x128xf32>
    %1367 = vector.extract_strided_slice %1344 {offsets = [16, 0], sizes = [8, 128], strides = [1, 1]} : vector<24x128xf32> to vector<8x128xf32>
    %1368 = vector.extract_strided_slice %1350 {offsets = [16, 0], sizes = [8, 128], strides = [1, 1]} : vector<24x128xf32> to vector<8x128xf32>
    %1369 = arith.mulf %1358, %1368 : vector<8x128xf32>
    %1370 = arith.addf %1367, %1369 : vector<8x128xf32>
    %1371 = math.tanh %1370 : vector<8x128xf32>
    %cst_64 = arith.constant 1.000000e+00 : f32
    %1372 = vector.broadcast %cst_64 : f32 to vector<8x128xf32>
    %1373 = arith.subf %1372, %1366 : vector<8x128xf32>
    %1374 = arith.mulf %1373, %1371 : vector<8x128xf32>
    %1375 = arith.mulf %1366, %1199 : vector<8x128xf32>
    %1376 = arith.addf %1374, %1375 : vector<8x128xf32>
    %1377 = vector.extract_strided_slice %2 {offsets = [0, 0], sizes = [8, 1], strides = [1, 1]} : vector<8x8xf32> to vector<8x1xf32>
    %1378 = vector.extract_strided_slice %1376 {offsets = [0, 0], sizes = [1, 128], strides = [1, 1]} : vector<8x128xf32> to vector<1x128xf32>
    %1379 = vector.broadcast %1377 : vector<8x1xf32> to vector<8x128xf32>
    %1380 = vector.broadcast %1378 : vector<1x128xf32> to vector<8x128xf32>
    %1381 = arith.mulf %1379, %1380 : vector<8x128xf32>
    %1382 = arith.addf %11, %1381 : vector<8x128xf32>
    %1383 = vector.extract_strided_slice %2 {offsets = [0, 1], sizes = [8, 1], strides = [1, 1]} : vector<8x8xf32> to vector<8x1xf32>
    %1384 = vector.extract_strided_slice %1376 {offsets = [1, 0], sizes = [1, 128], strides = [1, 1]} : vector<8x128xf32> to vector<1x128xf32>
    %1385 = vector.broadcast %1383 : vector<8x1xf32> to vector<8x128xf32>
    %1386 = vector.broadcast %1384 : vector<1x128xf32> to vector<8x128xf32>
    %1387 = arith.mulf %1385, %1386 : vector<8x128xf32>
    %1388 = arith.addf %1382, %1387 : vector<8x128xf32>
    %1389 = vector.extract_strided_slice %2 {offsets = [0, 2], sizes = [8, 1], strides = [1, 1]} : vector<8x8xf32> to vector<8x1xf32>
    %1390 = vector.extract_strided_slice %1376 {offsets = [2, 0], sizes = [1, 128], strides = [1, 1]} : vector<8x128xf32> to vector<1x128xf32>
    %1391 = vector.broadcast %1389 : vector<8x1xf32> to vector<8x128xf32>
    %1392 = vector.broadcast %1390 : vector<1x128xf32> to vector<8x128xf32>
    %1393 = arith.mulf %1391, %1392 : vector<8x128xf32>
    %1394 = arith.addf %1388, %1393 : vector<8x128xf32>
    %1395 = vector.extract_strided_slice %2 {offsets = [0, 3], sizes = [8, 1], strides = [1, 1]} : vector<8x8xf32> to vector<8x1xf32>
    %1396 = vector.extract_strided_slice %1376 {offsets = [3, 0], sizes = [1, 128], strides = [1, 1]} : vector<8x128xf32> to vector<1x128xf32>
    %1397 = vector.broadcast %1395 : vector<8x1xf32> to vector<8x128xf32>
    %1398 = vector.broadcast %1396 : vector<1x128xf32> to vector<8x128xf32>
    %1399 = arith.mulf %1397, %1398 : vector<8x128xf32>
    %1400 = arith.addf %1394, %1399 : vector<8x128xf32>
    %1401 = vector.extract_strided_slice %2 {offsets = [0, 4], sizes = [8, 1], strides = [1, 1]} : vector<8x8xf32> to vector<8x1xf32>
    %1402 = vector.extract_strided_slice %1376 {offsets = [4, 0], sizes = [1, 128], strides = [1, 1]} : vector<8x128xf32> to vector<1x128xf32>
    %1403 = vector.broadcast %1401 : vector<8x1xf32> to vector<8x128xf32>
    %1404 = vector.broadcast %1402 : vector<1x128xf32> to vector<8x128xf32>
    %1405 = arith.mulf %1403, %1404 : vector<8x128xf32>
    %1406 = arith.addf %1400, %1405 : vector<8x128xf32>
    %1407 = vector.extract_strided_slice %2 {offsets = [0, 5], sizes = [8, 1], strides = [1, 1]} : vector<8x8xf32> to vector<8x1xf32>
    %1408 = vector.extract_strided_slice %1376 {offsets = [5, 0], sizes = [1, 128], strides = [1, 1]} : vector<8x128xf32> to vector<1x128xf32>
    %1409 = vector.broadcast %1407 : vector<8x1xf32> to vector<8x128xf32>
    %1410 = vector.broadcast %1408 : vector<1x128xf32> to vector<8x128xf32>
    %1411 = arith.mulf %1409, %1410 : vector<8x128xf32>
    %1412 = arith.addf %1406, %1411 : vector<8x128xf32>
    %1413 = vector.extract_strided_slice %2 {offsets = [0, 6], sizes = [8, 1], strides = [1, 1]} : vector<8x8xf32> to vector<8x1xf32>
    %1414 = vector.extract_strided_slice %1376 {offsets = [6, 0], sizes = [1, 128], strides = [1, 1]} : vector<8x128xf32> to vector<1x128xf32>
    %1415 = vector.broadcast %1413 : vector<8x1xf32> to vector<8x128xf32>
    %1416 = vector.broadcast %1414 : vector<1x128xf32> to vector<8x128xf32>
    %1417 = arith.mulf %1415, %1416 : vector<8x128xf32>
    %1418 = arith.addf %1412, %1417 : vector<8x128xf32>
    %1419 = vector.extract_strided_slice %2 {offsets = [0, 7], sizes = [8, 1], strides = [1, 1]} : vector<8x8xf32> to vector<8x1xf32>
    %1420 = vector.extract_strided_slice %1376 {offsets = [7, 0], sizes = [1, 128], strides = [1, 1]} : vector<8x128xf32> to vector<1x128xf32>
    %1421 = vector.broadcast %1419 : vector<8x1xf32> to vector<8x128xf32>
    %1422 = vector.broadcast %1420 : vector<1x128xf32> to vector<8x128xf32>
    %1423 = arith.mulf %1421, %1422 : vector<8x128xf32>
    %1424 = arith.addf %1418, %1423 : vector<8x128xf32>
    %1425 = arith.index_cast %c7_i32 : i32 to index
    %c0_65 = arith.constant 0 : index
    %c0_66 = arith.constant 0 : index
    %1426 = vector.load %arg8[%1425, %c0_65, %c0_66] : memref<8x8x128xf32, #tpu.memory_space<vmem>>, vector<1x8x128xf32>
    %1427 = vector.shape_cast %1426 : vector<1x8x128xf32> to vector<8x128xf32>
    %1428 = vector.shape_cast %1424 : vector<8x128xf32> to vector<1x8x128xf32>
    tpu.vector_store %arg8[%1425, %c0_65, %c0_66], %1428 {strides = array<i32>} : memref<8x8x128xf32, #tpu.memory_space<vmem>>, vector<1x8x128xf32>,
    %c8_i32 = arith.constant 8 : i32
    return
  }
  func.func @transform_0(%arg0: i32) -> (i32, i32, i32) {
    %c0_i32 = arith.constant 0 : i32
    %c0_i32_0 = arith.constant 0 : i32
    %c0_i32_1 = arith.constant 0 : i32
    return %c0_i32, %c0_i32_0, %arg0 : i32, i32, i32
  }
  func.func @transform_1(%arg0: i32) -> (i32, i32) {
    %c0_i32 = arith.constant 0 : i32
    %c0_i32_0 = arith.constant 0 : i32
    %c0_i32_1 = arith.constant 0 : i32
    return %c0_i32, %c0_i32_0 : i32, i32
  }
  func.func @transform_2(%arg0: i32) -> (i32, i32) {
    %c0_i32 = arith.constant 0 : i32
    %c0_i32_0 = arith.constant 0 : i32
    %c0_i32_1 = arith.constant 0 : i32
    return %c0_i32, %c0_i32_0 : i32, i32
  }
  func.func @transform_3(%arg0: i32) -> (i32, i32) {
    %c0_i32 = arith.constant 0 : i32
    %c0_i32_0 = arith.constant 0 : i32
    %c0_i32_1 = arith.constant 0 : i32
    return %c0_i32, %c0_i32_0 : i32, i32
  }
  func.func @transform_4(%arg0: i32) -> (i32, i32) {
    %c0_i32 = arith.constant 0 : i32
    %c0_i32_0 = arith.constant 0 : i32
    %c0_i32_1 = arith.constant 0 : i32
    return %c0_i32, %c0_i32_0 : i32, i32
  }
  func.func @transform_5(%arg0: i32) -> (i32, i32) {
    %c0_i32 = arith.constant 0 : i32
    %c0_i32_0 = arith.constant 0 : i32
    %c0_i32_1 = arith.constant 0 : i32
    return %c0_i32, %c0_i32_0 : i32, i32
  }
  func.func @transform_6(%arg0: i32) -> (i32, i32) {
    %c0_i32 = arith.constant 0 : i32
    %c0_i32_0 = arith.constant 0 : i32
    %c0_i32_1 = arith.constant 0 : i32
    return %c0_i32, %c0_i32_0 : i32, i32
  }
  func.func @transform_7(%arg0: i32) -> (i32, i32, i32) {
    %c0_i32 = arith.constant 0 : i32
    %c0_i32_0 = arith.constant 0 : i32
    %c0_i32_1 = arith.constant 0 : i32
    return %c0_i32, %c0_i32_0, %arg0 : i32, i32, i32
  }
}

</mosaic_0001>

<bundles_post_ra>
// kernel: tpu_custom_call.1
= control target key start
LH: loop header
LB: loop body
LE: loop exit
PB: predicated region body
PF: predicated region fallthrough
CT: control target
= control target key end

     0   :  { %v2112_v2 = vmov 2   ;;  %v3779_v3 = vmov 0   ;;  %s3768_s0 = inlined_call_operand.vmem [shape: f32[8,8,128], index: 0, kind: input, shape index: {}]   ;;  %s3769_s1 = inlined_call_operand.vmem [shape: f32[24,8], index: 1, kind: input, shape index: {}]   ;;  %s3770_s2 = inlined_call_operand.vmem [shape: f32[24,8], index: 2, kind: input, shape index: {}]   ;;  %s3771_s3 = inlined_call_operand.vmem [shape: f32[24,1], index: 3, kind: input, shape index: {}]   ;;  %s3772_s4 = inlined_call_operand.vmem [shape: f32[24,1], index: 4, kind: input, shape index: {}]   ;;  %s3773_s5 = inlined_call_operand.vmem [shape: f32[8,8], index: 5, kind: input, shape index: {}]   ;;  %s3774_s6 = inlined_call_operand.vmem [shape: f32[8,1], index: 6, kind: input, shape index: {}]   ;;  %s3775_s7 = inlined_call_operand.hbm [shape: f32[8,8,128], index: 7, kind: output, shape index: {}]  }
   0x1   :  { %v34_v0 = vld [vmem:[%s3771_s3] sm:$0xff]  ;;  %1966 = vset.pattern.permute.xlu0 %v2112_v2  ;;  %1963 = vset.pattern.permute.xlu1 %v3779_v3 }
   0x2   :  { %v30_v1 = vld [vmem:[%s3770_s2] sm:$0xff]  ;;  %39 = vperm.xlu1 %1963, %v34_v0  }
   0x3   :  { %186 = vperm.xlu0 %1966, %v30_v1   ;;  %v52_v4 = vld [vmem:[%s3772_s4] sm:$0xff] }
   0x4   :  { %v27_v5 = vld [vmem:[%s3769_s1] sm:$0xff] }
   0x5   :  { %12 = vsyncpa [#allocation3], 0  ;;  %v3778_v6 = vmov 1   ;;  %v2181_v7 = vld [vmem:[%s3769_s1 + $0x8] sm:$0xff]  ;;  %v3776_v8 = vmov 4   ;;  %v3777_v9 = vmov 3   ;;  %v92_v24 = vlaneseq }
   0x6   :  { %57 = vperm.xlu1 %1963, %v52_v4   ;;  %v2117_v10 = vmov 5   ;;  %v2193_v11 = vld [vmem:[%s3770_s2 + $0x8] sm:$0xff]  ;;  %v3780_v12 = vmov 7   ;;  %v3786_v13 = vmov 6   ;;  %v54_v14 = vld [vmem:[%s3772_s4 + $0x10] sm:$0xff]  ;;  %v2250_v20 = vld [vmem:[%s3773_s5] sm:$0xff] }
   0x7   :  { %1967 = vset.pattern.permute.xlu0 %v3778_v6  ;;  %v35_v15 = vld [vmem:[%s3771_s3 + $0x8] sm:$0xff]  ;;  %v36_v16 = vld [vmem:[%s3771_s3 + $0x10] sm:$0xff]  ;;  %v2284_v26 = vshrl.u32 %v92_v24, 7  ;;  %v2301_v31 = vld [vmem:[%s3768_s0] sm:$0xff] }
   0x8   :  { %124 = vperm.xlu0 %1967, %v27_v5   ;;  %v53_v17 = vld [vmem:[%s3772_s4 + $0x8] sm:$0xff]  ;;  %v2225_v18 = vld [vmem:[%s3770_s2 + $0x10] sm:$0xff]  ;;  %3965 = vst [vmem:[#allocation12_spill] sm:$0xff] %v2301_v31  ;;  %v2324_v36 = vld [vmem:[%s3768_s0 + $0x18] sm:$0xff] }
   0x9   :  { %v2233_v19 = vld [vmem:[%s3769_s1 + $0x10] sm:$0xff]  ;;  %v2292_v29 = vsub.s32 1, %v2284_v26  ;;  %v2296_v30 = vsub.s32 2, %v2284_v26  ;;  %v2306_v32 = vld [vmem:[%s3768_s0 + $0x8] sm:$0xff]  ;;  %v2329_v37 = vld [vmem:[%s3768_s0 + $0x20] sm:$0xff]  ;;  %v2364_v46 = vsub.s32 4, %v2284_v26 }
   0xa   :  { %1964 = vset.pattern.permute.xlu1 %v3778_v6  ;;  %v2319_v35 = vld [vmem:[%s3768_s0 + $0x10] sm:$0xff]  ;;  %v2351_v43 = vld [vmem:[%s3768_s0 + $0x28] sm:$0xff]  ;;  %v2361_v45 = vld [vmem:[%s3768_s0 + $0x38] sm:$0xff]  ;;  %v2395_v54 = vsub.s32 3, %v2284_v26  ;;  %v2432_v0 = vsub.s32 5, %v2284_v26  ;;  %v2479_v24 = vsub.s32 7, %v2284_v26 }
   0xb   :  { %146 = vperm.xlu1 %1964, %v30_v1   ;;  %3963 = vst [vmem:[#allocation10_spill] sm:$0xff] %v2292_v29  ;;  %3964 = vst [vmem:[#allocation11_spill] sm:$0xff] %v2296_v30  ;;  %v2310_v33 = vrot.slane %v2301_v31, %v2292_v29  ;;  %v2314_v34 = vrot.slane %v2306_v32, %v2292_v29  ;;  %v2338_v40 = vrot.slane %v2319_v35, %v2292_v29  ;;  %v2356_v44 = vld [vmem:[%s3768_s0 + $0x30] sm:$0xff] }
   0xc   :  { %128 = vperm.xlu0 %1967, %v2181_v7   ;;  %v2342_v41 = vrot.slane %v2324_v36, %v2292_v29  ;;  %v2346_v42 = vrot.slane %v2329_v37, %v2292_v29  ;;  %3971 = vst [vmem:[#allocation18_spill] sm:$0xff] %v2364_v46  ;;  %v2368_v47 = vrot.slane %v2351_v43, %v2292_v29  ;;  %3979 = vst [vmem:[#allocation26_spill] sm:$0xff] %v2395_v54 }
   0xd   :  { %3966 = vst [vmem:[#allocation13_spill] sm:$0xff] %v2310_v33  ;;  %3967 = vst [vmem:[#allocation14_spill] sm:$0xff] %v2314_v34  ;;  %v2372_v48 = vrot.slane %v2356_v44, %v2292_v29  ;;  %v2376_v49 = vrot.slane %v2361_v45, %v2292_v29  ;;  %v2380_v50 = vrot.slane %v2301_v31, %v2296_v30 }
   0xe   :  { %3968 = vst [vmem:[#allocation15_spill] sm:$0xff] %v2338_v40  ;;  %3969 = vst [vmem:[#allocation16_spill] sm:$0xff] %v2342_v41  ;;  %v2384_v51 = vrot.slane %v2306_v32, %v2296_v30  ;;  %v2388_v52 = vrot.slane %v2319_v35, %v2296_v30  ;;  %v2392_v53 = vrot.slane %v2324_v36, %v2296_v30 }
   0xf   :  { %1965 = vset.pattern.permute.xlu1 %v2112_v2  ;;  %3970 = vst [vmem:[#allocation17_spill] sm:$0xff] %v2346_v42  ;;  %3972 = vst [vmem:[#allocation19_spill] sm:$0xff] %v2368_v47  ;;  %v2399_v55 = vrot.slane %v2329_v37, %v2296_v30  ;;  %v2403_v56 = vrot.slane %v2351_v43, %v2296_v30  ;;  %v2407_v57 = vrot.slane %v2356_v44, %v2296_v30 }
  0x10   :  { %1975 = vset.pattern.permute.xlu0 %v3776_v8  ;;  %164 = vperm.xlu1 %1965, %v27_v5   ;;  %3973 = vst [vmem:[#allocation20_spill] sm:$0xff] %v2372_v48  ;;  %3974 = vst [vmem:[#allocation21_spill] sm:$0xff] %v2376_v49  ;;  %v2411_v58 = vrot.slane %v2361_v45, %v2296_v30  ;;  %v2418_v60 = vrot.slane %v2301_v31, %v2364_v46 }
  0x11   :  { %244 = vperm.xlu0 %1975, %v27_v5   ;;  %3975 = vst [vmem:[#allocation22_spill] sm:$0xff] %v2380_v50  ;;  %3976 = vst [vmem:[#allocation23_spill] sm:$0xff] %v2384_v51  ;;  %v2422_v61 = vrot.slane %v2306_v32, %v2364_v46  ;;  %v2426_v62 = vrot.slane %v2319_v35, %v2364_v46  ;;  %v2444_v4 = vrot.slane %v2351_v43, %v2364_v46 }
  0x12   :  { %3977 = vst [vmem:[#allocation24_spill] sm:$0xff] %v2388_v52  ;;  %3978 = vst [vmem:[#allocation25_spill] sm:$0xff] %v2392_v53  ;;  %v2504_v30 = vrot.slane %v2306_v32, %v2432_v0  ;;  %v2516_v29 = vrot.slane %v2329_v37, %v2432_v0 }
  0x13   :  { %3980 = vst [vmem:[#allocation27_spill] sm:$0xff] %v2399_v55  ;;  %3981 = vst [vmem:[#allocation28_spill] sm:$0xff] %v2403_v56 }
  0x14   :  { %1968 = vset.pattern.permute.xlu1 %v3777_v9  ;;  %3982 = vst [vmem:[#allocation29_spill] sm:$0xff] %v2407_v57  ;;  %3983 = vst [vmem:[#allocation30_spill] sm:$0xff] %v2411_v58 }
  0x15   :  { %248 = vperm.xlu0 %1975, %v2181_v7   ;;  %204 = vperm.xlu1 %1968, %v27_v5   ;;  %3985 = vst [vmem:[#allocation32_spill] sm:$0xff] %v2418_v60  ;;  %3986 = vst [vmem:[#allocation33_spill] sm:$0xff] %v2422_v61 }
  0x16   :  { %3987 = vst [vmem:[#allocation34_spill] sm:$0xff] %v2426_v62  ;;  %3988 = vst [vmem:[#allocation35_spill] sm:$0xff] %v2432_v0 }
  0x17   :  { %3991 = vst [vmem:[#allocation38_spill] sm:$0xff] %v2444_v4  ;;  %4000 = vst [vmem:[#allocation47_spill] sm:$0xff] %v2479_v24 }
  0x18   :  { %4007 = vst [vmem:[#allocation54_spill] sm:$0xff] %v2504_v30  ;;  %4010 = vst [vmem:[#allocation57_spill] sm:$0xff] %v2516_v29 }
  0x19   :  { %1979 = vset.pattern.permute.xlu0 %v2117_v10  ;;  %226 = vperm.xlu1 %1968, %v30_v1  }
  0x1a   :  { %306 = vperm.xlu0 %1979, %v30_v1  }
  0x1d   :  { %1969 = vset.pattern.permute.xlu1 %v3776_v8 }
  0x1e   :  { %310 = vperm.xlu0 %1979, %v2193_v11   ;;  %266 = vperm.xlu1 %1969, %v30_v1  }
  0x22   :  { %1982 = vset.pattern.permute.xlu0 %v3780_v12  ;;  %1970 = vset.pattern.permute.xlu1 %v2117_v10 }
  0x23   :  { %386 = vperm.xlu0 %1982, %v30_v1   ;;  %284 = vperm.xlu1 %1970, %v27_v5  }
  0x27   :  { %368 = vperm.xlu0 %1982, %v2181_v7   ;;  %1971 = vset.pattern.permute.xlu1 %v3786_v13 }
  0x28   :  { %324 = vperm.xlu1 %1971, %v27_v5  }
  0x2b   :  { %1984 = vset.pattern.permute.xlu0 %v3779_v3 }
  0x2c   :  { %79 = vperm.xlu0 %1984, %v27_v5   ;;  %346 = vperm.xlu1 %1971, %v30_v1  }
  0x30   :  { %104 = vperm.xlu0 %1984, %v30_v1   ;;  %1972 = vset.pattern.permute.xlu1 %v3779_v3  ;;  %v2436_v1 = vrot.slane %v2324_v36, %v2364_v46 }
  0x31   :  { %109 = vperm.xlu1 %1972, %v2193_v11  }
  0x32   :  { %3989 = vst [vmem:[#allocation36_spill] sm:$0xff] %v2436_v1 }
  0x34   :  { %84 = vperm.xlu0 %1984, %v2181_v7  }
  0x35   :  { %1973 = vset.pattern.permute.xlu1 %v3780_v12 }
  0x36   :  { %364 = vperm.xlu1 %1973, %v27_v5   ;;  %v2448_v5 = vrot.slane %v2356_v44, %v2364_v46 }
  0x38   :  { %67 = vperm.xlu0 %1984, %v54_v14   ;;  %3992 = vst [vmem:[#allocation39_spill] sm:$0xff] %v2448_v5  ;;  %v2464_v14 = vrot.slane %v2319_v35, %v2395_v54 }
  0x3a   :  { %1974 = vset.pattern.permute.xlu1 %v3779_v3  ;;  %3996 = vst [vmem:[#allocation43_spill] sm:$0xff] %v2464_v14 }
  0x3b   :  { %44 = vperm.xlu1 %1974, %v35_v15   ;;  %v2468_v15 = vrot.slane %v2324_v36, %v2395_v54 }
  0x3c   :  { %49 = vperm.xlu0 %1984, %v36_v16   ;;  %v2472_v16 = vrot.slane %v2329_v37, %v2395_v54 }
  0x3d   :  { %3997 = vst [vmem:[#allocation44_spill] sm:$0xff] %v2468_v15 }
  0x3e   :  { %3998 = vst [vmem:[#allocation45_spill] sm:$0xff] %v2472_v16 }
  0x3f   :  { %62 = vperm.xlu1 %1974, %v53_v17   ;;  %v2476_v17 = vrot.slane %v2351_v43, %v2395_v54 }
  0x40   :  { %1988 = vset.pattern.permute.xlu0 %v2112_v2 }
  0x41   :  { %190 = vperm.xlu0 %1988, %v2193_v11   ;;  %3999 = vst [vmem:[#allocation46_spill] sm:$0xff] %v2476_v17 }
  0x43   :  { %1976 = vset.pattern.permute.xlu1 %v3778_v6 }
  0x44   :  { %150 = vperm.xlu1 %1976, %v2193_v11  }
  0x45   :  { %194 = vperm.xlu0 %1988, %v2225_v18  }
  0x48   :  { %1977 = vset.pattern.permute.xlu1 %v2112_v2 }
  0x49   :  { %1991 = vset.pattern.permute.xlu0 %v3777_v9  ;;  %168 = vperm.xlu1 %1977, %v2181_v7  }
  0x4a   :  { %212 = vperm.xlu0 %1991, %v2233_v19  }
  0x4d   :  { %1978 = vset.pattern.permute.xlu1 %v3777_v9 }
  0x4e   :  { %1993 = vset.pattern.permute.xlu0 %v2117_v10  ;;  %208 = vperm.xlu1 %1978, %v2181_v7  }
  0x4f   :  { %314 = vperm.xlu0 %1993, %v2225_v18  }
  0x52   :  { %230 = vperm.xlu1 %1978, %v2193_v11  }
  0x53   :  { %1996 = vset.pattern.permute.xlu0 %v3786_v13 }
  0x54   :  { %332 = vperm.xlu0 %1996, %v2233_v19  }
  0x56   :  { %1980 = vset.pattern.permute.xlu1 %v3776_v8 }
  0x57   :  { %270 = vperm.xlu1 %1980, %v2193_v11  }
  0x58   :  { %1998 = vset.pattern.permute.xlu0 %v3779_v3 }
  0x59   :  { %426 = vperm.xlu0 %1998, %v2250_v20  }
  0x5b   :  { %1981 = vset.pattern.permute.xlu1 %v2117_v10 }
  0x5c   :  { %288 = vperm.xlu1 %1981, %v2181_v7  }
  0x5d   :  { %2001 = vset.pattern.permute.xlu0 %v2112_v2 }
  0x5e   :  { %446 = vperm.xlu0 %2001, %v2250_v20  }
  0x60   :  { %1983 = vset.pattern.permute.xlu1 %v3786_v13 }
  0x61   :  { %328 = vperm.xlu1 %1983, %v2181_v7   ;;  %v2452_v7 = vrot.slane %v2361_v45, %v2364_v46 }
  0x62   :  { %2004 = vset.pattern.permute.xlu0 %v2117_v10 }
  0x63   :  { %476 = vperm.xlu0 %2004, %v2250_v20   ;;  %3993 = vst [vmem:[#allocation40_spill] sm:$0xff] %v2452_v7 }
  0x65   :  { %350 = vperm.xlu1 %1983, %v2193_v11  }
  0x67   :  { %2007 = vset.pattern.permute.xlu0 %v3780_v12 }
  0x69   :  { %1985 = vset.pattern.permute.xlu1 %v3780_v12  ;;  %v2496_v12 = vrot.slane %v2301_v31, %v2432_v0 }
  0x6a   :  { %390 = vperm.xlu1 %1985, %v2193_v11   ;;  %v2460_v11 = vrot.slane %v2306_v32, %v2395_v54 }
  0x6b   :  { %4005 = vst [vmem:[#allocation52_spill] sm:$0xff] %v2496_v12 }
  0x6c   :  { %3995 = vst [vmem:[#allocation42_spill] sm:$0xff] %v2460_v11 }
  0x6e   :  { %1986 = vset.pattern.permute.xlu1 %v3779_v3 }
  0x6f   :  { %114 = vperm.xlu1 %1986, %v2225_v18  }
  0x73   :  { %89 = vperm.xlu1 %1986, %v2233_v19  }
  0x77   :  { %1987 = vset.pattern.permute.xlu1 %v3778_v6 }
  0x78   :  { %154 = vperm.xlu1 %1987, %v2225_v18  }
  0x7c   :  { %132 = vperm.xlu1 %1987, %v2233_v19  }
  0x80   :  { %1989 = vset.pattern.permute.xlu1 %v2112_v2  ;;  %v2440_v2 = vrot.slane %v2329_v37, %v2364_v46  ;;  %v2499_v46 = vsub.s32 6, %v2284_v26 }
  0x81   :  { %v2273_v21 = vpop.permute.xlu1 %39  ;;  %172 = vperm.xlu1 %1989, %v2233_v19  }
  0x82   :  { %3958 = vst [vmem:[#allocation5_spill] sm:$0xff] %v2273_v21  ;;  %v2276_v22 = vpop.permute.xlu0 %186  ;;  %3990 = vst [vmem:[#allocation37_spill] sm:$0xff] %v2440_v2  ;;  %v2547_v21 = vrot.slane %v2329_v37, %v2479_v24 }
  0x83   :  { %3959 = vst [vmem:[#allocation6_spill] sm:$0xff] %v2276_v22  ;;  %4006 = vst [vmem:[#allocation53_spill] sm:$0xff] %v2499_v46  ;;  %v2539_v22 = vrot.slane %v2319_v35, %v2479_v24 }
  0x84   :  { %4018 = vst [vmem:[#allocation65_spill] sm:$0xff] %v2547_v21 }
  0x85   :  { %v2278_v23 = vpop.permute.xlu1 %57  ;;  %1990 = vset.pattern.permute.xlu1 %v3777_v9  ;;  %v2487_v9 = vrot.slane %v2361_v45, %v2395_v54  ;;  %4016 = vst [vmem:[#allocation63_spill] sm:$0xff] %v2539_v22  ;;  %v2561_v22 = vrot.slane %v2361_v45, %v2479_v24 }
  0x86   :  { %3960 = vst [vmem:[#allocation7_spill] sm:$0xff] %v2278_v23  ;;  %234 = vperm.xlu1 %1990, %v2225_v18   ;;  %v2528_v23 = vrot.slane %v2361_v45, %v2432_v0 }
  0x87   :  { %v2282_v25 = vpop.permute.xlu0 %124  ;;  %4002 = vst [vmem:[#allocation49_spill] sm:$0xff] %v2487_v9  ;;  %4022 = vst [vmem:[#allocation69_spill] sm:$0xff] %v2561_v22  ;;  %v2584_v22 = vrot.slane %v2329_v37, %v2499_v46 }
  0x88   :  { %4013 = vst [vmem:[#allocation60_spill] sm:$0xff] %v2528_v23  ;;  %v4024_v23 = vmov 7  }
  0x89   :  { %4028 = vst [vmem:[#allocation74_spill] sm:$0xff] %v2584_v22 }
  0x8a   :  { %v2286_v27 = vpop.permute.xlu1 %146  ;;  %1992 = vset.pattern.permute.xlu1 %v3776_v8  ;;  %v2483_v8 = vrot.slane %v2356_v44, %v2395_v54 }
  0x8b   :  { %3961 = vst [vmem:[#allocation8_spill] sm:$0xff] %v2286_v27  ;;  %v2289_v28 = vpop.permute.xlu0 %128  ;;  %274 = vperm.xlu1 %1992, %v2225_v18   ;;  %v2535_v27 = vrot.slane %v2306_v32, %v2479_v24 }
  0x8c   :  { %3962 = vst [vmem:[#allocation9_spill] sm:$0xff] %v2289_v28  ;;  %4001 = vst [vmem:[#allocation48_spill] sm:$0xff] %v2483_v8  ;;  %v2543_v28 = vrot.slane %v2324_v36, %v2479_v24 }
  0x8d   :  { %4015 = vst [vmem:[#allocation62_spill] sm:$0xff] %v2535_v27  ;;  %v2557_v27 = vrot.slane %v2356_v44, %v2479_v24 }
  0x8e   :  { %4017 = vst [vmem:[#allocation64_spill] sm:$0xff] %v2543_v28  ;;  %v2565_v28 = vrot.slane %v2301_v31, %v2499_v46 }
  0x8f   :  { %252 = vperm.xlu1 %1992, %v2233_v19   ;;  %v2332_v38 = vpop.permute.xlu1 %164  ;;  %4021 = vst [vmem:[#allocation68_spill] sm:$0xff] %v2557_v27  ;;  %v2593_v27 = vrot.slane %v2356_v44, %v2499_v46 }
  0x90   :  { %v2334_v39 = vpop.permute.xlu0 %244  ;;  %4023 = vst [vmem:[#allocation70_spill] sm:$0xff] %v2565_v28 }
  0x91   :  { %4030 = vst [vmem:[#allocation76_spill] sm:$0xff] %v2593_v27 }
  0x93   :  { %1994 = vset.pattern.permute.xlu1 %v2117_v10  ;;  %v2456_v10 = vrot.slane %v2301_v31, %v2395_v54  ;;  %v2512_v54 = vrot.slane %v2324_v36, %v2432_v0 }
  0x94   :  { %v2414_v59 = vpop.permute.xlu0 %248  ;;  %292 = vperm.xlu1 %1994, %v2233_v19   ;;  %v2429_v63 = vpop.permute.xlu1 %204 }
  0x95   :  { %3984 = vst [vmem:[#allocation31_spill] sm:$0xff] %v2414_v59  ;;  %3994 = vst [vmem:[#allocation41_spill] sm:$0xff] %v2456_v10  ;;  %v2531_v59 = vsub.s32 0, %v2284_v26  ;;  %v2553_v26 = vrot.slane %v2351_v43, %v2479_v24  ;;  %v2580_v24 = vrot.slane %v2324_v36, %v2499_v46 }
  0x96   :  { %4009 = vst [vmem:[#allocation56_spill] sm:$0xff] %v2512_v54 }
  0x97   :  { %4014 = vst [vmem:[#allocation61_spill] sm:$0xff] %v2531_v59  ;;  %4020 = vst [vmem:[#allocation67_spill] sm:$0xff] %v2553_v26  ;;  %v2576_v26 = vrot.slane %v2319_v35, %v2499_v46  ;;  %v2605_v22 = vrot.slane %v2306_v32, %v2531_v59 }
  0x98   :  { %1995 = vset.pattern.permute.xlu1 %v3786_v13  ;;  %v2490_v6 = vpop.permute.xlu1 %226  ;;  %v2508_v13 = vrot.slane %v2319_v35, %v2432_v0  ;;  %4027 = vst [vmem:[#allocation73_spill] sm:$0xff] %v2580_v24  ;;  %v2601_v24 = vrot.slane %v2301_v31, %v2531_v59  ;;  %v2621_v31 = vmul.f32 %v2310_v33, %v2282_v25 }
  0x99   :  { %4003 = vst [vmem:[#allocation50_spill] sm:$0xff] %v2490_v6  ;;  %v2492_v3 = vpop.permute.xlu0 %306  ;;  %354 = vperm.xlu1 %1995, %v2225_v18   ;;  %v2524_v6 = vrot.slane %v2356_v44, %v2432_v0  ;;  %4033 = vst [vmem:[#allocation79_spill] sm:$0xff] %v2605_v22  ;;  %v2641_v33 = vmul.f32 %v2338_v40, %v2282_v25  ;;  %v2663_v40 = vmul.f32 %v2376_v49, %v2282_v25 }
  0x9a   :  { %4004 = vst [vmem:[#allocation51_spill] sm:$0xff] %v2492_v3  ;;  %4008 = vst [vmem:[#allocation55_spill] sm:$0xff] %v2508_v13  ;;  %v2520_v3 = vrot.slane %v2351_v43, %v2432_v0  ;;  %v2727_v49 = vmul.f32 %v2444_v4, %v2334_v39  ;;  %v761_v4 = vmul.f32 %v2464_v14, %v2429_v63 }
  0x9b   :  { %4012 = vst [vmem:[#allocation59_spill] sm:$0xff] %v2524_v6  ;;  %4032 = vst [vmem:[#allocation78_spill] sm:$0xff] %v2601_v24 }
  0x9c   :  { %4011 = vst [vmem:[#allocation58_spill] sm:$0xff] %v2520_v3 }
  0x9d   :  { %v2549_v0 = vpop.permute.xlu0 %310  ;;  %1997 = vset.pattern.permute.xlu1 %v4024_v23  ;;  %v2568_v21 = vpop.permute.xlu1 %266  ;;  %v2597_v23 = vrot.slane %v2361_v45, %v2499_v46 }
  0x9e   :  { %4019 = vst [vmem:[#allocation66_spill] sm:$0xff] %v2549_v0  ;;  %4025 = vst [vmem:[#allocation71_spill] sm:$0xff] %v2568_v21  ;;  %v2572_v0 = vrot.slane %v2306_v32, %v2499_v46  ;;  %394 = vperm.xlu1 %1997, %v2225_v18   ;;  %v2589_v21 = vrot.slane %v2351_v43, %v2499_v46  ;;  %v2609_v18 = vrot.slane %v2319_v35, %v2531_v59 }
  0x9f   :  { %4031 = vst [vmem:[#allocation77_spill] sm:$0xff] %v2597_v23  ;;  %v2617_v46 = vrot.slane %v2329_v37, %v2531_v59  ;;  %v2625_v32 = vrot.slane %v2351_v43, %v2531_v59  ;;  %v2629_v35 = vrot.slane %v2356_v44, %v2531_v59  ;;  %v2637_v37 = vmul.f32 %v2314_v34, %v2282_v25 }
  0xa0   :  { %4026 = vst [vmem:[#allocation72_spill] sm:$0xff] %v2572_v0  ;;  %4029 = vst [vmem:[#allocation75_spill] sm:$0xff] %v2589_v21  ;;  %v2613_v21 = vrot.slane %v2324_v36, %v2531_v59  ;;  %v2633_v36 = vrot.slane %v2361_v45, %v2531_v59  ;;  %v2645_v43 = vmul.f32 %v2342_v41, %v2282_v25 }
  0xa1   :  { %4034 = vst [vmem:[#allocation80_spill] sm:$0xff] %v2609_v18  ;;  %4036 = vst [vmem:[#allocation82_spill] sm:$0xff] %v2617_v46  ;;  %v2649_v44 = vmul.f32 %v2346_v42, %v2282_v25  ;;  %v2655_v45 = vmul.f32 %v2368_v47, %v2282_v25  ;;  %v2659_v59 = vmul.f32 %v2372_v48, %v2282_v25  ;;  %v4044_v47 = vmov 0  }
  0xa2   :  { %4035 = vst [vmem:[#allocation81_spill] sm:$0xff] %v2613_v21  ;;  %4037 = vst [vmem:[#allocation83_spill] sm:$0xff] %v2625_v32  ;;  %v2651_v23 = vpop.permute.xlu0 %386  ;;  %v2667_v41 = vmul.f32 %v2380_v50, %v2332_v38  ;;  %372 = vperm.xlu1 %1997, %v2233_v19   ;;  %v2670_v42 = vpop.permute.xlu1 %284  ;;  %v2678_v48 = vmul.f32 %v2388_v52, %v2332_v38  ;;  %v2682_v25 = vmul.f32 %v2392_v53, %v2332_v38 }
  0xa3   :  { %4038 = vst [vmem:[#allocation84_spill] sm:$0xff] %v2629_v35  ;;  %4039 = vst [vmem:[#allocation85_spill] sm:$0xff] %v2633_v36  ;;  %v2686_v50 = vmul.f32 %v2399_v55, %v2332_v38  ;;  %v2690_v19 = vmul.f32 %v2403_v56, %v2332_v38  ;;  %v2698_v52 = vmul.f32 %v2411_v58, %v2332_v38  ;;  %v70_v55 = vld [vmem:[%s3774_s6] sm:$0xff]  ;;  %s2120_s6 = smov [#allocation2]  }
  0xa4   :  { %4040 = vst [vmem:[#allocation86_spill] sm:$0xff] %v2651_v23  ;;  %4041 = vst [vmem:[#allocation87_spill] sm:$0xff] %v2670_v42  ;;  %v2674_v23 = vmul.f32 %v2384_v51, %v2332_v38  ;;  %v2694_v51 = vmul.f32 %v2407_v57, %v2332_v38  ;;  %v2702_v53 = vmul.f32 %v2418_v60, %v2334_v39  ;;  %s1918_s16 = sshll.u32 %s2120_s6, 4  ;;  %s1919_s16 = int_to_ptr.vmem [resolvable:$true] %s1918_s16 }
  0xa5   :  { %v2709_v56 = vmul.f32 %v2422_v61, %v2334_v39  ;;  %v2713_v57 = vmul.f32 %v2426_v62, %v2334_v39  ;;  %v2717_v38 = vmul.f32 %v2436_v1, %v2334_v39  ;;  %v2721_v60 = vmul.f32 %v2440_v2, %v2334_v39  ;;  %s2088_s17 = scalar_lea.vmem %s1919_s16, 1024  ;;  %p2093_p1 = scmp.lt.s32.totalorder %s1919_s16, %s1919_s16 }
  0xa6   :  { %v2723_v58 = vpop.permute.xlu0 %368  ;;  %v2731_v61 = vmul.f32 %v2448_v5, %v2334_v39  ;;  %v2735_v62 = vmul.f32 %v2452_v7, %v2334_v39  ;;  %v219_v1 = vmul.f32 %v2456_v10, %v2429_v63  ;;  %1999 = vset.pattern.permute.xlu1 %v4044_v47  ;;  %v962_v2 = vmul.f32 %v2468_v15, %v2429_v63  ;;  %p2089_p0 = scmp.ne.s32.totalorder %s1919_s16, %s2088_s17  ;;  %p2094_p2 = scmp.lt.s32.totalorder %s2088_s17, %s2088_s17 }
  0xa7   :  { %4042 = vst [vmem:[#allocation88_spill] sm:$0xff] %v2723_v58  ;;  %v560_v58 = vmul.f32 %v2460_v11, %v2429_v63  ;;  %v1163_v5 = vmul.f32 %v2472_v16, %v2429_v63  ;;  %73 = vperm.xlu1 %1999, %v70_v55   ;;  %v2748_v39 = vpop.permute.xlu1 %324  ;;  %v1364_v10 = vmul.f32 %v2476_v17, %v2429_v63  ;;  %v4045_v7 = vmov 1  }
  0xa8   :  { %4043 = vst [vmem:[#allocation89_spill] sm:$0xff] %v2735_v62  ;;  %v1565_v47 = vmul.f32 %v2483_v8, %v2429_v63  ;;  %v1766_v11 = vmul.f32 %v2487_v9, %v2429_v63  ;;  %v2758_v14 = vmul.f32 %v2496_v12, %v2670_v42  ;;  %v2762_v15 = vmul.f32 %v2504_v30, %v2670_v42  ;;  %p2095_p3 = por %p2094_p2, %p2093_p1 }
  0xa9   :  { %v2766_v55 = vmul.f32 %v2508_v13, %v2670_v42  ;;  %v2770_v17 = vmul.f32 %v2512_v54, %v2670_v42  ;;  %v2774_v8 = vmul.f32 %v2516_v29, %v2670_v42  ;;  %v2778_v63 = vmul.f32 %v2520_v3, %v2670_v42 }
  0xaa   :  { %v2782_v12 = vmul.f32 %v2524_v6, %v2670_v42  ;;  %v2786_v13 = vmul.f32 %v2565_v28, %v2748_v39  ;;  %v2790_v54 = vmul.f32 %v2572_v0, %v2748_v39  ;;  %v4048_v42 = vmov 3   ;;  %p2096_p4 = pnand %p2095_p3, %p2089_p0 }
  0xab   :  { %v80_v30 = vpop.permute.xlu0 %79  ;;  %2000 = vset.pattern.permute.xlu1 %v4045_v7  ;;  %v2797_v6 = vpop.permute.xlu1 %346 }
  0xac   :  { %v96_v29 = vmul.f32 %v2601_v24, %v80_v30  ;;  %v512_v9 = vmul.f32 %v2605_v22, %v80_v30  ;;  %v713_v3 = vmul.f32 %v2609_v18, %v80_v30  ;;  %v914_v16 = vmul.f32 %v2613_v21, %v80_v30  ;;  %4046 = vst [vmem:[#allocation90_spill] sm:$0xff] %v2797_v6  ;;  %v4047_v24 = vld [vmem:[#allocation5_spill] sm:$0xff] }
  0xad   :  { %v1115_v28 = vmul.f32 %v2617_v46, %v80_v30  ;;  %v1316_v34 = vmul.f32 %v2625_v32, %v80_v30  ;;  %v1517_v0 = vmul.f32 %v2629_v35, %v80_v30  ;;  %v1718_v62 = vmul.f32 %v2633_v36, %v80_v30  ;;  %436 = vperm.xlu1 %2000, %v2250_v20  }
  0xae   :  { %v99_v22 = vadd.f32 %v96_v29, %v4047_v24  ;;  %v515_v18 = vadd.f32 %v512_v9, %v4047_v24  ;;  %v716_v21 = vadd.f32 %v713_v3, %v4047_v24  ;;  %v917_v7 = vadd.f32 %v914_v16, %v4047_v24 }
  0xaf   :  { %v1118_v6 = vadd.f32 %v1115_v28, %v4047_v24  ;;  %v1319_v46 = vadd.f32 %v1316_v34, %v4047_v24  ;;  %v1520_v32 = vadd.f32 %v1517_v0, %v4047_v24  ;;  %v1721_v35 = vadd.f32 %v1718_v62, %v4047_v24 }
  0xb0   :  { %v142_v30 = vadd.f32 %v2621_v31, %v99_v22  ;;  %v531_v36 = vadd.f32 %v2637_v37, %v515_v18  ;;  %v732_v29 = vadd.f32 %v2641_v33, %v716_v21  ;;  %v933_v9 = vadd.f32 %v2645_v43, %v917_v7  ;;  %v2821_v0 = vpop.permute.xlu1 %109  ;;  %v4050_v37 = vld [vmem:[#allocation74_spill] sm:$0xff] }
  0xb1   :  { %v1134_v3 = vadd.f32 %v2649_v44, %v1118_v6  ;;  %v1335_v16 = vadd.f32 %v2655_v45, %v1319_v46  ;;  %v1536_v28 = vadd.f32 %v2659_v59, %v1520_v32  ;;  %v1737_v34 = vadd.f32 %v2663_v40, %v1721_v35  ;;  %2002 = vset.pattern.permute.xlu1 %v4048_v42 }
  0xb2   :  { %v182_v22 = vadd.f32 %v2667_v41, %v142_v30  ;;  %v547_v31 = vadd.f32 %v2674_v23, %v531_v36  ;;  %v748_v21 = vadd.f32 %v2678_v48, %v732_v29  ;;  %v949_v33 = vadd.f32 %v2682_v25, %v933_v9  ;;  %456 = vperm.xlu1 %2002, %v2250_v20   ;;  %v4049_v36 = vld [vmem:[#allocation73_spill] sm:$0xff]  ;;  %v4055_v30 = vld [vmem:[#allocation87_spill] sm:$0xff]  ;;  %v4056_v29 = vld [vmem:[#allocation60_spill] sm:$0xff] }
  0xb3   :  { %v1150_v6 = vadd.f32 %v2686_v50, %v1134_v3  ;;  %v1351_v46 = vadd.f32 %v2690_v19, %v1335_v16  ;;  %v1552_v40 = vadd.f32 %v2694_v51, %v1536_v28  ;;  %v1753_v42 = vadd.f32 %v2698_v52, %v1737_v34 }
  0xb4   :  { %v222_v59 = vadd.f32 %v219_v1, %v182_v22  ;;  %v563_v62 = vadd.f32 %v560_v58, %v547_v31  ;;  %v764_v24 = vadd.f32 %v761_v4, %v748_v21  ;;  %v965_v41 = vadd.f32 %v962_v2, %v949_v33  ;;  %v4061_v31 = vld [vmem:[#allocation63_spill] sm:$0xff]  ;;  %v4062_v33 = vld [vmem:[#allocation64_spill] sm:$0xff] }
  0xb5   :  { %v1166_v18 = vadd.f32 %v1163_v5, %v1150_v6  ;;  %v1367_v23 = vadd.f32 %v1364_v10, %v1351_v46  ;;  %v1568_v32 = vadd.f32 %v1565_v47, %v1552_v40  ;;  %v1769_v48 = vadd.f32 %v1766_v11, %v1753_v42  ;;  %v2840_v58 = vpop.permute.xlu1 %364  ;;  %v4052_v10 = vld [vmem:[#allocation75_spill] sm:$0xff]  ;;  %v4063_v46 = vld [vmem:[#allocation77_spill] sm:$0xff] }
  0xb6   :  { %v809_v35 = vmul.f32 %v2576_v26, %v2748_v39  ;;  %v1010_v50 = vmul.f32 %v4049_v36, %v2748_v39  ;;  %v1211_v43 = vmul.f32 %v4050_v37, %v2748_v39  ;;  %v4051_v51 = vmov 4  }
  0xb7   :  { %2003 = vset.pattern.permute.xlu1 %v4051_v51  ;;  %v262_v52 = vadd.f32 %v2702_v53, %v222_v59  ;;  %v579_v1 = vadd.f32 %v2709_v56, %v563_v62  ;;  %v780_v2 = vadd.f32 %v2713_v57, %v764_v24  ;;  %v981_v4 = vadd.f32 %v2717_v38, %v965_v41  ;;  %v2858_v38 = vpop.permute.xlu0 %104  ;;  %v4064_v59 = vld [vmem:[#allocation65_spill] sm:$0xff]  ;;  %v4065_v24 = vld [vmem:[#allocation67_spill] sm:$0xff] }
  0xb8   :  { %v1182_v5 = vadd.f32 %v2721_v60, %v1166_v18  ;;  %466 = vperm.xlu1 %2003, %v2250_v20   ;;  %v1412_v11 = vmul.f32 %v4052_v10, %v2748_v39  ;;  %v1383_v45 = vadd.f32 %v2727_v49, %v1367_v23  ;;  %v1584_v53 = vadd.f32 %v2731_v61, %v1568_v32  ;;  %v4066_v23 = vld [vmem:[#allocation15_spill] sm:$0xff] }
  0xb9   :  { %v302_v44 = vadd.f32 %v2758_v14, %v262_v52  ;;  %v595_v25 = vadd.f32 %v2762_v15, %v579_v1  ;;  %v796_v56 = vadd.f32 %v2766_v55, %v780_v2  ;;  %v997_v57 = vadd.f32 %v2770_v17, %v981_v4  ;;  %4053 = vst [vmem:[#allocation5_spill] sm:$0xff] %v2858_v38 }
  0xba   :  { %v1198_v19 = vadd.f32 %v2774_v8, %v1182_v5  ;;  %v1613_v60 = vmul.f32 %v2593_v27, %v2748_v39  ;;  %v1399_v49 = vadd.f32 %v2778_v63, %v1383_v45  ;;  %v1600_v61 = vadd.f32 %v2782_v12, %v1584_v53  ;;  %v2867_v8 = vpop.permute.xlu1 %44  ;;  %v4058_v63 = vld [vmem:[#allocation9_spill] sm:$0xff]  ;;  %v4059_v12 = vld [vmem:[#allocation14_spill] sm:$0xff] }
  0xbb   :  { %v2861_v47 = vadd.f32 %v2786_v13, %v302_v44  ;;  %v611_v14 = vadd.f32 %v2790_v54, %v595_v25  ;;  %v812_v15 = vadd.f32 %v809_v35, %v796_v56  ;;  %v1013_v55 = vadd.f32 %v1010_v50, %v997_v57  ;;  %v4057_v13 = vld [vmem:[#allocation89_spill] sm:$0xff]  ;;  %v4060_v54 = vld [vmem:[#allocation62_spill] sm:$0xff]  ;;  %v2887_v18 = vpop.permute.xlu0 %84  ;;  %v4075_v44 = vld [vmem:[#allocation68_spill] sm:$0xff] }
  0xbc   :  { %v1214_v7 = vadd.f32 %v1211_v43, %v1198_v19  ;;  %v4054_v17 = vmov 6   ;;  %v1798_v9 = vmul.f32 %v4056_v29, %v4055_v30  ;;  %v1415_v3 = vadd.f32 %v1412_v11, %v1399_v49  ;;  %v4074_v5 = vld [vmem:[#allocation17_spill] sm:$0xff]  ;;  %v4077_v56 = vld [vmem:[#allocation79_spill] sm:$0xff]  ;;  %v4079_v49 = vld [vmem:[#allocation80_spill] sm:$0xff] }
  0xbd   :  { %2005 = vset.pattern.permute.xlu1 %v4054_v17  ;;  %v1616_v16 = vadd.f32 %v1613_v60, %v1600_v61  ;;  %v1785_v28 = vadd.f32 %v4057_v13, %v1769_v48  ;;  %v529_v34 = vmul.f32 %v4059_v12, %v4058_v63  ;;  %v624_v22 = vmul.f32 %v4060_v54, %v2840_v58  ;;  %v4076_v53 = vld [vmem:[#allocation69_spill] sm:$0xff]  ;;  %v4078_v19 = vld [vmem:[#allocation19_spill] sm:$0xff] }
  0xbe   :  { %486 = vperm.xlu1 %2005, %v2250_v20   ;;  %v825_v21 = vmul.f32 %v4061_v31, %v2840_v58  ;;  %v1026_v6 = vmul.f32 %v4062_v33, %v2840_v58  ;;  %v1814_v40 = vmul.f32 %v4063_v46, %v2748_v39  ;;  %v1227_v62 = vmul.f32 %v4064_v59, %v2840_v58  ;;  %v2897_v43 = vpop.permute.xlu1 %62  ;;  %v4070_v39 = vld [vmem:[#allocation16_spill] sm:$0xff] }
  0xbf   :  { %v1801_v42 = vadd.f32 %v1798_v9, %v1785_v28  ;;  %v1428_v41 = vmul.f32 %v4065_v24, %v2840_v58  ;;  %v730_v32 = vmul.f32 %v4066_v23, %v4058_v63  ;;  %v2891_v48 = vadd.f32 %v624_v22, %v611_v14  ;;  %v4080_v14 = vld [vmem:[#allocation81_spill] sm:$0xff]  ;;  %v4084_v9 = vld [vmem:[#allocation83_spill] sm:$0xff]  ;;  %v4086_v28 = vld [vmem:[#allocation20_spill] sm:$0xff] }
  0xc0   :  { %v2893_v35 = vadd.f32 %v825_v21, %v812_v15  ;;  %v2895_v50 = vadd.f32 %v1026_v6, %v1013_v55  ;;  %v931_v51 = vmul.f32 %v4070_v39, %v4058_v63  ;;  %v2901_v1 = vadd.f32 %v1227_v62, %v1214_v7  ;;  %v4081_v55 = vld [vmem:[#allocation82_spill] sm:$0xff]  ;;  %v4087_v21 = vld [vmem:[#allocation85_spill] sm:$0xff] }
  0xc1   :  { %4067 = vst [vmem:[#allocation73_spill] sm:$0xff] %v2891_v48  ;;  %v1817_v52 = vadd.f32 %v1814_v40, %v1801_v42  ;;  %v2903_v2 = vadd.f32 %v1428_v41, %v1415_v3  ;;  %v4073_v4 = vmov 7   ;;  %v1132_v11 = vmul.f32 %v4074_v5, %v4058_v63 }
  0xc2   :  { %4068 = vst [vmem:[#allocation74_spill] sm:$0xff] %v2893_v35  ;;  %4069 = vst [vmem:[#allocation87_spill] sm:$0xff] %v2895_v50  ;;  %2006 = vset.pattern.permute.xlu1 %v4073_v4  ;;  %v1629_v45 = vmul.f32 %v4075_v44, %v2840_v58  ;;  %v1830_v25 = vmul.f32 %v4076_v53, %v2840_v58  ;;  %v513_v57 = vmul.f32 %v4077_v56, %v2887_v18  ;;  %v4088_v4 = vld [vmem:[#allocation21_spill] sm:$0xff] }
  0xc3   :  { %4071 = vst [vmem:[#allocation89_spill] sm:$0xff] %v2901_v1  ;;  %4072 = vst [vmem:[#allocation9_spill] sm:$0xff] %v2903_v2  ;;  %496 = vperm.xlu1 %2006, %v2250_v20   ;;  %v1333_v60 = vmul.f32 %v4078_v19, %v4058_v63  ;;  %v714_v61 = vmul.f32 %v4079_v49, %v2887_v18  ;;  %v915_v15 = vmul.f32 %v4080_v14, %v2887_v18  ;;  %v4085_v20 = vld [vmem:[#allocation84_spill] sm:$0xff]  ;;  %v2936_v42 = vpop.permute.xlu1 %150  ;;  %v4091_v19 = vld [vmem:[#allocation31_spill] sm:$0xff] }
  0xc4   :  { %v1116_v7 = vmul.f32 %v4081_v55, %v2887_v18  ;;  %v2923_v17 = vadd.f32 %v1629_v45, %v1616_v16  ;;  %v2925_v30 = vadd.f32 %v1830_v25, %v1817_v52  ;;  %v1317_v3 = vmul.f32 %v4084_v9, %v2887_v18  ;;  %v4112_v14 = vld [vmem:[#allocation48_spill] sm:$0xff]  ;;  %v4113_v49 = vld [vmem:[#allocation49_spill] sm:$0xff] }
  0xc5   :  { %v1518_v13 = vmul.f32 %v4085_v20, %v2887_v18  ;;  %v1534_v22 = vmul.f32 %v4086_v28, %v4058_v63  ;;  %v1719_v6 = vmul.f32 %v4087_v21, %v2887_v18  ;;  %v516_v40 = vadd.f32 %v513_v57, %v2867_v8 }
  0xc6   :  { %4082 = vst [vmem:[#allocation91_spill] sm:$0xff] %v2923_v17  ;;  %4083 = vst [vmem:[#allocation92_spill] sm:$0xff] %v2925_v30  ;;  %v717_v16 = vadd.f32 %v714_v61, %v2867_v8  ;;  %v918_v62 = vadd.f32 %v915_v15, %v2867_v8  ;;  %v1119_v41 = vadd.f32 %v1116_v7, %v2867_v8  ;;  %v4089_v61 = vld [vmem:[#allocation6_spill] sm:$0xff]  ;;  %v4090_v15 = vld [vmem:[#allocation8_spill] sm:$0xff]  ;;  %v117_v7 = vmul.f32 0.0, %v2858_v38 }
  0xc7   :  { %v1320_v52 = vadd.f32 %v1317_v3, %v2867_v8  ;;  %v1735_v45 = vmul.f32 %v4088_v4, %v4058_v63  ;;  %v532_v25 = vadd.f32 %v529_v34, %v516_v40  ;;  %v1521_v30 = vadd.f32 %v1518_v13, %v2867_v8  ;;  %v4092_v4 = vld [vmem:[#allocation33_spill] sm:$0xff]  ;;  %v4093_v13 = vld [vmem:[#allocation34_spill] sm:$0xff] }
  0xc8   :  { %v733_v17 = vadd.f32 %v730_v32, %v717_v16  ;;  %v934_v2 = vadd.f32 %v931_v51, %v918_v62  ;;  %v1135_v1 = vadd.f32 %v1132_v11, %v1119_v41  ;;  %v1722_v35 = vadd.f32 %v1719_v6, %v2867_v8  ;;  %v2949_v3 = vpop.permute.xlu1 %168  ;;  %v4094_v11 = vld [vmem:[#allocation23_spill] sm:$0xff]  ;;  %v4096_v6 = vld [vmem:[#allocation24_spill] sm:$0xff]  ;;  %v4097_v16 = vld [vmem:[#allocation25_spill] sm:$0xff] }
  0xc9   :  { %v1336_v57 = vadd.f32 %v1333_v60, %v1320_v52  ;;  %v1537_v50 = vadd.f32 %v1534_v22, %v1521_v30  ;;  %v197_v48 = vmul.f32 0.0, %v4089_v61  ;;  %v157_v28 = vmul.f32 0.0, %v4090_v15  ;;  %v4095_v30 = vld [vmem:[#allocation36_spill] sm:$0xff]  ;;  %v4098_v41 = vld [vmem:[#allocation27_spill] sm:$0xff]  ;;  %v4099_v61 = vld [vmem:[#allocation37_spill] sm:$0xff] }
  0xca   :  { %v577_v34 = vmul.f32 %v4092_v4, %v4091_v19  ;;  %v778_v32 = vmul.f32 %v4093_v13, %v4091_v19  ;;  %v1738_v51 = vadd.f32 %v1735_v45, %v1722_v35  ;;  %v545_v60 = vmul.f32 %v4094_v11, %v2949_v3  ;;  %v4100_v35 = vld [vmem:[#allocation38_spill] sm:$0xff]  ;;  %v4101_v13 = vld [vmem:[#allocation28_spill] sm:$0xff] }
  0xcb   :  { %v979_v22 = vmul.f32 %v4095_v30, %v4091_v19  ;;  %v746_v40 = vmul.f32 %v4096_v6, %v2949_v3  ;;  %v947_v62 = vmul.f32 %v4097_v16, %v2949_v3  ;;  %v1148_v52 = vmul.f32 %v4098_v41, %v2949_v3  ;;  %v4102_v30 = vld [vmem:[#allocation7_spill] sm:$0xff]  ;;  %v4104_v41 = vld [vmem:[#allocation29_spill] sm:$0xff] }
  0xcc   :  { %v1180_v15 = vmul.f32 %v4099_v61, %v4091_v19  ;;  %v1381_v45 = vmul.f32 %v4100_v35, %v4091_v19  ;;  %v548_v38 = vadd.f32 %v545_v60, %v532_v25  ;;  %v1349_v4 = vmul.f32 %v4101_v13, %v2949_v3  ;;  %v4103_v16 = vld [vmem:[#allocation39_spill] sm:$0xff]  ;;  %v4105_v61 = vld [vmem:[#allocation30_spill] sm:$0xff]  ;;  %v4106_v25 = vld [vmem:[#allocation40_spill] sm:$0xff] }
  0xcd   :  { %v120_v11 = vadd.f32 %v117_v7, %v4102_v30  ;;  %v749_v5 = vadd.f32 %v746_v40, %v733_v17  ;;  %v950_v6 = vadd.f32 %v947_v62, %v934_v2  ;;  %v1151_v39 = vadd.f32 %v1148_v52, %v1135_v1  ;;  %v2978_v35 = vpop.permute.xlu1 %208  ;;  %v4107_v7 = vld [vmem:[#allocation42_spill] sm:$0xff]  ;;  %v4108_v1 = vld [vmem:[#allocation43_spill] sm:$0xff]  ;;  %v4109_v40 = vld [vmem:[#allocation44_spill] sm:$0xff] }
  0xce   :  { %v1582_v23 = vmul.f32 %v4103_v16, %v4091_v19  ;;  %v1352_v12 = vadd.f32 %v1349_v4, %v1336_v57  ;;  %v1550_v21 = vmul.f32 %v4104_v41, %v2949_v3  ;;  %v1751_v20 = vmul.f32 %v4105_v61, %v2949_v3  ;;  %v4110_v52 = vld [vmem:[#allocation45_spill] sm:$0xff]  ;;  %v4111_v16 = vld [vmem:[#allocation46_spill] sm:$0xff] }
  0xcf   :  { %v1783_v60 = vmul.f32 %v4106_v25, %v4091_v19  ;;  %v561_v17 = vmul.f32 %v4107_v7, %v2978_v35  ;;  %v762_v2 = vmul.f32 %v4108_v1, %v2978_v35  ;;  %v963_v4 = vmul.f32 %v4109_v40, %v2978_v35 }
  0xd0   :  { %v1553_v57 = vadd.f32 %v1550_v21, %v1537_v50  ;;  %v1754_v62 = vadd.f32 %v1751_v20, %v1738_v51  ;;  %v1164_v30 = vmul.f32 %v4110_v52, %v2978_v35  ;;  %v1365_v61 = vmul.f32 %v4111_v16, %v2978_v35 }
  0xd1   :  { %v160_v41 = vadd.f32 %v157_v28, %v120_v11  ;;  %v564_v13 = vadd.f32 %v561_v17, %v548_v38  ;;  %v765_v25 = vadd.f32 %v762_v2, %v749_v5  ;;  %v966_v9 = vadd.f32 %v963_v4, %v950_v6  ;;  %v2996_v50 = vpop.permute.xlu1 %230  ;;  %v4116_v6 = vld [vmem:[#allocation51_spill] sm:$0xff] }
  0xd2   :  { %v1167_v55 = vadd.f32 %v1164_v30, %v1151_v39  ;;  %v1368_v7 = vadd.f32 %v1365_v61, %v1352_v12  ;;  %v1566_v1 = vmul.f32 %v4112_v14, %v2978_v35  ;;  %v1767_v40 = vmul.f32 %v4113_v49, %v2978_v35  ;;  %v4114_v39 = vld [vmem:[#allocation50_spill] sm:$0xff]  ;;  %v4117_v2 = vld [vmem:[#allocation71_spill] sm:$0xff] }
  0xd3   :  { %v580_v20 = vadd.f32 %v577_v34, %v564_v13  ;;  %v781_v21 = vadd.f32 %v778_v32, %v765_v25  ;;  %v982_v56 = vadd.f32 %v979_v22, %v966_v9  ;;  %v200_v28 = vadd.f32 %v197_v48, %v160_v41  ;;  %v4118_v49 = vld [vmem:[#allocation47_spill] sm:$0xff]  ;;  %v4119_v34 = vld [vmem:[#allocation12_spill] sm:$0xff]  ;;  %v4120_v32 = vld [vmem:[#allocation86_spill] sm:$0xff] }
  0xd4   :  { %v1569_v51 = vadd.f32 %v1566_v1, %v1553_v57  ;;  %v1770_v52 = vadd.f32 %v1767_v40, %v1754_v62  ;;  %v1183_v16 = vadd.f32 %v1180_v15, %v1167_v55  ;;  %v1384_v38 = vadd.f32 %v1381_v45, %v1368_v7  ;;  %v4121_v55 = vld [vmem:[#allocation88_spill] sm:$0xff]  ;;  %v3016_v45 = vpop.permute.xlu0 %67  ;;  %v4122_v25 = vld [vmem:[#allocation54_spill] sm:$0xff]  ;;  %v4123_v7 = vld [vmem:[#allocation55_spill] sm:$0xff] }
  0xd5   :  { %v237_v12 = vmul.f32 0.0, %v4114_v39  ;;  %v317_v17 = vmul.f32 0.0, %v4116_v6  ;;  %v277_v4 = vmul.f32 0.0, %v4117_v2  ;;  %v3005_v13 = vrot.slane %v4119_v34, %v4118_v49  ;;  %v4124_v40 = vld [vmem:[#allocation56_spill] sm:$0xff]  ;;  %v4125_v62 = vld [vmem:[#allocation57_spill] sm:$0xff] }
  0xd6   :  { %v1585_v5 = vadd.f32 %v1582_v23, %v1569_v51  ;;  %v1786_v11 = vadd.f32 %v1783_v60, %v1770_v52  ;;  %v2999_v61 = vpop.permute.xlu1 %270  ;;  %v397_v9 = vmul.f32 0.0, %v4120_v32  ;;  %v625_v48 = vmul.f32 %v4060_v54, %v4121_v55  ;;  %v4126_v51 = vld [vmem:[#allocation58_spill] sm:$0xff] }
  0xd7   :  { %4115 = vst [vmem:[#allocation31_spill] sm:$0xff] %v2999_v61  ;;  %v240_v30 = vadd.f32 %v237_v12, %v200_v28  ;;  %v826_v23 = vmul.f32 %v4061_v31, %v4121_v55  ;;  %v1027_v15 = vmul.f32 %v4062_v33, %v4121_v55  ;;  %v4127_v12 = vld [vmem:[#allocation59_spill] sm:$0xff]  ;;  %v1228_v34 = vmul.f32 %v4064_v59, %v4121_v55 }
  0xd8   :  { %v1429_v54 = vmul.f32 %v4065_v24, %v4121_v55 }
  0xd9   :  { %v280_v41 = vadd.f32 %v277_v4, %v240_v30 }
  0xdb   :  { %v3014_v22 = vpop.permute.xlu1 %288 }
  0xdc   :  { %v593_v60 = vmul.f32 %v4122_v25, %v3014_v22  ;;  %v794_v1 = vmul.f32 %v4123_v7, %v3014_v22  ;;  %v995_v57 = vmul.f32 %v4124_v40, %v3014_v22  ;;  %v1196_v52 = vmul.f32 %v4125_v62, %v3014_v22 }
  0xdd   :  { %v1397_v28 = vmul.f32 %v4126_v51, %v3014_v22  ;;  %v1598_v30 = vmul.f32 %v4127_v12, %v3014_v22  ;;  %v1799_v4 = vmul.f32 %v4056_v29, %v3014_v22  ;;  %v1630_v51 = vmul.f32 %v4075_v44, %v4121_v55  ;;  %v4128_v29 = vld [vmem:[#allocation90_spill] sm:$0xff] }
  0xde   :  { %v596_v32 = vadd.f32 %v593_v60, %v580_v20  ;;  %v797_v6 = vadd.f32 %v794_v1, %v781_v21  ;;  %v998_v49 = vadd.f32 %v995_v57, %v982_v56  ;;  %v1199_v2 = vadd.f32 %v1196_v52, %v1183_v16  ;;  %v4129_v56 = vld [vmem:[#allocation72_spill] sm:$0xff]  ;;  %v4130_v1 = vld [vmem:[#allocation78_spill] sm:$0xff] }
  0xdf   :  { %v1400_v39 = vadd.f32 %v1397_v28, %v1384_v38  ;;  %v1601_v33 = vadd.f32 %v1598_v30, %v1585_v5  ;;  %v1802_v31 = vadd.f32 %v1799_v4, %v1786_v11  ;;  %v1831_v12 = vmul.f32 %v4076_v53, %v4121_v55  ;;  %v3049_v5 = vpop.permute.xlu0 %49 }
  0xe0   :  { %v357_v62 = vmul.f32 0.0, %v4128_v29  ;;  %v3041_v40 = vpop.permute.xlu1 %328  ;;  %v320_v20 = vadd.f32 %v317_v17, %v280_v41  ;;  %v97_v57 = vmul.f32 %v4130_v1, %v2887_v18 }
  0xe1   :  { %v609_v16 = vmul.f32 %v4129_v56, %v3041_v40  ;;  %v810_v21 = vmul.f32 %v2576_v26, %v3041_v40  ;;  %v1011_v38 = vmul.f32 %v4049_v36, %v3041_v40  ;;  %v1212_v11 = vmul.f32 %v4050_v37, %v3041_v40 }
  0xe2   :  { %v1413_v60 = vmul.f32 %v4052_v10, %v3041_v40  ;;  %v1614_v17 = vmul.f32 %v2593_v27, %v3041_v40  ;;  %v1815_v41 = vmul.f32 %v4063_v46, %v3041_v40  ;;  %v360_v59 = vadd.f32 %v357_v62, %v320_v20  ;;  %v4141_v62 = vld [vmem:[#allocation22_spill] sm:$0xff] }
  0xe3   :  { %v612_v52 = vadd.f32 %v609_v16, %v596_v32  ;;  %v813_v28 = vadd.f32 %v810_v21, %v797_v6  ;;  %v1014_v30 = vadd.f32 %v1011_v38, %v998_v49  ;;  %v1215_v4 = vadd.f32 %v1212_v11, %v1199_v2  ;;  %v4140_v32 = vld [vmem:[#allocation13_spill] sm:$0xff]  ;;  %v4144_v38 = vld [vmem:[#allocation32_spill] sm:$0xff]  ;;  %v4145_v11 = vld [vmem:[#allocation66_spill] sm:$0xff] }
  0xe4   :  { %v1416_v29 = vadd.f32 %v1413_v60, %v1400_v39  ;;  %v1617_v53 = vadd.f32 %v1614_v17, %v1601_v33  ;;  %v1818_v44 = vadd.f32 %v1815_v41, %v1802_v31  ;;  %v3061_v24 = vpop.permute.xlu1 %350  ;;  %v118_v33 = vmul.f32 0.0, %v2821_v0  ;;  %v3079_v39 = vpop.permute.xlu0 %190 }
  0xe5   :  { %4131 = vst [vmem:[#allocation48_spill] sm:$0xff] %v3061_v24  ;;  %v3063_v7 = vadd.f32 %v625_v48, %v612_v52  ;;  %v3065_v25 = vadd.f32 %v826_v23, %v813_v28  ;;  %v3067_v27 = vadd.f32 %v1027_v15, %v1014_v30  ;;  %v3069_v46 = vadd.f32 %v1228_v34, %v1215_v4  ;;  %v4146_v52 = vld [vmem:[#allocation79_spill] sm:$0xff]  ;;  %v4147_v28 = vld [vmem:[#allocation80_spill] sm:$0xff]  ;;  %v4148_v4 = vld [vmem:[#allocation81_spill] sm:$0xff] }
  0xe6   :  { %v3071_v10 = vadd.f32 %v1429_v54, %v1416_v29  ;;  %v3073_v18 = vadd.f32 %v1630_v51, %v1617_v53  ;;  %v3075_v49 = vadd.f32 %v1831_v12, %v1818_v44  ;;  %v158_v31 = vmul.f32 0.0, %v2936_v42 }
  0xe7   :  { %4132 = vst [vmem:[#allocation12_spill] sm:$0xff] %v3063_v7  ;;  %4133 = vst [vmem:[#allocation88_spill] sm:$0xff] %v3065_v25  ;;  %v121_v6 = vadd.f32 %v118_v33, %v2897_v43  ;;  %v140_v48 = vmul.f32 %v4140_v32, %v4058_v63  ;;  %v400_v23 = vadd.f32 %v397_v9, %v360_v59  ;;  %v198_v53 = vmul.f32 0.0, %v3079_v39  ;;  %v4142_v63 = vld [vmem:[#allocation41_spill] sm:$0xff] }
  0xe8   :  { %4134 = vst [vmem:[#allocation72_spill] sm:$0xff] %v3067_v27  ;;  %4135 = vst [vmem:[#allocation78_spill] sm:$0xff] %v3069_v46  ;;  %v379_v29 = vmul.f32 %v3005_v13, %v2840_v58  ;;  %v100_v54 = vadd.f32 %v97_v57, %v2867_v8  ;;  %v180_v51 = vmul.f32 %v4141_v62, %v2949_v3  ;;  %v238_v12 = vmul.f32 0.0, %v2996_v50 }
  0xe9   :  { %4136 = vst [vmem:[#allocation93_spill] sm:$0xff] %v3071_v10  ;;  %4137 = vst [vmem:[#allocation94_spill] sm:$0xff] %v3073_v18  ;;  %v3082_v2 = vpop.permute.xlu1 %390  ;;  %v161_v44 = vadd.f32 %v158_v31, %v121_v6  ;;  %v220_v59 = vmul.f32 %v4142_v63, %v2978_v35  ;;  %v278_v8 = vmul.f32 0.0, %v2999_v61  ;;  %v318_v60 = vmul.f32 0.0, %v4145_v11  ;;  %v4149_v31 = vld [vmem:[#allocation82_spill] sm:$0xff]  ;;  %v4163_v18 = vld [vmem:[#allocation19_spill] sm:$0xff] }
  0xea   :  { %4138 = vst [vmem:[#allocation95_spill] sm:$0xff] %v3075_v49  ;;  %4139 = vst [vmem:[#allocation96_spill] sm:$0xff] %v3082_v2  ;;  %v382_v15 = vadd.f32 %v379_v29, %v2861_v47  ;;  %v143_v20 = vadd.f32 %v140_v48, %v100_v54  ;;  %v260_v47 = vmul.f32 %v4144_v38, %v4091_v19  ;;  %v4150_v19 = vld [vmem:[#allocation83_spill] sm:$0xff]  ;;  %v4152_v54 = vld [vmem:[#allocation85_spill] sm:$0xff] }
  0xeb   :  { %v201_v58 = vadd.f32 %v198_v53, %v161_v44  ;;  %v3118_v53 = vpop.permute.xlu0 %194  ;;  %v4158_v49 = vld [vmem:[#allocation15_spill] sm:$0xff]  ;;  %v4174_v11 = vld [vmem:[#allocation30_spill] sm:$0xff] }
  0xec   :  { %v403_v34 = vadd.f32 %v400_v23, %v382_v15  ;;  %v183_v16 = vadd.f32 %v180_v51, %v143_v20  ;;  %v4151_v23 = vld [vmem:[#allocation84_spill] sm:$0xff] }
  0xed   :  { %v241_v21 = vadd.f32 %v238_v12, %v201_v58  ;;  %v4153_v15 = vld [vmem:[#allocation52_spill] sm:$0xff] }
  0xee   :  { %v3096_v9 = vpop.permute.xlu1 %114  ;;  %v1929_v3 = vmul.f32 -1.442695, %v403_v34  ;;  %v223_v17 = vadd.f32 %v220_v59, %v183_v16  ;;  %v300_v51 = vmul.f32 %v4153_v15, %v3014_v22  ;;  %v358_v22 = vmul.f32 0.0, %v3061_v24 }
  0xef   :  { %4143 = vst [vmem:[#allocation13_spill] sm:$0xff] %v3096_v9  ;;  %v281_v57 = vadd.f32 %v278_v8, %v241_v21 }
  0xf0   :  { %v263_v21 = vadd.f32 %v260_v47, %v223_v17  ;;  %2008 = vpow2.f32 %v1929_v3  ;;  %v4155_v17 = vld [vmem:[#allocation42_spill] sm:$0xff] }
  0xf2   :  { %v3102_v41 = vpop.permute.xlu1 %89 }
  0xf3   :  { %v514_v35 = vmul.f32 %v4146_v52, %v3102_v41  ;;  %v715_v30 = vmul.f32 %v4147_v28, %v3102_v41  ;;  %v916_v33 = vmul.f32 %v4148_v4, %v3102_v41  ;;  %v1117_v6 = vmul.f32 %v4149_v31, %v3102_v41  ;;  %v4154_v52 = vld [vmem:[#allocation70_spill] sm:$0xff] }
  0xf4   :  { %v1318_v48 = vmul.f32 %v4150_v19, %v3102_v41  ;;  %v1519_v29 = vmul.f32 %v4151_v23, %v3102_v41  ;;  %v1720_v44 = vmul.f32 %v4152_v54, %v3102_v41  ;;  %v340_v28 = vmul.f32 %v4154_v52, %v3041_v40  ;;  %v4156_v23 = vld [vmem:[#allocation43_spill] sm:$0xff]  ;;  %v4157_v54 = vld [vmem:[#allocation14_spill] sm:$0xff] }
  0xf5   :  { %v517_v12 = vadd.f32 %v514_v35, %v3049_v5  ;;  %v718_v34 = vadd.f32 %v715_v30, %v3049_v5  ;;  %v919_v20 = vadd.f32 %v916_v33, %v3049_v5  ;;  %v1120_v59 = vadd.f32 %v1117_v6, %v3049_v5  ;;  %v3134_v35 = vpop.permute.xlu0 %212 }
  0xf6   :  { %v1321_v58 = vadd.f32 %v1318_v48, %v3049_v5  ;;  %v1522_v8 = vadd.f32 %v1519_v29, %v3049_v5  ;;  %v1723_v16 = vadd.f32 %v1720_v44, %v3049_v5  ;;  %v303_v30 = vadd.f32 %v300_v51, %v263_v21  ;;  %v4160_v21 = vld [vmem:[#allocation45_spill] sm:$0xff] }
  0xf7   :  { %v3132_v4 = vpop.permute.xlu1 %154  ;;  %v321_v33 = vadd.f32 %v318_v60, %v281_v57  ;;  %v398_v31 = vmul.f32 0.0, %v3082_v2  ;;  %v380_v6 = vmul.f32 %v3005_v13, %v4121_v55  ;;  %v562_v40 = vmul.f32 %v4155_v17, %v3134_v35  ;;  %v4159_v60 = vld [vmem:[#allocation44_spill] sm:$0xff] }
  0xf8   :  { %v343_v19 = vadd.f32 %v340_v28, %v303_v30  ;;  %v763_v29 = vmul.f32 %v4156_v23, %v3134_v35  ;;  %v964_v57 = vmul.f32 %v4159_v60, %v3134_v35  ;;  %v1165_v55 = vmul.f32 %v4160_v21, %v3134_v35  ;;  %v4161_v28 = vld [vmem:[#allocation16_spill] sm:$0xff]  ;;  %v4162_v30 = vld [vmem:[#allocation17_spill] sm:$0xff] }
  0xf9   :  { %v361_v48 = vadd.f32 %v358_v22, %v321_v33  ;;  %v4164_v23 = vld [vmem:[#allocation20_spill] sm:$0xff]  ;;  %v4166_v21 = vld [vmem:[#allocation21_spill] sm:$0xff] }
  0xfa   :  { %v383_v25 = vadd.f32 %v380_v6, %v343_v19  ;;  %v4173_v19 = vld [vmem:[#allocation29_spill] sm:$0xff] }
  0xfb   :  { %v133_v47 = vpop.permute.xlu1 %132  ;;  %v401_v3 = vadd.f32 %v398_v31, %v361_v48 }
  0xfc   :  { %v530_v44 = vmul.f32 %v4157_v54, %v133_v47  ;;  %v731_v51 = vmul.f32 %v4158_v49, %v133_v47  ;;  %v932_v22 = vmul.f32 %v4161_v28, %v133_v47  ;;  %v1133_v33 = vmul.f32 %v4162_v30, %v133_v47  ;;  %v4165_v54 = vld [vmem:[#allocation46_spill] sm:$0xff]  ;;  %v4169_v30 = vld [vmem:[#allocation24_spill] sm:$0xff] }
  0xfd   :  { %v1334_v17 = vmul.f32 %v4163_v18, %v133_v47  ;;  %v1535_v27 = vmul.f32 %v4164_v23, %v133_v47  ;;  %v1366_v49 = vmul.f32 %v4165_v54, %v3134_v35  ;;  %v1736_v31 = vmul.f32 %v4166_v21, %v133_v47  ;;  %v4167_v18 = vld [vmem:[#allocation49_spill] sm:$0xff] }
  0xfe   :  { %v533_v10 = vadd.f32 %v530_v44, %v517_v12  ;;  %v734_v46 = vadd.f32 %v731_v51, %v718_v34  ;;  %v935_v7 = vadd.f32 %v932_v22, %v919_v20  ;;  %v1136_v60 = vadd.f32 %v1133_v33, %v1120_v59  ;;  %v4168_v44 = vld [vmem:[#allocation23_spill] sm:$0xff]  ;;  %v4170_v54 = vld [vmem:[#allocation25_spill] sm:$0xff] }
  0xff   :  { %v1337_v2 = vadd.f32 %v1334_v17, %v1321_v58  ;;  %v1538_v24 = vadd.f32 %v1535_v27, %v1522_v8  ;;  %v1567_v28 = vmul.f32 %v4112_v14, %v3134_v35  ;;  %v1768_v12 = vmul.f32 %v4167_v18, %v3134_v35  ;;  %v4171_v59 = vld [vmem:[#allocation27_spill] sm:$0xff]  ;;  %v4172_v27 = vld [vmem:[#allocation28_spill] sm:$0xff]  ;;  %v2009_v18 = vpop.eup %2008 }
 0x100   :  { %v173_v48 = vpop.permute.xlu1 %172  ;;  %v410_v34 = vadd.f32 %v401_v3, %v383_v25  ;;  %v1739_v20 = vadd.f32 %v1736_v31, %v1723_v16  ;;  %v119_v33 = vmul.f32 0.0, %v3096_v9 }
 0x101   :  { %v546_v51 = vmul.f32 %v4168_v44, %v173_v48  ;;  %v747_v23 = vmul.f32 %v4169_v30, %v173_v48  ;;  %v948_v6 = vmul.f32 %v4170_v54, %v173_v48  ;;  %v1149_v58 = vmul.f32 %v4171_v59, %v173_v48 }
 0x102   :  { %v1350_v8 = vmul.f32 %v4172_v27, %v173_v48  ;;  %v1551_v22 = vmul.f32 %v4173_v19, %v173_v48  ;;  %v1752_v30 = vmul.f32 %v4174_v11, %v173_v48  ;;  %v159_v54 = vmul.f32 0.0, %v3132_v4  ;;  %v3171_v27 = vpop.permute.xlu0 %314 }
 0x103   :  { %v549_v14 = vadd.f32 %v546_v51, %v533_v10  ;;  %v750_v17 = vadd.f32 %v747_v23, %v734_v46  ;;  %v951_v21 = vadd.f32 %v948_v6, %v935_v7  ;;  %v1152_v25 = vadd.f32 %v1149_v58, %v1136_v60 }
 0x104   :  { %v1353_v3 = vadd.f32 %v1350_v8, %v1337_v2  ;;  %v1554_v44 = vadd.f32 %v1551_v22, %v1538_v24  ;;  %v1755_v19 = vadd.f32 %v1752_v30, %v1739_v20  ;;  %v98_v7 = vmul.f32 %v4130_v1, %v3102_v41  ;;  %v4176_v20 = vld [vmem:[#allocation33_spill] sm:$0xff]  ;;  %v4177_v8 = vld [vmem:[#allocation34_spill] sm:$0xff]  ;;  %v4182_v30 = vld [vmem:[#allocation40_spill] sm:$0xff] }
 0x105   :  { %v565_v16 = vadd.f32 %v562_v40, %v549_v14  ;;  %v766_v31 = vadd.f32 %v763_v29, %v750_v17  ;;  %v967_v59 = vadd.f32 %v964_v57, %v951_v21  ;;  %v3169_v61 = vpop.permute.xlu1 %234  ;;  %v1168_v9 = vadd.f32 %v1165_v55, %v1152_v25  ;;  %v4179_v14 = vld [vmem:[#allocation37_spill] sm:$0xff]  ;;  %v4180_v17 = vld [vmem:[#allocation38_spill] sm:$0xff] }
 0x106   :  { %v1369_v10 = vadd.f32 %v1366_v49, %v1353_v3  ;;  %v1570_v46 = vadd.f32 %v1567_v28, %v1554_v44  ;;  %v407_v2 = vadd.f32 1.0, %v2009_v18  ;;  %v122_v24 = vadd.f32 %v119_v33, %v3016_v45  ;;  %v3177_v40 = vpop.permute.xlu0 %332  ;;  %v4181_v18 = vld [vmem:[#allocation39_spill] sm:$0xff] }
 0x107   :  { %v1771_v11 = vadd.f32 %v1768_v12, %v1755_v19  ;;  %v141_v60 = vmul.f32 %v4140_v32, %v133_v47  ;;  %v1930_v29 = vmul.f32 -1.442695, %v410_v34  ;;  %v199_v51 = vmul.f32 0.0, %v3118_v53 }
 0x108   :  { %v162_v57 = vadd.f32 %v159_v54, %v122_v24  ;;  %v101_v55 = vadd.f32 %v98_v7, %v3049_v5  ;;  %v181_v49 = vmul.f32 %v4141_v62, %v173_v48  ;;  %2010 = vrcp.f32 %v407_v2 }
 0x109   :  { %v221_v1 = vmul.f32 %v4142_v63, %v3134_v35  ;;  %v319_v41 = vmul.f32 0.0, %v3171_v27  ;;  %v610_v32 = vmul.f32 %v4129_v56, %v3177_v40  ;;  %v239_v28 = vmul.f32 0.0, %v3169_v61  ;;  %v4175_v35 = vld [vmem:[#allocation75_spill] sm:$0xff] }
 0x10a   :  { %v3180_v23 = vpop.permute.xlu1 %274  ;;  %v144_v47 = vadd.f32 %v141_v60, %v101_v55  ;;  %v811_v12 = vmul.f32 %v2576_v26, %v3177_v40  ;;  %v1012_v5 = vmul.f32 %v4049_v36, %v3177_v40  ;;  %2012 = vpow2.f32 %v1930_v29  ;;  %v4178_v26 = vld [vmem:[#allocation36_spill] sm:$0xff] }
 0x10b   :  { %v202_v62 = vadd.f32 %v199_v51, %v162_v57  ;;  %v1213_v63 = vmul.f32 %v4050_v37, %v3177_v40  ;;  %v1414_v34 = vmul.f32 %v4175_v35, %v3177_v40  ;;  %v279_v56 = vmul.f32 0.0, %v3180_v23  ;;  %v4183_v51 = vld [vmem:[#allocation76_spill] sm:$0xff] }
 0x10c   :  { %v184_v6 = vadd.f32 %v181_v49, %v144_v47  ;;  %v1615_v55 = vmul.f32 %v4183_v51, %v3177_v40  ;;  %v4184_v49 = vld [vmem:[#allocation77_spill] sm:$0xff] }
 0x10d   :  { %v242_v3 = vadd.f32 %v239_v28, %v202_v62  ;;  %v1816_v47 = vmul.f32 %v4184_v49, %v3177_v40  ;;  %v4187_v62 = vld [vmem:[#allocation56_spill] sm:$0xff] }
 0x10e   :  { %v253_v48 = vpop.permute.xlu1 %252  ;;  %v224_v60 = vadd.f32 %v221_v1, %v184_v6  ;;  %v4190_v1 = vld [vmem:[#allocation59_spill] sm:$0xff]  ;;  %v4191_v6 = vld [vmem:[#allocation60_spill] sm:$0xff] }
 0x10f   :  { %v578_v58 = vmul.f32 %v4176_v20, %v253_v48  ;;  %v779_v22 = vmul.f32 %v4177_v8, %v253_v48  ;;  %v980_v33 = vmul.f32 %v4178_v26, %v253_v48  ;;  %v1181_v36 = vmul.f32 %v4179_v14, %v253_v48  ;;  %v4185_v20 = vld [vmem:[#allocation54_spill] sm:$0xff] }
 0x110   :  { %v1382_v21 = vmul.f32 %v4180_v17, %v253_v48  ;;  %v1583_v25 = vmul.f32 %v4181_v18, %v253_v48  ;;  %v1784_v54 = vmul.f32 %v4182_v30, %v253_v48  ;;  %v282_v35 = vadd.f32 %v279_v56, %v242_v3 }
 0x111   :  { %v581_v37 = vadd.f32 %v578_v58, %v565_v16  ;;  %v782_v44 = vadd.f32 %v779_v22, %v766_v31  ;;  %v983_v19 = vadd.f32 %v980_v33, %v967_v59  ;;  %v1184_v7 = vadd.f32 %v1181_v36, %v1168_v9  ;;  %v4186_v16 = vld [vmem:[#allocation55_spill] sm:$0xff]  ;;  %v4188_v59 = vld [vmem:[#allocation57_spill] sm:$0xff] }
 0x112   :  { %v1385_v2 = vadd.f32 %v1382_v21, %v1369_v10  ;;  %v1586_v24 = vadd.f32 %v1583_v25, %v1570_v46  ;;  %v1787_v29 = vadd.f32 %v1784_v54, %v1771_v11  ;;  %v4189_v10 = vld [vmem:[#allocation58_spill] sm:$0xff]  ;;  %v2011_v22 = vpop.eup %2010  ;;  %v261_v26 = vmul.f32 %v4144_v38, %v253_v48 }
 0x113   :  { %v293_v57 = vpop.permute.xlu1 %292 }
 0x114   :  { %v594_v28 = vmul.f32 %v4185_v20, %v293_v57  ;;  %v795_v31 = vmul.f32 %v4186_v16, %v293_v57  ;;  %v996_v58 = vmul.f32 %v4187_v62, %v293_v57  ;;  %v1197_v9 = vmul.f32 %v4188_v59, %v293_v57  ;;  %v2013_v25 = vpop.eup %2012 }
 0x115   :  { %v1398_v46 = vmul.f32 %v4189_v10, %v293_v57  ;;  %v1599_v11 = vmul.f32 %v4190_v1, %v293_v57  ;;  %v1800_v8 = vmul.f32 %v4191_v6, %v293_v57  ;;  %v301_v3 = vmul.f32 %v4153_v15, %v293_v57  ;;  %v4199_v1 = vld [vmem:[#allocation69_spill] sm:$0xff] }
 0x116   :  { %v597_v33 = vadd.f32 %v594_v28, %v581_v37  ;;  %v798_v14 = vadd.f32 %v795_v31, %v782_v44  ;;  %v999_v56 = vadd.f32 %v996_v58, %v983_v19  ;;  %v1200_v36 = vadd.f32 %v1197_v9, %v1184_v7  ;;  %v4197_v31 = vld [vmem:[#allocation68_spill] sm:$0xff] }
 0x117   :  { %v1401_v17 = vadd.f32 %v1398_v46, %v1385_v2  ;;  %v1602_v21 = vadd.f32 %v1599_v11, %v1586_v24  ;;  %v1803_v18 = vadd.f32 %v1800_v8, %v1787_v29  ;;  %v264_v48 = vadd.f32 %v261_v26, %v224_v60  ;;  %v4192_v29 = vld [vmem:[#allocation62_spill] sm:$0xff] }
 0x118   :  { %v613_v30 = vadd.f32 %v610_v32, %v597_v33  ;;  %v814_v54 = vadd.f32 %v811_v12, %v798_v14  ;;  %v1015_v51 = vadd.f32 %v1012_v5, %v999_v56  ;;  %v3219_v49 = vpop.permute.xlu1 %354  ;;  %v1216_v20 = vadd.f32 %v1213_v63, %v1200_v36 }
 0x119   :  { %v1417_v16 = vadd.f32 %v1414_v34, %v1401_v17  ;;  %v1618_v62 = vadd.f32 %v1615_v55, %v1602_v21  ;;  %v1819_v59 = vadd.f32 %v1816_v47, %v1803_v18  ;;  %v359_v38 = vmul.f32 0.0, %v3219_v49  ;;  %v4194_v55 = vld [vmem:[#allocation64_spill] sm:$0xff] }
 0x11a   :  { %v322_v37 = vadd.f32 %v319_v41, %v282_v35  ;;  %v414_v44 = vadd.f32 1.0, %v2013_v25  ;;  %v304_v19 = vadd.f32 %v301_v3, %v264_v48  ;;  %v341_v7 = vmul.f32 %v4154_v52, %v3177_v40  ;;  %v4193_v41 = vld [vmem:[#allocation63_spill] sm:$0xff]  ;;  %v4195_v35 = vld [vmem:[#allocation65_spill] sm:$0xff] }
 0x11b   :  { %v4196_v40 = vld [vmem:[#allocation67_spill] sm:$0xff] }
 0x11c   :  { %v362_v15 = vadd.f32 %v359_v38, %v322_v37  ;;  %2014 = vrcp.f32 %v414_v44  ;;  %v344_v5 = vadd.f32 %v341_v7, %v304_v19  ;;  %v4210_v37 = vld [vmem:[#allocation26_spill] sm:$0xff]  ;;  %v4211_v19 = vld [vmem:[#allocation7_spill] sm:$0xff] }
 0x11d   :  { %v3224_v2 = vpop.permute.xlu1 %394 }
 0x11e   :  { %v399_v32 = vmul.f32 0.0, %v3224_v2 }
 0x120   :  { %v402_v12 = vadd.f32 %v399_v32, %v362_v15  ;;  %v4212_v32 = vld [vmem:[#allocation8_spill] sm:$0xff] }
 0x121   :  { %v373_v63 = vpop.permute.xlu1 %372 }
 0x122   :  { %v417_v34 = vmul.f32 %v2011_v22, %v402_v12  ;;  %v381_v24 = vmul.f32 %v3005_v13, %v373_v63  ;;  %v626_v60 = vmul.f32 %v4192_v29, %v373_v63  ;;  %v827_v57 = vmul.f32 %v4193_v41, %v373_v63  ;;  %v4215_v41 = vld [vmem:[#allocation6_spill] sm:$0xff] }
 0x123   :  { %v1028_v47 = vmul.f32 %v4194_v55, %v373_v63  ;;  %v1229_v52 = vmul.f32 %v4195_v35, %v373_v63  ;;  %v1430_v28 = vmul.f32 %v4196_v40, %v373_v63  ;;  %v1631_v58 = vmul.f32 %v4197_v31, %v373_v63  ;;  %v4217_v35 = vld [vmem:[#allocation35_spill] sm:$0xff]  ;;  %v4218_v31 = vld [vmem:[#allocation50_spill] sm:$0xff] }
 0x124   :  { %v384_v9 = vadd.f32 %v381_v24, %v344_v5  ;;  %v3234_v10 = vadd.f32 %v626_v60, %v613_v30  ;;  %v3236_v46 = vadd.f32 %v827_v57, %v814_v54  ;;  %v1832_v11 = vmul.f32 %v4199_v1, %v373_v63  ;;  %v4206_v30 = vld [vmem:[#allocation61_spill] sm:$0xff] }
 0x125   :  { %v3239_v13 = vadd.f32 %v1028_v47, %v1015_v51  ;;  %v3241_v6 = vadd.f32 %v1229_v52, %v1216_v20  ;;  %v3243_v8 = vadd.f32 %v1430_v28, %v1417_v16  ;;  %v3245_v22 = vadd.f32 %v1631_v58, %v1618_v62  ;;  %v4207_v51 = vld [vmem:[#allocation10_spill] sm:$0xff]  ;;  %v4208_v16 = vld [vmem:[#allocation11_spill] sm:$0xff]  ;;  %v3283_v47 = vpop.permute.xlu0 %426  ;;  %v4219_v1 = vld [vmem:[#allocation53_spill] sm:$0xff] }
 0x126   :  { %4198 = vst [vmem:[#allocation22_spill] sm:$0xff] %v3236_v46  ;;  %v418_v26 = vadd.f32 %v417_v34, %v384_v9  ;;  %v3247_v33 = vadd.f32 %v1832_v11, %v1819_v59  ;;  %v2015_v14 = vpop.eup %2014  ;;  %v3249_v56 = vpop.permute.xlu1 %73  ;;  %v4209_v59 = vld [vmem:[#allocation5_spill] sm:$0xff]  ;;  %v4214_v34 = vld [vmem:[#allocation18_spill] sm:$0xff]  ;;  %4216 = vst [vmem:[#allocation84_spill] sm:$0xff] %v3283_v47 }
 0x127   :  { %4200 = vst [vmem:[#allocation41_spill] sm:$0xff] %v3239_v13  ;;  %4201 = vst [vmem:[#allocation32_spill] sm:$0xff] %v3241_v6  ;;  %v420_v36 = vsub.f32 1.0, %v2015_v14  ;;  %v422_v21 = vmul.f32 0.0, %v2015_v14  ;;  %v4227_v6 = vld [vmem:[#allocation90_spill] sm:$0xff] }
 0x128   :  { %4202 = vst [vmem:[#allocation79_spill] sm:$0xff] %v3243_v8  ;;  %4203 = vst [vmem:[#allocation80_spill] sm:$0xff] %v3245_v22  ;;  %2016 = vtanh.f32 %v418_v26 }
 0x129   :  { %4204 = vst [vmem:[#allocation81_spill] sm:$0xff] %v3247_v33 }
 0x12c   :  { %v3253_v3 = vpop.permute.xlu1 %436 }
 0x12d   :  { %4205 = vst [vmem:[#allocation82_spill] sm:$0xff] %v3253_v3 }
 0x131   :  { %v3273_v63 = vpop.permute.xlu1 %456 }
 0x132   :  { %v2017_v17 = vpop.eup %2016  ;;  %4213 = vst [vmem:[#allocation83_spill] sm:$0xff] %v3273_v63 }
 0x133   :  { %v421_v18 = vmul.f32 %v2017_v17, %v420_v36  ;;  %v4220_v36 = vld [vmem:[#allocation71_spill] sm:$0xff] }
 0x135   :  { %v3251_v25 = vadd.f32 %v422_v21, %v421_v18  ;;  %v4221_v21 = vld [vmem:[#allocation31_spill] sm:$0xff] }
 0x137   :  { %v432_v54 = vrot.slane %v3251_v25, %v4206_v30  ;;  %v442_v20 = vrot.slane %v3251_v25, %v4207_v51  ;;  %v3261_v62 = vrot.slane %v3251_v25, %v4208_v16  ;;  %v3267_v44 = vrot.slane %v3251_v25, %v4210_v37 }
 0x138   :  { %v3277_v24 = vrot.slane %v3251_v25, %v4214_v34  ;;  %v3287_v52 = vrot.slane %v3251_v25, %v4217_v35  ;;  %v3295_v11 = vrot.slane %v3251_v25, %v4219_v1 }
 0x139   :  { %v518_v38 = vmul.f32 %v432_v54, %v4209_v59  ;;  %v519_v48 = vmul.f32 %v432_v54, %v2821_v0  ;;  %v534_v12 = vmul.f32 %v442_v20, %v4212_v32  ;;  %v535_v5 = vmul.f32 %v442_v20, %v2936_v42 }
 0x13a   :  { %v550_v57 = vmul.f32 %v3261_v62, %v4215_v41  ;;  %v551_v55 = vmul.f32 %v3261_v62, %v3079_v39  ;;  %v566_v58 = vmul.f32 %v3267_v44, %v4218_v31  ;;  %v567_v9 = vmul.f32 %v3267_v44, %v2996_v50 }
 0x13b   :  { %v521_v7 = vadd.f32 %v518_v38, %v4211_v19  ;;  %v522_v15 = vadd.f32 %v519_v48, %v2897_v43  ;;  %v582_v17 = vmul.f32 %v3277_v24, %v4220_v36  ;;  %v583_v18 = vmul.f32 %v3277_v24, %v4221_v21  ;;  %v3301_v38 = vpop.permute.xlu1 %466  ;;  %v4222_v48 = vld [vmem:[#allocation47_spill] sm:$0xff] }
 0x13d   :  { %v537_v29 = vadd.f32 %v534_v12, %v521_v7  ;;  %v538_v60 = vadd.f32 %v535_v5, %v522_v15  ;;  %v502_v7 = vrot.slane %v3251_v25, %v4222_v48  ;;  %v433_v15 = vmul.f32 %v432_v54, %v3283_v47 }
 0x13f   :  { %v553_v40 = vadd.f32 %v550_v57, %v537_v29  ;;  %v554_v28 = vadd.f32 %v551_v55, %v538_v60  ;;  %v4223_v29 = vld [vmem:[#allocation51_spill] sm:$0xff]  ;;  %v4224_v57 = vld [vmem:[#allocation66_spill] sm:$0xff]  ;;  %v434_v33 = vadd.f32 %v433_v15, %v3249_v56  ;;  %v3323_v47 = vpop.permute.xlu1 %486  ;;  %v463_v15 = vmul.f32 %v3267_v44, %v3273_v63 }
 0x140   :  { %v598_v60 = vmul.f32 %v3287_v52, %v4223_v29  ;;  %v599_v55 = vmul.f32 %v3287_v52, %v4224_v57  ;;  %v4229_v29 = vld [vmem:[#allocation86_spill] sm:$0xff] }
 0x141   :  { %v569_v26 = vadd.f32 %v566_v58, %v553_v40  ;;  %v570_v14 = vadd.f32 %v567_v9, %v554_v28  ;;  %v3310_v40 = vpop.permute.xlu0 %446  ;;  %v4226_v28 = vld [vmem:[#allocation13_spill] sm:$0xff]  ;;  %v443_v9 = vmul.f32 %v442_v20, %v3253_v3 }
 0x142   :  { %4225 = vst [vmem:[#allocation85_spill] sm:$0xff] %v3310_v40  ;;  %v520_v58 = vmul.f32 %v432_v54, %v4226_v28  ;;  %v453_v13 = vmul.f32 %v3261_v62, %v3310_v40  ;;  %v630_v54 = vmul.f32 %v502_v7, %v4229_v29  ;;  %v4230_v28 = vld [vmem:[#allocation96_spill] sm:$0xff] }
 0x143   :  { %v585_v12 = vadd.f32 %v582_v17, %v569_v26  ;;  %v586_v5 = vadd.f32 %v583_v18, %v570_v14  ;;  %v614_v26 = vmul.f32 %v3295_v11, %v4227_v6  ;;  %v4228_v14 = vld [vmem:[#allocation48_spill] sm:$0xff]  ;;  %v444_v18 = vadd.f32 %v443_v9, %v434_v33 }
 0x144   :  { %v615_v17 = vmul.f32 %v3295_v11, %v4228_v14  ;;  %v631_v3 = vmul.f32 %v502_v7, %v4230_v28  ;;  %v536_v9 = vmul.f32 %v442_v20, %v3132_v4  ;;  %v4232_v28 = vld [vmem:[#allocation12_spill] sm:$0xff]  ;;  %v552_v20 = vmul.f32 %v3261_v62, %v3118_v53 }
 0x145   :  { %v601_v22 = vadd.f32 %v598_v60, %v585_v12  ;;  %v602_v8 = vadd.f32 %v599_v55, %v586_v5  ;;  %v454_v12 = vadd.f32 %v453_v13, %v444_v18  ;;  %v523_v5 = vadd.f32 %v520_v58, %v3016_v45  ;;  %v3328_v33 = vpop.permute.xlu0 %476 }
 0x146   :  { %v483_v13 = vmul.f32 %v3287_v52, %v3328_v33  ;;  %v600_v62 = vmul.f32 %v3287_v52, %v3171_v27 }
 0x147   :  { %v617_v46 = vadd.f32 %v614_v26, %v601_v22  ;;  %v618_v57 = vadd.f32 %v615_v17, %v602_v8  ;;  %v473_v22 = vmul.f32 %v3277_v24, %v3301_v38  ;;  %v464_v8 = vadd.f32 %v463_v15, %v454_v12  ;;  %v4231_v26 = vld [vmem:[#allocation73_spill] sm:$0xff] }
 0x148   :  { %v539_v18 = vadd.f32 %v536_v9, %v523_v5  ;;  %v568_v5 = vmul.f32 %v3267_v44, %v3169_v61 }
 0x149   :  { %v633_v60 = vadd.f32 %v630_v54, %v617_v46  ;;  %v634_v55 = vadd.f32 %v631_v3, %v618_v57  ;;  %v474_v40 = vadd.f32 %v473_v22, %v464_v8  ;;  %v3337_v3 = vpop.permute.xlu1 %496  ;;  %v493_v54 = vmul.f32 %v3295_v11, %v3323_v47 }
 0x14a   :  { %v555_v12 = vadd.f32 %v552_v20, %v539_v18  ;;  %v632_v18 = vmul.f32 %v502_v7, %v3224_v2 }
 0x14b   :  { %v636_v17 = vadd.f32 %v633_v60, %v4231_v26  ;;  %v643_v29 = vadd.f32 %v634_v55, %v4232_v28  ;;  %v484_v57 = vadd.f32 %v483_v13, %v474_v40  ;;  %v503_v28 = vmul.f32 %v502_v7, %v3337_v3 }
 0x14c   :  { %v584_v40 = vmul.f32 %v3277_v24, %v3180_v23  ;;  %v616_v13 = vmul.f32 %v3295_v11, %v3219_v49 }
 0x14d   :  { %v1932_v58 = vmul.f32 -1.442695, %v636_v17  ;;  %v1933_v46 = vmul.f32 -1.442695, %v643_v29  ;;  %v494_v15 = vadd.f32 %v493_v54, %v484_v57  ;;  %v571_v29 = vadd.f32 %v568_v5, %v555_v12 }
 0x14f   :  { %2018 = vpow2.f32 %v1932_v58  ;;  %v504_v60 = vadd.f32 %v503_v28, %v494_v15  ;;  %v587_v22 = vadd.f32 %v584_v40, %v571_v29 }
 0x150   :  { %2020 = vpow2.f32 %v1933_v46 }
 0x151   :  { %505 = vst [vmem:[#allocation2] sm:$0xff] %v504_v60  ;;  %v603_v17 = vadd.f32 %v600_v62, %v587_v22 }
 0x153   :  { %v619_v44 = vadd.f32 %v616_v13, %v603_v17 }
 0x155   :  { %v635_v58 = vadd.f32 %v632_v18, %v619_v44 }
 0x159   :  { %v2019_v55 = vpop.eup %2018 }
 0x15a   :  { %v2021_v8 = vpop.eup %2020  ;;  %v640_v9 = vadd.f32 1.0, %v2019_v55 }
 0x15b   :  { %v647_v26 = vadd.f32 1.0, %v2021_v8 }
 0x15c   :  { %2022 = vrcp.f32 %v640_v9 }
 0x15d   :  { %2024 = vrcp.f32 %v647_v26 }
 0x166   :  { %v2023_v46 = vpop.eup %2022 }
 0x167   :  { %v2025_v24 = vpop.eup %2024  ;;  %v650_v57 = vmul.f32 %v2023_v46, %v635_v58 }
 0x168   :  { %v655_v54 = vmul.f32 %v2025_v24, %v3251_v25  ;;  %v653_v52 = vsub.f32 1.0, %v2025_v24 }
 0x169   :  { %v651_v20 = vadd.f32 %v650_v57, %v3234_v10 }
 0x16b   :  { %2026 = vtanh.f32 %v651_v20 }
 0x175   :  { %v2027_v15 = vpop.eup %2026 }
 0x176   :  { %v654_v28 = vmul.f32 %v2027_v15, %v653_v52 }
 0x178   :  { %v3355_v12 = vadd.f32 %v655_v54, %v654_v28  ;;  %v4233_v28 = vld [vmem:[#allocation84_spill] sm:$0xff] }
 0x17a   :  { %v660_v11 = vrot.slane %v3355_v12, %v4206_v30  ;;  %v666_v7 = vrot.slane %v3355_v12, %v4207_v51  ;;  %v672_v60 = vrot.slane %v3355_v12, %v4208_v16  ;;  %v3367_v10 = vrot.slane %v3355_v12, %v4210_v37 }
 0x17b   :  { %v684_v8 = vrot.slane %v3355_v12, %v4214_v34  ;;  %v690_v13 = vrot.slane %v3355_v12, %v4217_v35  ;;  %v696_v24 = vrot.slane %v3355_v12, %v4219_v1  ;;  %v702_v15 = vrot.slane %v3355_v12, %v4222_v48 }
 0x17c   :  { %v719_v5 = vmul.f32 %v660_v11, %v4209_v59  ;;  %v720_v25 = vmul.f32 %v660_v11, %v2821_v0  ;;  %v735_v55 = vmul.f32 %v666_v7, %v4212_v32  ;;  %v736_v22 = vmul.f32 %v666_v7, %v2936_v42 }
 0x17d   :  { %v751_v26 = vmul.f32 %v672_v60, %v4215_v41  ;;  %v752_v17 = vmul.f32 %v672_v60, %v3079_v39  ;;  %v767_v58 = vmul.f32 %v3367_v10, %v4218_v31  ;;  %v768_v46 = vmul.f32 %v3367_v10, %v2996_v50 }
 0x17e   :  { %v722_v29 = vadd.f32 %v719_v5, %v4211_v19  ;;  %v723_v40 = vadd.f32 %v720_v25, %v2897_v43  ;;  %v783_v20 = vmul.f32 %v684_v8, %v4220_v36  ;;  %v784_v52 = vmul.f32 %v684_v8, %v4221_v21 }
 0x17f   :  { %v661_v5 = vmul.f32 %v660_v11, %v4233_v28  ;;  %v815_v21 = vmul.f32 %v696_v24, %v4227_v6  ;;  %v816_v48 = vmul.f32 %v696_v24, %v4228_v14  ;;  %v4238_v28 = vld [vmem:[#allocation85_spill] sm:$0xff] }
 0x180   :  { %v738_v9 = vadd.f32 %v735_v55, %v722_v29  ;;  %v739_v62 = vadd.f32 %v736_v22, %v723_v40  ;;  %v4234_v40 = vld [vmem:[#allocation51_spill] sm:$0xff]  ;;  %v4235_v22 = vld [vmem:[#allocation66_spill] sm:$0xff] }
 0x181   :  { %v799_v55 = vmul.f32 %v690_v13, %v4234_v40 }
 0x182   :  { %v754_v44 = vadd.f32 %v751_v26, %v738_v9  ;;  %v755_v18 = vadd.f32 %v752_v17, %v739_v62  ;;  %v800_v9 = vmul.f32 %v690_v13, %v4235_v22  ;;  %v4236_v62 = vld [vmem:[#allocation13_spill] sm:$0xff]  ;;  %v4237_v17 = vld [vmem:[#allocation82_spill] sm:$0xff]  ;;  %v4240_v22 = vld [vmem:[#allocation96_spill] sm:$0xff] }
 0x183   :  { %v721_v26 = vmul.f32 %v660_v11, %v4236_v62  ;;  %v832_v1 = vmul.f32 %v702_v15, %v4240_v22  ;;  %v679_v11 = vmul.f32 %v3367_v10, %v3273_v63  ;;  %v691_v22 = vmul.f32 %v690_v13, %v3328_v33 }
 0x184   :  { %v770_v57 = vadd.f32 %v767_v58, %v754_v44  ;;  %v771_v54 = vadd.f32 %v768_v46, %v755_v18  ;;  %v667_v44 = vmul.f32 %v666_v7, %v4237_v17  ;;  %v662_v18 = vadd.f32 %v661_v5, %v3249_v56 }
 0x185   :  { %v724_v5 = vadd.f32 %v721_v26, %v3016_v45  ;;  %v697_v26 = vmul.f32 %v696_v24, %v3323_v47 }
 0x186   :  { %v786_v25 = vadd.f32 %v783_v20, %v770_v57  ;;  %v787_v29 = vadd.f32 %v784_v52, %v771_v54  ;;  %v668_v36 = vadd.f32 %v667_v44, %v662_v18  ;;  %v673_v57 = vmul.f32 %v672_v60, %v4238_v28  ;;  %v4239_v52 = vld [vmem:[#allocation86_spill] sm:$0xff] }
 0x187   :  { %v831_v40 = vmul.f32 %v702_v15, %v4239_v52  ;;  %v737_v44 = vmul.f32 %v666_v7, %v3132_v4  ;;  %v4241_v18 = vld [vmem:[#allocation74_spill] sm:$0xff]  ;;  %v703_v7 = vmul.f32 %v702_v15, %v3337_v3 }
 0x188   :  { %v802_v58 = vadd.f32 %v799_v55, %v786_v25  ;;  %v803_v46 = vadd.f32 %v800_v9, %v787_v29  ;;  %v674_v17 = vadd.f32 %v673_v57, %v668_v36  ;;  %v685_v55 = vmul.f32 %v684_v8, %v3301_v38 }
 0x189   :  { %v740_v52 = vadd.f32 %v737_v44, %v724_v5 }
 0x18a   :  { %v818_v54 = vadd.f32 %v815_v21, %v802_v58  ;;  %v819_v20 = vadd.f32 %v816_v48, %v803_v46  ;;  %v680_v9 = vadd.f32 %v679_v11, %v674_v17  ;;  %v4242_v48 = vld [vmem:[#allocation88_spill] sm:$0xff]  ;;  %v785_v11 = vmul.f32 %v684_v8, %v3180_v23 }
 0x18c   :  { %v834_v25 = vadd.f32 %v831_v40, %v818_v54  ;;  %v835_v29 = vadd.f32 %v832_v1, %v819_v20  ;;  %v686_v46 = vadd.f32 %v685_v55, %v680_v9  ;;  %v753_v1 = vmul.f32 %v672_v60, %v3118_v53 }
 0x18d   :  { %v769_v54 = vmul.f32 %v3367_v10, %v3169_v61  ;;  %v801_v60 = vmul.f32 %v690_v13, %v3171_v27  ;;  %v833_v9 = vmul.f32 %v702_v15, %v3224_v2 }
 0x18e   :  { %v837_v21 = vadd.f32 %v834_v25, %v4241_v18  ;;  %v844_v58 = vadd.f32 %v835_v29, %v4242_v48  ;;  %v692_v36 = vadd.f32 %v691_v22, %v686_v46  ;;  %v756_v17 = vadd.f32 %v753_v1, %v740_v52  ;;  %v4243_v48 = vld [vmem:[#allocation22_spill] sm:$0xff] }
 0x18f   :  { %v817_v52 = vmul.f32 %v696_v24, %v3219_v49 }
 0x190   :  { %v1935_v28 = vmul.f32 -1.442695, %v837_v21  ;;  %v1936_v63 = vmul.f32 -1.442695, %v844_v58  ;;  %v698_v40 = vadd.f32 %v697_v26, %v692_v36  ;;  %v772_v20 = vadd.f32 %v769_v54, %v756_v17 }
 0x192   :  { %2028 = vpow2.f32 %v1935_v28  ;;  %v704_v57 = vadd.f32 %v703_v7, %v698_v40  ;;  %v788_v22 = vadd.f32 %v785_v11, %v772_v20 }
 0x193   :  { %2030 = vpow2.f32 %v1936_v63 }
 0x194   :  { %706 = vst [vmem:[#allocation2 + $0x8] sm:$0xff] %v704_v57  ;;  %v804_v63 = vadd.f32 %v801_v60, %v788_v22 }
 0x196   :  { %v820_v55 = vadd.f32 %v817_v52, %v804_v63 }
 0x198   :  { %v836_v10 = vadd.f32 %v833_v9, %v820_v55  ;;  %v4244_v9 = vld [vmem:[#allocation53_spill] sm:$0xff] }
 0x19c   :  { %v2029_v5 = vpop.eup %2028 }
 0x19d   :  { %v2031_v25 = vpop.eup %2030  ;;  %v841_v29 = vadd.f32 1.0, %v2029_v5 }
 0x19e   :  { %v848_v28 = vadd.f32 1.0, %v2031_v25 }
 0x19f   :  { %2032 = vrcp.f32 %v841_v29 }
 0x1a0   :  { %2034 = vrcp.f32 %v848_v28 }
 0x1a9   :  { %v2033_v44 = vpop.eup %2032 }
 0x1aa   :  { %v2035_v18 = vpop.eup %2034  ;;  %v851_v21 = vmul.f32 %v2033_v44, %v836_v10 }
 0x1ab   :  { %v856_v8 = vmul.f32 %v2035_v18, %v3355_v12  ;;  %v854_v46 = vsub.f32 1.0, %v2035_v18 }
 0x1ac   :  { %v852_v58 = vadd.f32 %v851_v21, %v4243_v48  ;;  %v4245_v21 = vld [vmem:[#allocation71_spill] sm:$0xff] }
 0x1ad   :  { %v4246_v48 = vld [vmem:[#allocation31_spill] sm:$0xff] }
 0x1ae   :  { %2036 = vtanh.f32 %v852_v58 }
 0x1b8   :  { %v2037_v13 = vpop.eup %2036 }
 0x1b9   :  { %v855_v36 = vmul.f32 %v2037_v13, %v854_v46  ;;  %v4247_v46 = vld [vmem:[#allocation47_spill] sm:$0xff] }
 0x1bb   :  { %v3419_v26 = vadd.f32 %v856_v8, %v855_v36  ;;  %v4248_v36 = vld [vmem:[#allocation84_spill] sm:$0xff] }
 0x1bd   :  { %v861_v24 = vrot.slane %v3419_v26, %v4206_v30  ;;  %v867_v15 = vrot.slane %v3419_v26, %v4207_v51  ;;  %v873_v1 = vrot.slane %v3419_v26, %v4208_v16  ;;  %v3431_v7 = vrot.slane %v3419_v26, %v4210_v37 }
 0x1be   :  { %v885_v11 = vrot.slane %v3419_v26, %v4214_v34  ;;  %v891_v60 = vrot.slane %v3419_v26, %v4217_v35  ;;  %v897_v10 = vrot.slane %v3419_v26, %v4244_v9  ;;  %v903_v13 = vrot.slane %v3419_v26, %v4247_v46 }
 0x1bf   :  { %v920_v40 = vmul.f32 %v861_v24, %v4209_v59  ;;  %v921_v12 = vmul.f32 %v861_v24, %v2821_v0  ;;  %v936_v54 = vmul.f32 %v867_v15, %v4212_v32  ;;  %v937_v20 = vmul.f32 %v867_v15, %v2936_v42 }
 0x1c0   :  { %v952_v25 = vmul.f32 %v873_v1, %v4215_v41  ;;  %v953_v29 = vmul.f32 %v873_v1, %v3079_v39  ;;  %v968_v52 = vmul.f32 %v3431_v7, %v4218_v31  ;;  %v969_v55 = vmul.f32 %v3431_v7, %v2996_v50 }
 0x1c1   :  { %v923_v17 = vadd.f32 %v920_v40, %v4211_v19  ;;  %v924_v57 = vadd.f32 %v921_v12, %v2897_v43  ;;  %v984_v8 = vmul.f32 %v885_v11, %v4245_v21  ;;  %v985_v58 = vmul.f32 %v885_v11, %v4246_v48 }
 0x1c2   :  { %v862_v40 = vmul.f32 %v861_v24, %v4248_v36  ;;  %v1017_v46 = vmul.f32 %v897_v10, %v4228_v14  ;;  %v4252_v36 = vld [vmem:[#allocation85_spill] sm:$0xff] }
 0x1c3   :  { %v939_v5 = vadd.f32 %v936_v54, %v923_v17  ;;  %v940_v22 = vadd.f32 %v937_v20, %v924_v57  ;;  %v4249_v57 = vld [vmem:[#allocation51_spill] sm:$0xff]  ;;  %v4250_v20 = vld [vmem:[#allocation66_spill] sm:$0xff] }
 0x1c4   :  { %v1000_v54 = vmul.f32 %v891_v60, %v4249_v57 }
 0x1c5   :  { %v955_v28 = vadd.f32 %v952_v25, %v939_v5  ;;  %v956_v63 = vadd.f32 %v953_v29, %v940_v22  ;;  %v1001_v5 = vmul.f32 %v891_v60, %v4250_v20  ;;  %v922_v22 = vmul.f32 %v861_v24, %v4236_v62  ;;  %v4251_v25 = vld [vmem:[#allocation82_spill] sm:$0xff]  ;;  %v4254_v20 = vld [vmem:[#allocation96_spill] sm:$0xff]  ;;  %v4255_v24 = vld [vmem:[#allocation83_spill] sm:$0xff] }
 0x1c6   :  { %v868_v29 = vmul.f32 %v867_v15, %v4251_v25  ;;  %v1033_v21 = vmul.f32 %v903_v13, %v4254_v20  ;;  %v880_v25 = vmul.f32 %v3431_v7, %v4255_v24  ;;  %v892_v20 = vmul.f32 %v891_v60, %v3328_v33 }
 0x1c7   :  { %v971_v44 = vadd.f32 %v968_v52, %v955_v28  ;;  %v972_v18 = vadd.f32 %v969_v55, %v956_v63  ;;  %v863_v28 = vadd.f32 %v862_v40, %v3249_v56  ;;  %v1016_v55 = vmul.f32 %v897_v10, %v4227_v6 }
 0x1c8   :  { %v925_v40 = vadd.f32 %v922_v22, %v3016_v45  ;;  %v898_v22 = vmul.f32 %v897_v10, %v3323_v47 }
 0x1c9   :  { %v987_v12 = vadd.f32 %v984_v8, %v971_v44  ;;  %v988_v17 = vadd.f32 %v985_v58, %v972_v18  ;;  %v869_v48 = vadd.f32 %v868_v29, %v863_v28  ;;  %v874_v44 = vmul.f32 %v873_v1, %v4252_v36  ;;  %v4253_v58 = vld [vmem:[#allocation86_spill] sm:$0xff]  ;;  %v4256_v28 = vld [vmem:[#allocation87_spill] sm:$0xff] }
 0x1ca   :  { %v1032_v57 = vmul.f32 %v903_v13, %v4253_v58  ;;  %v938_v29 = vmul.f32 %v867_v15, %v3132_v4  ;;  %v904_v15 = vmul.f32 %v903_v13, %v3337_v3 }
 0x1cb   :  { %v1003_v63 = vadd.f32 %v1000_v54, %v987_v12  ;;  %v1004_v52 = vadd.f32 %v1001_v5, %v988_v17  ;;  %v875_v62 = vadd.f32 %v874_v44, %v869_v48  ;;  %v886_v54 = vmul.f32 %v885_v11, %v3301_v38 }
 0x1cc   :  { %v941_v58 = vadd.f32 %v938_v29, %v925_v40  ;;  %v970_v44 = vmul.f32 %v3431_v7, %v3169_v61 }
 0x1cd   :  { %v1019_v18 = vadd.f32 %v1016_v55, %v1003_v63  ;;  %v1020_v8 = vadd.f32 %v1017_v46, %v1004_v52  ;;  %v881_v5 = vadd.f32 %v880_v25, %v875_v62  ;;  %v4257_v46 = vld [vmem:[#allocation72_spill] sm:$0xff] }
 0x1cf   :  { %v1035_v12 = vadd.f32 %v1032_v57, %v1019_v18  ;;  %v1036_v17 = vadd.f32 %v1033_v21, %v1020_v8  ;;  %v887_v55 = vadd.f32 %v886_v54, %v881_v5  ;;  %v954_v21 = vmul.f32 %v873_v1, %v3118_v53 }
 0x1d0   :  { %v986_v8 = vmul.f32 %v885_v11, %v3180_v23  ;;  %v1002_v1 = vmul.f32 %v891_v60, %v3171_v27  ;;  %v1034_v5 = vmul.f32 %v903_v13, %v3224_v2 }
 0x1d1   :  { %v1038_v63 = vadd.f32 %v1035_v12, %v4256_v28  ;;  %v1045_v52 = vadd.f32 %v1036_v17, %v4257_v46  ;;  %v893_v48 = vadd.f32 %v892_v20, %v887_v55  ;;  %v957_v57 = vadd.f32 %v954_v21, %v941_v58  ;;  %v4258_v46 = vld [vmem:[#allocation41_spill] sm:$0xff] }
 0x1d2   :  { %v1018_v58 = vmul.f32 %v897_v10, %v3219_v49 }
 0x1d3   :  { %v1938_v36 = vmul.f32 -1.442695, %v1038_v63  ;;  %v1939_v24 = vmul.f32 -1.442695, %v1045_v52  ;;  %v899_v62 = vadd.f32 %v898_v22, %v893_v48  ;;  %v973_v18 = vadd.f32 %v970_v44, %v957_v57 }
 0x1d5   :  { %2038 = vpow2.f32 %v1938_v36  ;;  %v905_v25 = vadd.f32 %v904_v15, %v899_v62  ;;  %v989_v20 = vadd.f32 %v986_v8, %v973_v18 }
 0x1d6   :  { %2040 = vpow2.f32 %v1939_v24 }
 0x1d7   :  { %907 = vst [vmem:[#allocation2 + $0x10] sm:$0xff] %v905_v25  ;;  %v1005_v24 = vadd.f32 %v1002_v1, %v989_v20 }
 0x1d9   :  { %v1021_v54 = vadd.f32 %v1018_v58, %v1005_v24 }
 0x1db   :  { %v1037_v7 = vadd.f32 %v1034_v5, %v1021_v54 }
 0x1df   :  { %v2039_v40 = vpop.eup %2038 }
 0x1e0   :  { %v2041_v12 = vpop.eup %2040  ;;  %v1042_v17 = vadd.f32 1.0, %v2039_v40 }
 0x1e1   :  { %v1049_v36 = vadd.f32 1.0, %v2041_v12 }
 0x1e2   :  { %2042 = vrcp.f32 %v1042_v17 }
 0x1e3   :  { %2044 = vrcp.f32 %v1049_v36 }
 0x1ec   :  { %v2043_v29 = vpop.eup %2042 }
 0x1ed   :  { %v2045_v28 = vpop.eup %2044  ;;  %v1052_v63 = vmul.f32 %v2043_v29, %v1037_v7 }
 0x1ee   :  { %v1057_v11 = vmul.f32 %v2045_v28, %v3419_v26  ;;  %v1055_v55 = vsub.f32 1.0, %v2045_v28  ;;  %v4259_v28 = vld [vmem:[#allocation71_spill] sm:$0xff] }
 0x1ef   :  { %v1053_v52 = vadd.f32 %v1052_v63, %v4258_v46 }
 0x1f1   :  { %2046 = vtanh.f32 %v1053_v52  ;;  %v4261_v52 = vld [vmem:[#allocation47_spill] sm:$0xff] }
 0x1fb   :  { %v2047_v60 = vpop.eup %2046 }
 0x1fc   :  { %v1056_v48 = vmul.f32 %v2047_v60, %v1055_v55  ;;  %v4262_v60 = vld [vmem:[#allocation84_spill] sm:$0xff] }
 0x1fe   :  { %v3483_v22 = vadd.f32 %v1057_v11, %v1056_v48  ;;  %v4260_v11 = vld [vmem:[#allocation31_spill] sm:$0xff] }
 0x200   :  { %v1062_v10 = vrot.slane %v3483_v22, %v4206_v30  ;;  %v1068_v13 = vrot.slane %v3483_v22, %v4207_v51  ;;  %v1074_v21 = vrot.slane %v3483_v22, %v4208_v16  ;;  %v3495_v15 = vrot.slane %v3483_v22, %v4210_v37 }
 0x201   :  { %v1086_v8 = vrot.slane %v3483_v22, %v4214_v34  ;;  %v1092_v1 = vrot.slane %v3483_v22, %v4217_v35  ;;  %v1098_v5 = vrot.slane %v3483_v22, %v4244_v9  ;;  %v1104_v55 = vrot.slane %v3483_v22, %v4261_v52 }
 0x202   :  { %v1121_v62 = vmul.f32 %v1062_v10, %v4209_v59  ;;  %v1122_v26 = vmul.f32 %v1062_v10, %v2821_v0  ;;  %v1137_v44 = vmul.f32 %v1068_v13, %v4212_v32  ;;  %v1138_v18 = vmul.f32 %v1068_v13, %v2936_v42 }
 0x203   :  { %v1153_v12 = vmul.f32 %v1074_v21, %v4215_v41  ;;  %v1154_v17 = vmul.f32 %v1074_v21, %v3079_v39  ;;  %v1169_v58 = vmul.f32 %v3495_v15, %v4218_v31  ;;  %v1170_v54 = vmul.f32 %v3495_v15, %v2996_v50 }
 0x204   :  { %v1124_v57 = vadd.f32 %v1121_v62, %v4211_v19  ;;  %v1125_v25 = vadd.f32 %v1122_v26, %v2897_v43  ;;  %v1185_v63 = vmul.f32 %v1086_v8, %v4259_v28  ;;  %v1186_v46 = vmul.f32 %v1086_v8, %v4260_v11 }
 0x205   :  { %v1063_v48 = vmul.f32 %v1062_v10, %v4262_v60  ;;  %v1218_v52 = vmul.f32 %v1098_v5, %v4228_v14  ;;  %v4267_v60 = vld [vmem:[#allocation85_spill] sm:$0xff] }
 0x206   :  { %v1140_v40 = vadd.f32 %v1137_v44, %v1124_v57  ;;  %v1141_v20 = vadd.f32 %v1138_v18, %v1125_v25  ;;  %v4263_v57 = vld [vmem:[#allocation51_spill] sm:$0xff]  ;;  %v4264_v44 = vld [vmem:[#allocation66_spill] sm:$0xff] }
 0x207   :  { %v1201_v25 = vmul.f32 %v1092_v1, %v4263_v57  ;;  %v1202_v18 = vmul.f32 %v1092_v1, %v4264_v44  ;;  %v4269_v44 = vld [vmem:[#allocation96_spill] sm:$0xff] }
 0x208   :  { %v1156_v36 = vadd.f32 %v1153_v12, %v1140_v40  ;;  %v1157_v24 = vadd.f32 %v1154_v17, %v1141_v20  ;;  %v4265_v40 = vld [vmem:[#allocation13_spill] sm:$0xff]  ;;  %v4266_v12 = vld [vmem:[#allocation82_spill] sm:$0xff]  ;;  %v1234_v28 = vmul.f32 %v1104_v55, %v4269_v44  ;;  %v1093_v44 = vmul.f32 %v1092_v1, %v3328_v33 }
 0x209   :  { %v1123_v20 = vmul.f32 %v1062_v10, %v4265_v40  ;;  %v1069_v17 = vmul.f32 %v1068_v13, %v4266_v12  ;;  %v4270_v10 = vld [vmem:[#allocation83_spill] sm:$0xff] }
 0x20a   :  { %v1172_v7 = vadd.f32 %v1169_v58, %v1156_v36  ;;  %v1173_v29 = vadd.f32 %v1170_v54, %v1157_v24  ;;  %v1064_v36 = vadd.f32 %v1063_v48, %v3249_v56  ;;  %v1217_v54 = vmul.f32 %v1098_v5, %v4227_v6 }
 0x20b   :  { %v1081_v12 = vmul.f32 %v3495_v15, %v4270_v10  ;;  %v1126_v48 = vadd.f32 %v1123_v20, %v3016_v45  ;;  %v1099_v20 = vmul.f32 %v1098_v5, %v3323_v47 }
 0x20c   :  { %v1188_v62 = vadd.f32 %v1185_v63, %v1172_v7  ;;  %v1189_v26 = vadd.f32 %v1186_v46, %v1173_v29  ;;  %v1070_v11 = vadd.f32 %v1069_v17, %v1064_v36  ;;  %v1075_v7 = vmul.f32 %v1074_v21, %v4267_v60  ;;  %v4268_v46 = vld [vmem:[#allocation86_spill] sm:$0xff]  ;;  %v4271_v36 = vld [vmem:[#allocation89_spill] sm:$0xff] }
 0x20d   :  { %v1233_v57 = vmul.f32 %v1104_v55, %v4268_v46  ;;  %v1139_v17 = vmul.f32 %v1068_v13, %v3132_v4  ;;  %v1105_v13 = vmul.f32 %v1104_v55, %v3337_v3 }
 0x20e   :  { %v1204_v24 = vadd.f32 %v1201_v25, %v1188_v62  ;;  %v1205_v58 = vadd.f32 %v1202_v18, %v1189_v26  ;;  %v1076_v40 = vadd.f32 %v1075_v7, %v1070_v11  ;;  %v1087_v25 = vmul.f32 %v1086_v8, %v3301_v38 }
 0x20f   :  { %v1142_v46 = vadd.f32 %v1139_v17, %v1126_v48  ;;  %v1171_v7 = vmul.f32 %v3495_v15, %v3169_v61 }
 0x210   :  { %v1220_v29 = vadd.f32 %v1217_v54, %v1204_v24  ;;  %v1221_v63 = vadd.f32 %v1218_v52, %v1205_v58  ;;  %v1082_v18 = vadd.f32 %v1081_v12, %v1076_v40  ;;  %v4272_v52 = vld [vmem:[#allocation78_spill] sm:$0xff] }
 0x212   :  { %v1236_v62 = vadd.f32 %v1233_v57, %v1220_v29  ;;  %v1237_v26 = vadd.f32 %v1234_v28, %v1221_v63  ;;  %v1088_v54 = vadd.f32 %v1087_v25, %v1082_v18  ;;  %v1155_v28 = vmul.f32 %v1074_v21, %v3118_v53 }
 0x213   :  { %v1187_v63 = vmul.f32 %v1086_v8, %v3180_v23  ;;  %v1203_v21 = vmul.f32 %v1092_v1, %v3171_v27  ;;  %v1235_v18 = vmul.f32 %v1104_v55, %v3224_v2 }
 0x214   :  { %v1239_v24 = vadd.f32 %v1236_v62, %v4271_v36  ;;  %v1246_v58 = vadd.f32 %v1237_v26, %v4272_v52  ;;  %v1094_v11 = vadd.f32 %v1093_v44, %v1088_v54  ;;  %v1158_v40 = vadd.f32 %v1155_v28, %v1142_v46  ;;  %v4273_v52 = vld [vmem:[#allocation32_spill] sm:$0xff] }
 0x215   :  { %v1219_v46 = vmul.f32 %v1098_v5, %v3219_v49 }
 0x216   :  { %v1941_v60 = vmul.f32 -1.442695, %v1239_v24  ;;  %v1942_v10 = vmul.f32 -1.442695, %v1246_v58  ;;  %v1100_v57 = vadd.f32 %v1099_v20, %v1094_v11  ;;  %v1174_v29 = vadd.f32 %v1171_v7, %v1158_v40 }
 0x218   :  { %2048 = vpow2.f32 %v1941_v60  ;;  %v1106_v12 = vadd.f32 %v1105_v13, %v1100_v57  ;;  %v1190_v44 = vadd.f32 %v1187_v63, %v1174_v29 }
 0x219   :  { %2050 = vpow2.f32 %v1942_v10 }
 0x21a   :  { %1108 = vst [vmem:[#allocation2 + $0x18] sm:$0xff] %v1106_v12  ;;  %v1206_v10 = vadd.f32 %v1203_v21, %v1190_v44 }
 0x21c   :  { %v1222_v25 = vadd.f32 %v1219_v46, %v1206_v10 }
 0x21e   :  { %v1238_v15 = vadd.f32 %v1235_v18, %v1222_v25 }
 0x222   :  { %v2049_v48 = vpop.eup %2048 }
 0x223   :  { %v2051_v62 = vpop.eup %2050  ;;  %v1243_v26 = vadd.f32 1.0, %v2049_v48 }
 0x224   :  { %v1250_v60 = vadd.f32 1.0, %v2051_v62 }
 0x225   :  { %2052 = vrcp.f32 %v1243_v26 }
 0x226   :  { %2054 = vrcp.f32 %v1250_v60 }
 0x22f   :  { %v2053_v17 = vpop.eup %2052 }
 0x230   :  { %v2055_v36 = vpop.eup %2054  ;;  %v1253_v24 = vmul.f32 %v2053_v17, %v1238_v15 }
 0x231   :  { %v1258_v8 = vmul.f32 %v2055_v36, %v3483_v22  ;;  %v1256_v54 = vsub.f32 1.0, %v2055_v36  ;;  %v4274_v36 = vld [vmem:[#allocation71_spill] sm:$0xff] }
 0x232   :  { %v1254_v58 = vadd.f32 %v1253_v24, %v4273_v52 }
 0x234   :  { %2056 = vtanh.f32 %v1254_v58  ;;  %v4276_v58 = vld [vmem:[#allocation47_spill] sm:$0xff] }
 0x23e   :  { %v2057_v1 = vpop.eup %2056 }
 0x23f   :  { %v1257_v11 = vmul.f32 %v2057_v1, %v1256_v54  ;;  %v4277_v1 = vld [vmem:[#allocation84_spill] sm:$0xff] }
 0x241   :  { %v3547_v20 = vadd.f32 %v1258_v8, %v1257_v11  ;;  %v4275_v8 = vld [vmem:[#allocation31_spill] sm:$0xff] }
 0x243   :  { %v1263_v5 = vrot.slane %v3547_v20, %v4206_v30  ;;  %v1269_v55 = vrot.slane %v3547_v20, %v4207_v51  ;;  %v1275_v28 = vrot.slane %v3547_v20, %v4208_v16  ;;  %v3559_v13 = vrot.slane %v3547_v20, %v4210_v37 }
 0x244   :  { %v1287_v63 = vrot.slane %v3547_v20, %v4214_v34  ;;  %v1293_v21 = vrot.slane %v3547_v20, %v4217_v35  ;;  %v1299_v18 = vrot.slane %v3547_v20, %v4244_v9  ;;  %v1305_v54 = vrot.slane %v3547_v20, %v4276_v58 }
 0x245   :  { %v1322_v57 = vmul.f32 %v1263_v5, %v4209_v59  ;;  %v1323_v22 = vmul.f32 %v1263_v5, %v2821_v0  ;;  %v1338_v7 = vmul.f32 %v1269_v55, %v4212_v32  ;;  %v1339_v29 = vmul.f32 %v1269_v55, %v2936_v42 }
 0x246   :  { %v1354_v62 = vmul.f32 %v1275_v28, %v4215_v41  ;;  %v1355_v26 = vmul.f32 %v1275_v28, %v3079_v39  ;;  %v1370_v46 = vmul.f32 %v3559_v13, %v4218_v31  ;;  %v1371_v25 = vmul.f32 %v3559_v13, %v2996_v50 }
 0x247   :  { %v1325_v40 = vadd.f32 %v1322_v57, %v4211_v19  ;;  %v1326_v12 = vadd.f32 %v1323_v22, %v2897_v43  ;;  %v1386_v24 = vmul.f32 %v1287_v63, %v4274_v36  ;;  %v1387_v52 = vmul.f32 %v1287_v63, %v4275_v8 }
 0x248   :  { %v1264_v11 = vmul.f32 %v1263_v5, %v4277_v1  ;;  %v1419_v58 = vmul.f32 %v1299_v18, %v4228_v14  ;;  %v4282_v1 = vld [vmem:[#allocation85_spill] sm:$0xff] }
 0x249   :  { %v1341_v48 = vadd.f32 %v1338_v7, %v1325_v40  ;;  %v1342_v44 = vadd.f32 %v1339_v29, %v1326_v12  ;;  %v4278_v40 = vld [vmem:[#allocation51_spill] sm:$0xff]  ;;  %v4279_v7 = vld [vmem:[#allocation66_spill] sm:$0xff] }
 0x24a   :  { %v1402_v12 = vmul.f32 %v1293_v21, %v4278_v40  ;;  %v1403_v29 = vmul.f32 %v1293_v21, %v4279_v7  ;;  %v4284_v7 = vld [vmem:[#allocation96_spill] sm:$0xff] }
 0x24b   :  { %v1357_v60 = vadd.f32 %v1354_v62, %v1341_v48  ;;  %v1358_v10 = vadd.f32 %v1355_v26, %v1342_v44  ;;  %v4280_v48 = vld [vmem:[#allocation13_spill] sm:$0xff]  ;;  %v4281_v62 = vld [vmem:[#allocation82_spill] sm:$0xff]  ;;  %v1435_v36 = vmul.f32 %v1305_v54, %v4284_v7  ;;  %v1294_v7 = vmul.f32 %v1293_v21, %v3328_v33 }
 0x24c   :  { %v1324_v44 = vmul.f32 %v1263_v5, %v4280_v48  ;;  %v1270_v26 = vmul.f32 %v1269_v55, %v4281_v62  ;;  %v4285_v5 = vld [vmem:[#allocation83_spill] sm:$0xff] }
 0x24d   :  { %v1373_v15 = vadd.f32 %v1370_v46, %v1357_v60  ;;  %v1374_v17 = vadd.f32 %v1371_v25, %v1358_v10  ;;  %v1265_v60 = vadd.f32 %v1264_v11, %v3249_v56  ;;  %v1418_v25 = vmul.f32 %v1299_v18, %v4227_v6 }
 0x24e   :  { %v1282_v62 = vmul.f32 %v3559_v13, %v4285_v5  ;;  %v1327_v11 = vadd.f32 %v1324_v44, %v3016_v45  ;;  %v1300_v44 = vmul.f32 %v1299_v18, %v3323_v47 }
 0x24f   :  { %v1389_v57 = vadd.f32 %v1386_v24, %v1373_v15  ;;  %v1390_v22 = vadd.f32 %v1387_v52, %v1374_v17  ;;  %v1271_v8 = vadd.f32 %v1270_v26, %v1265_v60  ;;  %v1276_v15 = vmul.f32 %v1275_v28, %v4282_v1  ;;  %v4283_v52 = vld [vmem:[#allocation86_spill] sm:$0xff]  ;;  %v4286_v60 = vld [vmem:[#allocation9_spill] sm:$0xff] }
 0x250   :  { %v1434_v40 = vmul.f32 %v1305_v54, %v4283_v52  ;;  %v1340_v26 = vmul.f32 %v1269_v55, %v3132_v4  ;;  %v1306_v55 = vmul.f32 %v1305_v54, %v3337_v3 }
 0x251   :  { %v1405_v10 = vadd.f32 %v1402_v12, %v1389_v57  ;;  %v1406_v46 = vadd.f32 %v1403_v29, %v1390_v22  ;;  %v1277_v48 = vadd.f32 %v1276_v15, %v1271_v8  ;;  %v1288_v12 = vmul.f32 %v1287_v63, %v3301_v38 }
 0x252   :  { %v1343_v52 = vadd.f32 %v1340_v26, %v1327_v11  ;;  %v1372_v15 = vmul.f32 %v3559_v13, %v3169_v61 }
 0x253   :  { %v1421_v17 = vadd.f32 %v1418_v25, %v1405_v10  ;;  %v1422_v24 = vadd.f32 %v1419_v58, %v1406_v46  ;;  %v1283_v29 = vadd.f32 %v1282_v62, %v1277_v48  ;;  %v4287_v58 = vld [vmem:[#allocation93_spill] sm:$0xff] }
 0x255   :  { %v1437_v57 = vadd.f32 %v1434_v40, %v1421_v17  ;;  %v1438_v22 = vadd.f32 %v1435_v36, %v1422_v24  ;;  %v1289_v25 = vadd.f32 %v1288_v12, %v1283_v29  ;;  %v1356_v36 = vmul.f32 %v1275_v28, %v3118_v53 }
 0x256   :  { %v1388_v24 = vmul.f32 %v1287_v63, %v3180_v23  ;;  %v1404_v28 = vmul.f32 %v1293_v21, %v3171_v27  ;;  %v1436_v29 = vmul.f32 %v1305_v54, %v3224_v2 }
 0x257   :  { %v1440_v10 = vadd.f32 %v1437_v57, %v4286_v60  ;;  %v1447_v46 = vadd.f32 %v1438_v22, %v4287_v58  ;;  %v1295_v8 = vadd.f32 %v1294_v7, %v1289_v25  ;;  %v1359_v48 = vadd.f32 %v1356_v36, %v1343_v52  ;;  %v4288_v58 = vld [vmem:[#allocation79_spill] sm:$0xff] }
 0x258   :  { %v1420_v52 = vmul.f32 %v1299_v18, %v3219_v49 }
 0x259   :  { %v1944_v1 = vmul.f32 -1.442695, %v1440_v10  ;;  %v1945_v5 = vmul.f32 -1.442695, %v1447_v46  ;;  %v1301_v40 = vadd.f32 %v1300_v44, %v1295_v8  ;;  %v1375_v17 = vadd.f32 %v1372_v15, %v1359_v48 }
 0x25b   :  { %2058 = vpow2.f32 %v1944_v1  ;;  %v1307_v62 = vadd.f32 %v1306_v55, %v1301_v40  ;;  %v1391_v7 = vadd.f32 %v1388_v24, %v1375_v17 }
 0x25c   :  { %2060 = vpow2.f32 %v1945_v5 }
 0x25d   :  { %1309 = vst [vmem:[#allocation2 + $0x20] sm:$0xff] %v1307_v62  ;;  %v1407_v5 = vadd.f32 %v1404_v28, %v1391_v7 }
 0x25f   :  { %v1423_v12 = vadd.f32 %v1420_v52, %v1407_v5 }
 0x261   :  { %v1439_v13 = vadd.f32 %v1436_v29, %v1423_v12 }
 0x265   :  { %v2059_v11 = vpop.eup %2058 }
 0x266   :  { %v2061_v57 = vpop.eup %2060  ;;  %v1444_v22 = vadd.f32 1.0, %v2059_v11 }
 0x267   :  { %v1451_v1 = vadd.f32 1.0, %v2061_v57 }
 0x268   :  { %2062 = vrcp.f32 %v1444_v22 }
 0x269   :  { %2064 = vrcp.f32 %v1451_v1 }
 0x272   :  { %v2063_v26 = vpop.eup %2062 }
 0x273   :  { %v2065_v60 = vpop.eup %2064  ;;  %v1454_v10 = vmul.f32 %v2063_v26, %v1439_v13 }
 0x274   :  { %v1459_v63 = vmul.f32 %v2065_v60, %v3547_v20  ;;  %v1457_v25 = vsub.f32 1.0, %v2065_v60  ;;  %v4289_v60 = vld [vmem:[#allocation71_spill] sm:$0xff] }
 0x275   :  { %v1455_v46 = vadd.f32 %v1454_v10, %v4288_v58 }
 0x277   :  { %2066 = vtanh.f32 %v1455_v46  ;;  %v4291_v46 = vld [vmem:[#allocation47_spill] sm:$0xff] }
 0x281   :  { %v2067_v21 = vpop.eup %2066 }
 0x282   :  { %v1458_v8 = vmul.f32 %v2067_v21, %v1457_v25  ;;  %v4292_v21 = vld [vmem:[#allocation84_spill] sm:$0xff] }
 0x284   :  { %v3611_v44 = vadd.f32 %v1459_v63, %v1458_v8  ;;  %v4290_v63 = vld [vmem:[#allocation31_spill] sm:$0xff] }
 0x286   :  { %v1464_v18 = vrot.slane %v3611_v44, %v4206_v30  ;;  %v1470_v54 = vrot.slane %v3611_v44, %v4207_v51  ;;  %v1476_v36 = vrot.slane %v3611_v44, %v4208_v16  ;;  %v3623_v55 = vrot.slane %v3611_v44, %v4210_v37 }
 0x287   :  { %v1488_v24 = vrot.slane %v3611_v44, %v4214_v34  ;;  %v1494_v28 = vrot.slane %v3611_v44, %v4217_v35  ;;  %v1500_v29 = vrot.slane %v3611_v44, %v4244_v9  ;;  %v1506_v25 = vrot.slane %v3611_v44, %v4291_v46 }
 0x288   :  { %v1523_v40 = vmul.f32 %v1464_v18, %v4209_v59  ;;  %v1524_v20 = vmul.f32 %v1464_v18, %v2821_v0  ;;  %v1539_v15 = vmul.f32 %v1470_v54, %v4212_v32  ;;  %v1540_v17 = vmul.f32 %v1470_v54, %v2936_v42 }
 0x289   :  { %v1555_v57 = vmul.f32 %v1476_v36, %v4215_v41  ;;  %v1556_v22 = vmul.f32 %v1476_v36, %v3079_v39  ;;  %v1571_v52 = vmul.f32 %v3623_v55, %v4218_v31  ;;  %v1572_v12 = vmul.f32 %v3623_v55, %v2996_v50 }
 0x28a   :  { %v1526_v48 = vadd.f32 %v1523_v40, %v4211_v19  ;;  %v1527_v62 = vadd.f32 %v1524_v20, %v2897_v43  ;;  %v1587_v10 = vmul.f32 %v1488_v24, %v4289_v60  ;;  %v1588_v58 = vmul.f32 %v1488_v24, %v4290_v63 }
 0x28b   :  { %v1465_v8 = vmul.f32 %v1464_v18, %v4292_v21  ;;  %v1620_v46 = vmul.f32 %v1500_v29, %v4228_v14  ;;  %v4297_v21 = vld [vmem:[#allocation85_spill] sm:$0xff] }
 0x28c   :  { %v1542_v11 = vadd.f32 %v1539_v15, %v1526_v48  ;;  %v1543_v7 = vadd.f32 %v1540_v17, %v1527_v62  ;;  %v4293_v48 = vld [vmem:[#allocation51_spill] sm:$0xff]  ;;  %v4294_v15 = vld [vmem:[#allocation66_spill] sm:$0xff] }
 0x28d   :  { %v1603_v62 = vmul.f32 %v1494_v28, %v4293_v48  ;;  %v1604_v17 = vmul.f32 %v1494_v28, %v4294_v15  ;;  %v4299_v15 = vld [vmem:[#allocation96_spill] sm:$0xff] }
 0x28e   :  { %v1558_v1 = vadd.f32 %v1555_v57, %v1542_v11  ;;  %v1559_v5 = vadd.f32 %v1556_v22, %v1543_v7  ;;  %v4295_v11 = vld [vmem:[#allocation13_spill] sm:$0xff]  ;;  %v4296_v57 = vld [vmem:[#allocation82_spill] sm:$0xff]  ;;  %v1636_v60 = vmul.f32 %v1506_v25, %v4299_v15  ;;  %v1495_v15 = vmul.f32 %v1494_v28, %v3328_v33 }
 0x28f   :  { %v1525_v7 = vmul.f32 %v1464_v18, %v4295_v11  ;;  %v1471_v22 = vmul.f32 %v1470_v54, %v4296_v57  ;;  %v4300_v18 = vld [vmem:[#allocation83_spill] sm:$0xff] }
 0x290   :  { %v1574_v13 = vadd.f32 %v1571_v52, %v1558_v1  ;;  %v1575_v26 = vadd.f32 %v1572_v12, %v1559_v5  ;;  %v1466_v1 = vadd.f32 %v1465_v8, %v3249_v56  ;;  %v1619_v12 = vmul.f32 %v1500_v29, %v4227_v6 }
 0x291   :  { %v1483_v57 = vmul.f32 %v3623_v55, %v4300_v18  ;;  %v1528_v8 = vadd.f32 %v1525_v7, %v3016_v45  ;;  %v1501_v7 = vmul.f32 %v1500_v29, %v3323_v47 }
 0x292   :  { %v1590_v40 = vadd.f32 %v1587_v10, %v1574_v13  ;;  %v1591_v20 = vadd.f32 %v1588_v58, %v1575_v26  ;;  %v1472_v63 = vadd.f32 %v1471_v22, %v1466_v1  ;;  %v1477_v13 = vmul.f32 %v1476_v36, %v4297_v21  ;;  %v4298_v58 = vld [vmem:[#allocation86_spill] sm:$0xff]  ;;  %v4301_v1 = vld [vmem:[#allocation91_spill] sm:$0xff] }
 0x293   :  { %v1635_v48 = vmul.f32 %v1506_v25, %v4298_v58  ;;  %v1541_v22 = vmul.f32 %v1470_v54, %v3132_v4  ;;  %v1507_v54 = vmul.f32 %v1506_v25, %v3337_v3 }
 0x294   :  { %v1606_v5 = vadd.f32 %v1603_v62, %v1590_v40  ;;  %v1607_v52 = vadd.f32 %v1604_v17, %v1591_v20  ;;  %v1478_v11 = vadd.f32 %v1477_v13, %v1472_v63  ;;  %v1489_v62 = vmul.f32 %v1488_v24, %v3301_v38 }
 0x295   :  { %v1544_v58 = vadd.f32 %v1541_v22, %v1528_v8  ;;  %v1573_v13 = vmul.f32 %v3623_v55, %v3169_v61 }
 0x296   :  { %v1622_v26 = vadd.f32 %v1619_v12, %v1606_v5  ;;  %v1623_v10 = vadd.f32 %v1620_v46, %v1607_v52  ;;  %v1484_v17 = vadd.f32 %v1483_v57, %v1478_v11  ;;  %v4302_v46 = vld [vmem:[#allocation94_spill] sm:$0xff] }
 0x298   :  { %v1638_v40 = vadd.f32 %v1635_v48, %v1622_v26  ;;  %v1639_v20 = vadd.f32 %v1636_v60, %v1623_v10  ;;  %v1490_v12 = vadd.f32 %v1489_v62, %v1484_v17  ;;  %v1557_v60 = vmul.f32 %v1476_v36, %v3118_v53 }
 0x299   :  { %v1589_v10 = vmul.f32 %v1488_v24, %v3180_v23  ;;  %v1605_v36 = vmul.f32 %v1494_v28, %v3171_v27  ;;  %v1637_v17 = vmul.f32 %v1506_v25, %v3224_v2 }
 0x29a   :  { %v1641_v5 = vadd.f32 %v1638_v40, %v4301_v1  ;;  %v1648_v52 = vadd.f32 %v1639_v20, %v4302_v46  ;;  %v1496_v63 = vadd.f32 %v1495_v15, %v1490_v12  ;;  %v1560_v11 = vadd.f32 %v1557_v60, %v1544_v58  ;;  %v4303_v46 = vld [vmem:[#allocation80_spill] sm:$0xff] }
 0x29b   :  { %v1621_v58 = vmul.f32 %v1500_v29, %v3219_v49 }
 0x29c   :  { %v1947_v21 = vmul.f32 -1.442695, %v1641_v5  ;;  %v1948_v18 = vmul.f32 -1.442695, %v1648_v52  ;;  %v1502_v48 = vadd.f32 %v1501_v7, %v1496_v63  ;;  %v1576_v26 = vadd.f32 %v1573_v13, %v1560_v11 }
 0x29e   :  { %2068 = vpow2.f32 %v1947_v21  ;;  %v1508_v57 = vadd.f32 %v1507_v54, %v1502_v48  ;;  %v1592_v15 = vadd.f32 %v1589_v10, %v1576_v26 }
 0x29f   :  { %2070 = vpow2.f32 %v1948_v18 }
 0x2a0   :  { %1510 = vst [vmem:[#allocation2 + $0x28] sm:$0xff] %v1508_v57  ;;  %v1608_v18 = vadd.f32 %v1605_v36, %v1592_v15 }
 0x2a2   :  { %v1624_v62 = vadd.f32 %v1621_v58, %v1608_v18  ;;  %v4304_v18 = vld [vmem:[#allocation71_spill] sm:$0xff] }
 0x2a3   :  { %v4305_v58 = vld [vmem:[#allocation31_spill] sm:$0xff] }
 0x2a4   :  { %v1640_v55 = vadd.f32 %v1637_v17, %v1624_v62  ;;  %v4306_v62 = vld [vmem:[#allocation47_spill] sm:$0xff] }
 0x2a8   :  { %v2069_v8 = vpop.eup %2068 }
 0x2a9   :  { %v2071_v40 = vpop.eup %2070  ;;  %v1645_v20 = vadd.f32 1.0, %v2069_v8 }
 0x2aa   :  { %v1652_v21 = vadd.f32 1.0, %v2071_v40 }
 0x2ab   :  { %2072 = vrcp.f32 %v1645_v20 }
 0x2ac   :  { %2074 = vrcp.f32 %v1652_v21 }
 0x2b5   :  { %v2073_v22 = vpop.eup %2072 }
 0x2b6   :  { %v2075_v1 = vpop.eup %2074  ;;  %v1655_v5 = vmul.f32 %v2073_v22, %v1640_v55  ;;  %v4307_v55 = vld [vmem:[#allocation84_spill] sm:$0xff] }
 0x2b7   :  { %v1660_v24 = vmul.f32 %v2075_v1, %v3611_v44  ;;  %v1658_v12 = vsub.f32 1.0, %v2075_v1 }
 0x2b8   :  { %v1656_v52 = vadd.f32 %v1655_v5, %v4303_v46  ;;  %v4309_v46 = vld [vmem:[#allocation66_spill] sm:$0xff] }
 0x2ba   :  { %2076 = vtanh.f32 %v1656_v52  ;;  %v4310_v52 = vld [vmem:[#allocation13_spill] sm:$0xff] }
 0x2c4   :  { %v2077_v28 = vpop.eup %2076 }
 0x2c5   :  { %v1659_v63 = vmul.f32 %v2077_v28, %v1658_v12  ;;  %v4311_v28 = vld [vmem:[#allocation82_spill] sm:$0xff] }
 0x2c7   :  { %v3675_v7 = vadd.f32 %v1660_v24, %v1659_v63 }
 0x2c9   :  { %v1665_v29 = vrot.slane %v3675_v7, %v4206_v30  ;;  %v1671_v25 = vrot.slane %v3675_v7, %v4207_v51  ;;  %v1677_v60 = vrot.slane %v3675_v7, %v4208_v16  ;;  %v3687_v54 = vrot.slane %v3675_v7, %v4210_v37 }
 0x2ca   :  { %v1689_v10 = vrot.slane %v3675_v7, %v4214_v34  ;;  %v1695_v40 = vrot.slane %v3675_v7, %v4217_v35  ;;  %v1707_v17 = vrot.slane %v3675_v7, %v4306_v62 }
 0x2cb   :  { %v1724_v48 = vmul.f32 %v1665_v29, %v4209_v59  ;;  %v1725_v44 = vmul.f32 %v1665_v29, %v2821_v0  ;;  %v1740_v13 = vmul.f32 %v1671_v25, %v4212_v32  ;;  %v1741_v26 = vmul.f32 %v1671_v25, %v2936_v42 }
 0x2cc   :  { %v1756_v59 = vmul.f32 %v1677_v60, %v4215_v41  ;;  %v1757_v0 = vmul.f32 %v1677_v60, %v3079_v39  ;;  %v1773_v42 = vmul.f32 %v3687_v54, %v2996_v50  ;;  %v1701_v32 = vrot.slane %v3675_v7, %v4244_v9 }
 0x2cd   :  { %v1727_v11 = vadd.f32 %v1724_v48, %v4211_v19  ;;  %v1728_v57 = vadd.f32 %v1725_v44, %v2897_v43  ;;  %v1772_v43 = vmul.f32 %v3687_v54, %v4218_v31  ;;  %v1788_v41 = vmul.f32 %v1689_v10, %v4304_v18  ;;  %v4308_v31 = vld [vmem:[#allocation51_spill] sm:$0xff] }
 0x2ce   :  { %v1789_v39 = vmul.f32 %v1689_v10, %v4305_v58  ;;  %v1666_v22 = vmul.f32 %v1665_v29, %v4307_v55  ;;  %v1804_v24 = vmul.f32 %v1695_v40, %v4308_v31  ;;  %v1805_v50 = vmul.f32 %v1695_v40, %v4309_v46 }
 0x2cf   :  { %v1743_v8 = vadd.f32 %v1740_v13, %v1727_v11  ;;  %v1744_v15 = vadd.f32 %v1741_v26, %v1728_v57  ;;  %v1726_v12 = vmul.f32 %v1665_v29, %v4310_v52  ;;  %v1672_v63 = vmul.f32 %v1671_v25, %v4311_v28  ;;  %v4315_v29 = vld [vmem:[#allocation83_spill] sm:$0xff] }
 0x2d0   :  { %v1667_v48 = vadd.f32 %v1666_v22, %v3249_v56  ;;  %v1820_v57 = vmul.f32 %v1701_v32, %v4227_v6  ;;  %v1821_v13 = vmul.f32 %v1701_v32, %v4228_v14  ;;  %v1690_v6 = vmul.f32 %v1689_v10, %v3301_v38  ;;  %v4316_v22 = vld [vmem:[#allocation92_spill] sm:$0xff] }
 0x2d1   :  { %v1759_v20 = vadd.f32 %v1756_v59, %v1743_v8  ;;  %v1760_v19 = vadd.f32 %v1757_v0, %v1744_v15  ;;  %v4312_v8 = vld [vmem:[#allocation85_spill] sm:$0xff]  ;;  %v1729_v18 = vadd.f32 %v1726_v12, %v3016_v45  ;;  %v1696_v46 = vmul.f32 %v1695_v40, %v3328_v33 }
 0x2d2   :  { %v1673_v26 = vadd.f32 %v1672_v63, %v1667_v48  ;;  %v1678_v15 = vmul.f32 %v1677_v60, %v4312_v8  ;;  %v1702_v45 = vmul.f32 %v1701_v32, %v3323_v47  ;;  %v1758_v12 = vmul.f32 %v1677_v60, %v3118_v53 }
 0x2d3   :  { %v1775_v36 = vadd.f32 %v1772_v43, %v1759_v20  ;;  %v1776_v21 = vadd.f32 %v1773_v42, %v1760_v19  ;;  %v4313_v20 = vld [vmem:[#allocation86_spill] sm:$0xff]  ;;  %v4314_v43 = vld [vmem:[#allocation96_spill] sm:$0xff]  ;;  %v1806_v53 = vmul.f32 %v1695_v40, %v3171_v27 }
 0x2d4   :  { %v1836_v19 = vmul.f32 %v1707_v17, %v4313_v20  ;;  %v1837_v42 = vmul.f32 %v1707_v17, %v4314_v43  ;;  %v1822_v43 = vmul.f32 %v1701_v32, %v3219_v49 }
 0x2d5   :  { %v1791_v1 = vadd.f32 %v1788_v41, %v1775_v36  ;;  %v1792_v5 = vadd.f32 %v1789_v39, %v1776_v21  ;;  %v1684_v36 = vmul.f32 %v3687_v54, %v4315_v29  ;;  %v1679_v21 = vadd.f32 %v1678_v15, %v1673_v26 }
 0x2d6   :  { %v1742_v39 = vmul.f32 %v1671_v25, %v3132_v4  ;;  %v1708_v4 = vmul.f32 %v1707_v17, %v3337_v3  ;;  %v1790_v26 = vmul.f32 %v1689_v10, %v3180_v23  ;;  %v4318_v10 = vld [vmem:[#allocation81_spill] sm:$0xff] }
 0x2d7   :  { %v1807_v44 = vadd.f32 %v1804_v24, %v1791_v1  ;;  %v1808_v11 = vadd.f32 %v1805_v50, %v1792_v5  ;;  %v1685_v14 = vadd.f32 %v1684_v36, %v1679_v21  ;;  %v4317_v5 = vld [vmem:[#allocation95_spill] sm:$0xff]  ;;  %v1838_v36 = vmul.f32 %v1707_v17, %v3224_v2 }
 0x2d8   :  { %v1745_v50 = vadd.f32 %v1742_v39, %v1729_v18 }
 0x2d9   :  { %v1823_v59 = vadd.f32 %v1820_v57, %v1807_v44  ;;  %v1824_v0 = vadd.f32 %v1821_v13, %v1808_v11  ;;  %v1691_v24 = vadd.f32 %v1690_v6, %v1685_v14  ;;  %v1774_v57 = vmul.f32 %v3687_v54, %v3169_v61 }
 0x2da   :  { %v1761_v25 = vadd.f32 %v1758_v12, %v1745_v50 }
 0x2db   :  { %v1839_v41 = vadd.f32 %v1836_v19, %v1823_v59  ;;  %v1840_v58 = vadd.f32 %v1837_v42, %v1824_v0  ;;  %v1697_v48 = vadd.f32 %v1696_v46, %v1691_v24 }
 0x2dc   :  { %v1777_v13 = vadd.f32 %v1774_v57, %v1761_v25 }
 0x2dd   :  { %v1842_v1 = vadd.f32 %v1839_v41, %v4316_v22  ;;  %v1849_v31 = vadd.f32 %v1840_v58, %v4317_v5  ;;  %v1703_v44 = vadd.f32 %v1702_v45, %v1697_v48 }
 0x2de   :  { %v1793_v59 = vadd.f32 %v1790_v26, %v1777_v13 }
 0x2df   :  { %v1950_v52 = vmul.f32 -1.442695, %v1842_v1  ;;  %v1951_v63 = vmul.f32 -1.442695, %v1849_v31  ;;  %v1709_v11 = vadd.f32 %v1708_v4, %v1703_v44 }
 0x2e0   :  { %v1809_v19 = vadd.f32 %v1806_v53, %v1793_v59 }
 0x2e1   :  { %2078 = vpow2.f32 %v1950_v52  ;;  %1711 = vst [vmem:[#allocation2 + $0x30] sm:$0xff] %v1709_v11 }
 0x2e2   :  { %2080 = vpow2.f32 %v1951_v63  ;;  %v1825_v42 = vadd.f32 %v1822_v43, %v1809_v19 }
 0x2e4   :  { %v1841_v61 = vadd.f32 %v1838_v36, %v1825_v42 }
 0x2eb   :  { %v2079_v15 = vpop.eup %2078 }
 0x2ec   :  { %v2081_v0 = vpop.eup %2080  ;;  %v1846_v20 = vadd.f32 1.0, %v2079_v15 }
 0x2ed   :  { %v1853_v60 = vadd.f32 1.0, %v2081_v0 }
 0x2ee   :  { %2082 = vrcp.f32 %v1846_v20 }
 0x2ef   :  { %2084 = vrcp.f32 %v1853_v60 }
 0x2f8   :  { %v2083_v54 = vpop.eup %2082 }
 0x2f9   :  { %v2085_v21 = vpop.eup %2084  ;;  %v1856_v18 = vmul.f32 %v2083_v54, %v1841_v61 }
 0x2fa   :  { %v1861_v23 = vmul.f32 %v2085_v21, %v3675_v7  ;;  %v1859_v58 = vsub.f32 1.0, %v2085_v21 }
 0x2fb   :  { %v1857_v41 = vadd.f32 %v1856_v18, %v4318_v10 }
 0x2fd   :  { %2086 = vtanh.f32 %v1857_v41 }
 0x307   :  { %v2087_v27 = vpop.eup %2086 }
 0x308   :  { %v1860_v40 = vmul.f32 %v2087_v27, %v1859_v58 }
 0x30a   :  { %v1862_v6 = vadd.f32 %v1861_v23, %v1860_v40 }
 0x30c   :  { %v1872_v14 = vrot.slane %v1862_v6, %v4207_v51  ;;  %v1866_v49 = vrot.slane %v1862_v6, %v4206_v30  ;;  %v1878_v2 = vrot.slane %v1862_v6, %v4208_v16  ;;  %v1884_v7 = vrot.slane %v1862_v6, %v4210_v37 }
 0x30d   :  { %v1890_v5 = vrot.slane %v1862_v6, %v4214_v34  ;;  %v1896_v30 = vrot.slane %v1862_v6, %v4217_v35  ;;  %v1902_v16 = vrot.slane %v1862_v6, %v4244_v9  ;;  %v1908_v37 = vrot.slane %v1862_v6, %v4306_v62 }
 0x30e   :  { %v1867_v32 = vmul.f32 %v1866_v49, %v4307_v55  ;;  %v1873_v17 = vmul.f32 %v1872_v14, %v4311_v28  ;;  %v1879_v1 = vmul.f32 %v1878_v2, %v4312_v8  ;;  %v1885_v31 = vmul.f32 %v1884_v7, %v4315_v29 }
 0x30f   :  { %v1891_v55 = vmul.f32 %v1890_v5, %v3301_v38  ;;  %v1903_v8 = vmul.f32 %v1902_v16, %v3323_v47  ;;  %v1909_v29 = vmul.f32 %v1908_v37, %v3337_v3 }
 0x310   :  { %v1868_v39 = vadd.f32 %v1867_v32, %v3249_v56  ;;  %v1897_v56 = vmul.f32 %v1896_v30, %v3328_v33 }
 0x312   :  { %v1874_v22 = vadd.f32 %v1873_v17, %v1868_v39 }
 0x314   :  { %v1880_v51 = vadd.f32 %v1879_v1, %v1874_v22 }
 0x316   :  { %v1886_v24 = vadd.f32 %v1885_v31, %v1880_v51 }
 0x318   :  { %v1892_v28 = vadd.f32 %v1891_v55, %v1886_v24 }
 0x31a   :  { %v1898_v46 = vadd.f32 %v1897_v56, %v1892_v28 }
 0x31c   :  { %v1904_v34 = vadd.f32 %v1903_v8, %v1898_v46 }
 0x31e   :  { %v1910_v50 = vadd.f32 %v1909_v29, %v1904_v34 }
 0x320   :  { %1912 = vst [vmem:[#allocation2 + $0x38] sm:$0xff] %v1910_v50 }
 0x321   :  { %2099 = shalt.err (!%p2096_p4)
}
 0x322   :  { %s2100_s20 = scalar_lea.hbm %s3775_s7, 1024 }
 0x323   :  { %p2101_p5 = scmp.ne.s32.totalorder %s3775_s7, %s2100_s20  ;;  %p2104_p6 = scmp.lt.u32.totalorder %s2100_s20, %s3775_s7 }
 0x325   :  { %p2106_p7 = pnand %p2104_p6, %p2101_p5 }
 0x327   :  { %2109 = shalt.err (!%p2106_p7)
}
 0x328   :  { %s2121_s1 = smov 128   ;;  %s2122_s2 = smov 8  }
 0x329   :  { %1924 = dma.vmem_to_hbm [thread:$0]  %s1919_s16, 1024, %s3775_s7, [#allocation3], %s2121_s1, %s2121_s1, %s2122_s2  }
 0x32a   :  { %2110 = dma.done.wait [#allocation3], 1024  }
 0x32b   :  { %2111 = vsyncadd [#allocation3], 4294966272 }
 0x32c   :  { %1928 = vsyncpa [#allocation3], 1 }

</bundles_post_ra>
